<compile_context>
chip_gen: v6e
topology: v6e:2x2x1
jax: 0.10.0
libtpu: 0.0.40
codegen_flags: <defaults>
</compile_context>

<pallas_src>
import functools

import jax
import jax.numpy as jnp
from jax import lax
from jax.experimental import pallas as pl
from jax.experimental.pallas import tpu as pltpu

_LANE = 128
_SUBLANE = 8


def _round_up(v, m):
    return ((v + m - 1) // m) * m


def _fold_bn(gamma, beta, mean, var, eps=1e-5):
    scale = gamma / jnp.sqrt(var + eps)
    return scale, beta - mean * scale


def _pad_to(a, shape):
    return jnp.pad(a, [(0, s - d) for d, s in zip(a.shape, shape)])


# ----------------------------------------------------------------------------
# Fused kernel: 1x1 expand + ReLU6  ->  3x3 depthwise + ReLU6  ->  1x1 project
#               (+ optional residual), all in VMEM per (batch, H-tile).
# ----------------------------------------------------------------------------
def _bottleneck_kernel(x_ref, w1_ref, b1_ref, w2_ref, b2_ref, w3_ref, b3_ref,
                       *rest, stride, th_out, H, W, use_shortcut):
    # x_ref : (1, hp, wp, CinP)   spatially + channel padded input (resident)
    # w1_ref: (CinP, MidP)   b1_ref: (1, MidP)    -- BN1 scale folded into w1
    # w2_ref: (9, MidP)      b2_ref: (1, MidP)    -- BN2 scale folded into w2
    # w3_ref: (MidP, CoutP)  b3_ref: (1, CoutP)   -- BN3 scale folded into w3
    # rest  : (res_ref, o_ref) if use_shortcut else (o_ref,)
    if use_shortcut:
        res_ref, o_ref = rest
    else:
        (o_ref,) = rest

    j = pl.program_id(1)
    Wp = x_ref.shape[2]
    MidP = w1_ref.shape[1]
    CoutP = o_ref.shape[3]
    Wo = o_ref.shape[2]                         # sublane-padded output width
    th_in = (th_out - 1) * stride + 3           # input rows needed (incl. halo)
    row0 = j * (th_out * stride)                # first padded input row of tile
    if (th_out * stride) % _SUBLANE == 0:
        row0 = pl.multiple_of(row0, _SUBLANE)   # aligned dynamic row window

    # ---- stage 1: 1x1 expand (BN folded) + ReLU6 on the halo'd row window ----
    xw = x_ref[0, pl.ds(row0, th_in), :, :]                      # (th_in, Wp, CinP)
    e = jnp.dot(xw.reshape(th_in * Wp, -1), w1_ref[...],
                preferred_element_type=jnp.float32)              # (th_in*Wp, MidP)
    e = jnp.clip(e + b1_ref[...], 0.0, 6.0)
    e = e.reshape(th_in, Wp, MidP)
    # Depthwise zero-padding lives in the *expanded* domain: zero every spatial
    # padding position (expand(0) == relu6(b1) != 0 there), incl. the padded
    # tail rows of a non-divisible Ho.
    prow = row0 + lax.broadcasted_iota(jnp.int32, (th_in, Wp, 1), 0)
    pcol = lax.broadcasted_iota(jnp.int32, (th_in, Wp, 1), 1)
    valid = (prow >= 1) & (prow <= H) & (pcol >= 1) & (pcol <= W)
    # bf16 `e` in the bf16 path halves spill / tap-shift traffic (f32 on v5e by
    # simply passing compute_dtype=float32).
    e = jnp.where(valid, e, 0.0).astype(w1_ref.dtype)

    # ---- stage 2: 3x3 depthwise conv (stride), BN folded, + ReLU6 ------------
    # Column (kw) shifts hit the sublane axis -> hoist them: 3 (possibly
    # strided) column slices built once; the per-tap row (kh) slices are cheap
    # outer-dim selects.  For stride=2 this also subsamples columns once.
    w2 = w2_ref[...]                                             # (9, MidP)
    col_len = (Wo - 1) * stride + 1
    e_cols = [lax.slice(e, (0, kw, 0), (th_in, kw + col_len, MidP),
                        (1, stride, 1)) for kw in range(3)]      # (th_in, Wo, MidP)
    row_len = (th_out - 1) * stride + 1
    acc = jnp.zeros((th_out, Wo, MidP), jnp.float32)
    for kh in range(3):
        for kw in range(3):
            tap = lax.slice(e_cols[kw], (kh, 0, 0),
                            (kh + row_len, Wo, MidP),
                            (stride, 1, 1))                      # (th_out, Wo, MidP)
            acc = acc + (tap * w2[kh * 3 + kw]).astype(jnp.float32)
    acc = jnp.clip(acc + b2_ref[...], 0.0, 6.0)

    # ---- stage 3: 1x1 project (BN folded, no activation) + optional residual -
    y = jnp.dot(acc.reshape(th_out * Wo, MidP).astype(w3_ref.dtype), w3_ref[...],
                preferred_element_type=jnp.float32)              # (th_out*Wo, CoutP)
    y = y + b3_ref[...]
    if use_shortcut:  # residual block is aligned identically to the output
        y = y + res_ref[0].reshape(th_out * Wo, CoutP).astype(jnp.float32)
    o_ref[0] = y.reshape(th_out, Wo, CoutP).astype(o_ref.dtype)


# ----------------------------------------------------------------------------
# Host wrapper: BN folding, lane/sublane padding, single pallas_call.
# ----------------------------------------------------------------------------
def linear_bottleneck_forward(params, x_nchw, stride, *,
                              compute_dtype=jnp.bfloat16, row_tile=16):
    """Fused MobileNetV2 LinearBottleneck forward (eval-mode BN). NCHW in/out.

    row_tile is a per-generation knob: 16-32 on v5e/v6e (128 MiB VMEM),
    keep at/below 16 on v7x (64 MiB VMEM).
    """
    mid, in_c = params["w1"].shape[:2]
    c = params["w3"].shape[0]
    use_shortcut = (stride == 1) and (in_c == c)

    N, _, H, W = x_nchw.shape
    Ho = (H + 2 - 3) // stride + 1
    Wo = (W + 2 - 3) // stride + 1
    cin_p = _round_up(in_c, _LANE)
    mid_p = _round_up(mid, _LANE)
    cout_p = _round_up(c, _LANE)
    wo_p = _round_up(Wo, _SUBLANE)                 # sublane-dense compute width
    th_out = min(row_tile, Ho)
    grid_h = pl.cdiv(Ho, th_out)                   # masked tail instead of tiny tiles
    ho_p = grid_h * th_out
    th_in = (th_out - 1) * stride + 3
    # Padded input extents: enough rows/cols for the last tile's receptive field.
    hp = max(H + 2, (ho_p - 1) * stride + 3)
    wp = _round_up(max(W + 2, (wo_p - 1) * stride + 3), _SUBLANE)

    # Fold the BN scale into the conv weights; keep only per-channel biases.
    s1, b1 = _fold_bn(*params["bn1"])
    s2, b2 = _fold_bn(*params["bn2"])
    s3, b3 = _fold_bn(*params["bn3"])
    w1 = params["w1"][:, :, 0, 0].T * s1[None, :]                        # (in_c, mid)
    w2 = jnp.transpose(params["w2"][:, 0], (1, 2, 0)).reshape(9, mid) * s2[None, :]
    w3 = params["w3"][:, :, 0, 0].T * s3[None, :]                        # (mid, c)

    w1p = _pad_to(w1, (cin_p, mid_p)).astype(compute_dtype)
    w2p = _pad_to(w2, (9, mid_p)).astype(compute_dtype)
    w3p = _pad_to(w3, (mid_p, cout_p)).astype(compute_dtype)
    b1p = _pad_to(b1.reshape(1, mid), (1, mid_p)).astype(jnp.float32)
    b2p = _pad_to(b2.reshape(1, mid), (1, mid_p)).astype(jnp.float32)
    b3p = _pad_to(b3.reshape(1, c), (1, cout_p)).astype(jnp.float32)

    # TODO(synk): keep NHWC end-to-end across stacked blocks so these host-side
    #             transposes/pads amortize over the whole network.
    x_nhwc = jnp.transpose(x_nchw, (0, 2, 3, 1)).astype(compute_dtype)
    xp = jnp.pad(x_nhwc, ((0, 0), (1, hp - H - 1), (1, wp - W - 1),
                          (0, cin_p - in_c)))

    kernel = functools.partial(_bottleneck_kernel, stride=stride, th_out=th_out,
                               H=H, W=W, use_shortcut=use_shortcut)

    const2 = lambda n, j: (0, 0)
    inputs = [xp, w1p, b1p, w2p, b2p, w3p, b3p]
    in_specs = [
        pl.BlockSpec((1, hp, wp, cin_p), lambda n, j: (n, 0, 0, 0)),
        # Grid-constant weights/biases: single-buffered to save VMEM.
        pl.BlockSpec((cin_p, mid_p), const2, pipeline_mode=pl.Buffered(1)),
        pl.BlockSpec((1, mid_p), const2, pipeline_mode=pl.Buffered(1)),
        pl.BlockSpec((9, mid_p), const2, pipeline_mode=pl.Buffered(1)),
        pl.BlockSpec((1, mid_p), const2, pipeline_mode=pl.Buffered(1)),
        pl.BlockSpec((mid_p, cout_p), const2, pipeline_mode=pl.Buffered(1)),
        pl.BlockSpec((1, cout_p), const2, pipeline_mode=pl.Buffered(1)),
    ]
    if use_shortcut:
        # Residual blocked identically to the output -> aligned block load, no
        # sublane-misaligned in-kernel slice.  Only DMA'd when stride == 1.
        res = jnp.pad(x_nhwc, ((0, 0), (0, ho_p - H), (0, wo_p - W),
                               (0, cout_p - in_c)))
        inputs.append(res)
        in_specs.append(
            pl.BlockSpec((1, th_out, wo_p, cout_p), lambda n, j: (n, j, 0, 0)))

    # Explicit scoped-VMEM budget: 2x pipelined blocks + weights + in-kernel
    # intermediates, floored at 32 MiB and capped at 48 MiB (v7x headroom).
    ib = jnp.dtype(compute_dtype).itemsize
    in_blk = hp * wp * cin_p * ib
    out_blk = th_out * wo_p * cout_p * ib
    res_blk = out_blk if use_shortcut else 0
    wts = (cin_p * mid_p + 9 * mid_p + mid_p * cout_p) * ib \
        + (2 * mid_p + cout_p) * 4
    interm = (th_in * wp * mid_p * 4                 # f32 expand before cast
              + 4 * th_in * wp * mid_p * ib          # e + 3 column-shift copies
              + th_out * wo_p * mid_p * 4            # depthwise accumulator
              + 2 * th_out * wo_p * cout_p * 4)      # stage-3 result + slack
    vmem_est = 2 * (in_blk + out_blk + res_blk) + wts + interm
    vmem_limit = int(min(max(2 * vmem_est, 32 * 2**20), 48 * 2**20))

    out = pl.pallas_call(
        kernel,
        out_shape=jax.ShapeDtypeStruct((N, ho_p, wo_p, cout_p), compute_dtype),
        grid=(N, grid_h),
        in_specs=in_specs,
        out_specs=pl.BlockSpec((1, th_out, wo_p, cout_p), lambda n, j: (n, j, 0, 0)),
        compiler_params=pltpu.CompilerParams(
            dimension_semantics=("parallel", "parallel"),
            vmem_limit_bytes=vmem_limit),
    )(*inputs)

    # Drop row/col/channel padding, back to NCHW (PyTorch convention).
    return jnp.transpose(out[:, :Ho, :Wo, :c], (0, 3, 1, 2))


# ----------------------------------------------------------------------------
# Deterministic parameter init (PyTorch OIHW layouts + BN running stats)
# ----------------------------------------------------------------------------
def init_params(key, in_c, c, t):
    mid = in_c * t
    k1, k2, k3, kb = jax.random.split(key, 4)

    def bn_init(k, n):
        ka, kb_, kc, kd = jax.random.split(k, 4)
        gamma = 1.0 + 0.1 * jax.random.normal(ka, (n,), jnp.float32)
        beta = 0.1 * jax.random.normal(kb_, (n,), jnp.float32)
        mean = 0.1 * jax.random.normal(kc, (n,), jnp.float32)
        var = 1.0 + 0.1 * jax.random.uniform(kd, (n,), jnp.float32)
        return (gamma, beta, mean, var)

    kb1, kb2, kb3 = jax.random.split(kb, 3)
    return {
        "w1": jax.random.normal(k1, (mid, in_c, 1, 1), jnp.float32) / jnp.sqrt(in_c),
        "w2": jax.random.normal(k2, (mid, 1, 3, 3), jnp.float32) / 3.0,
        "w3": jax.random.normal(k3, (c, mid, 1, 1), jnp.float32) / jnp.sqrt(mid),
        "bn1": bn_init(kb1, mid),
        "bn2": bn_init(kb2, mid),
        "bn3": bn_init(kb3, c),
    }


# ----------------------------------------------------------------------------
# Pure-JAX reference (lax.conv) for correctness checking
# ----------------------------------------------------------------------------
def reference_forward(params, x_nchw, stride):
    x = jnp.transpose(x_nchw, (0, 2, 3, 1))
    dn = ("NHWC", "HWIO", "NHWC")

    def bn_apply(v, bnp):
        s, b = _fold_bn(*bnp)
        return v * s + b

    w1 = jnp.transpose(params["w1"], (2, 3, 1, 0))
    y = lax.conv_general_dilated(x, w1, (1, 1), "VALID", dimension_numbers=dn)
    y = jnp.clip(bn_apply(y, params["bn1"]), 0.0, 6.0)

    mid = params["w1"].shape[0]
    w2 = jnp.transpose(params["w2"], (2, 3, 1, 0))  # (3,3,1,mid)
    y = lax.conv_general_dilated(y, w2, (stride, stride), ((1, 1), (1, 1)),
                                 dimension_numbers=dn, feature_group_count=mid)
    y = jnp.clip(bn_apply(y, params["bn2"]), 0.0, 6.0)

    w3 = jnp.transpose(params["w3"], (2, 3, 1, 0))
    y = lax.conv_general_dilated(y, w3, (1, 1), "VALID", dimension_numbers=dn)
    y = bn_apply(y, params["bn3"])

    if stride == 1 and x.shape[-1] == y.shape[-1]:
        y = y + x
    return jnp.transpose(y, (0, 3, 1, 2))


if __name__ == "__main__":
    key = jax.random.PRNGKey(0)
    pkey, xkey, pkey2, xkey2 = jax.random.split(key, 4)

    # --- case 1: LinearBottleneck(in_c=4, c=4, t=6, stride=1) -> shortcut on --
    in_c, c, t, stride = 4, 4, 6, 1
    params = init_params(pkey, in_c, c, t)
    x = jax.random.normal(xkey, (2, in_c, 16, 16), jnp.float32)  # NCHW

    ref = jax.block_until_ready(reference_forward(params, x, stride))

    out = jax.block_until_ready(
        linear_bottleneck_forward(params, x, stride, compute_dtype=jnp.float32))
    assert out.shape == ref.shape == (2, c, 16, 16), (out.shape, ref.shape)
    max_err = float(jnp.max(jnp.abs(out - ref)))
    assert jnp.allclose(out, ref, rtol=1e-4, atol=1e-4), max_err

    # bfloat16 path (halved HBM traffic, native bf16 MXU) -- loose check
    out_bf16 = jax.block_until_ready(
        linear_bottleneck_forward(params, x, stride, compute_dtype=jnp.bfloat16))
    diff_bf16 = jnp.abs(out_bf16.astype(jnp.float32) - ref)
    assert jnp.all(jnp.isfinite(diff_bf16)) and float(jnp.max(diff_bf16)) < 0.5, \
        float(jnp.max(diff_bf16))

    # --- case 2: stride=2, no shortcut, non-8-aligned Wo (14x14 -> 7x7) ------
    in_c2, c2, t2, stride2 = 4, 8, 6, 2
    params2 = init_params(pkey2, in_c2, c2, t2)
    x2 = jax.random.normal(xkey2, (2, in_c2, 14, 14), jnp.float32)

    ref2 = jax.block_until_ready(reference_forward(params2, x2, stride2))
    out2 = jax.block_until_ready(
        linear_bottleneck_forward(params2, x2, stride2, compute_dtype=jnp.float32))
    assert out2.shape == ref2.shape == (2, c2, 7, 7), (out2.shape, ref2.shape)
    max_err2 = float(jnp.max(jnp.abs(out2 - ref2)))
    assert jnp.allclose(out2, ref2, rtol=1e-4, atol=1e-4), max_err2

    print("KERNEL_OK")
</pallas_src>

<mosaic_0001>
module attributes {stable_mosaic.version = 11 : i64} {
  func.func @_bottleneck_kernel(%arg0: i32, %arg1: i32, %arg2: memref<1x18x24x128xf32, #tpu.memory_space<vmem>>, %arg3: memref<128x128xf32, #tpu.memory_space<vmem>>, %arg4: memref<1x128xf32, #tpu.memory_space<vmem>>, %arg5: memref<9x128xf32, #tpu.memory_space<vmem>>, %arg6: memref<1x128xf32, #tpu.memory_space<vmem>>, %arg7: memref<128x128xf32, #tpu.memory_space<vmem>>, %arg8: memref<1x128xf32, #tpu.memory_space<vmem>>, %arg9: memref<1x16x16x128xf32, #tpu.memory_space<vmem>>, %arg10: memref<1x16x16x128xf32, #tpu.memory_space<vmem>>) attributes {dimension_semantics = [#tpu.dimension_semantics<parallel>, #tpu.dimension_semantics<parallel>], iteration_bounds = array<i64: 2, 1>, scalar_prefetch = 0 : i64, scratch_operands = 0 : i64, tpu.core_type = #tpu.core_type<tc>, window_params = [{transform_indices = @transform_0, window_bounds = array<i64: 1, 18, 24, 128>}, {pipeline_mode = #tpu.pipeline_mode<synchronous>, transform_indices = @transform_1, window_bounds = array<i64: 128, 128>}, {pipeline_mode = #tpu.pipeline_mode<synchronous>, transform_indices = @transform_2, window_bounds = array<i64: 1, 128>}, {pipeline_mode = #tpu.pipeline_mode<synchronous>, transform_indices = @transform_3, window_bounds = array<i64: 9, 128>}, {pipeline_mode = #tpu.pipeline_mode<synchronous>, transform_indices = @transform_4, window_bounds = array<i64: 1, 128>}, {pipeline_mode = #tpu.pipeline_mode<synchronous>, transform_indices = @transform_5, window_bounds = array<i64: 128, 128>}, {pipeline_mode = #tpu.pipeline_mode<synchronous>, transform_indices = @transform_6, window_bounds = array<i64: 1, 128>}, {transform_indices = @transform_7, window_bounds = array<i64: 1, 16, 16, 128>}, {transform_indices = @transform_8, window_bounds = array<i64: 1, 16, 16, 128>}]} {
    %c16_i32 = arith.constant 16 : i32
    %0 = arith.muli %arg1, %c16_i32 : i32
    %1 = tpu.assume_multiple %0, 8 : i32
    %c0 = arith.constant 0 : index
    %2 = arith.index_cast %1 : i32 to index
    %c0_0 = arith.constant 0 : index
    %c0_1 = arith.constant 0 : index
    %3 = vector.load %arg2[%c0, %2, %c0_0, %c0_1] : memref<1x18x24x128xf32, #tpu.memory_space<vmem>>, vector<1x18x24x128xf32>
    %4 = vector.shape_cast %3 : vector<1x18x24x128xf32> to vector<18x24x128xf32>
    %5 = vector.shape_cast %4 : vector<18x24x128xf32> to vector<432x128xf32>
    %c0_2 = arith.constant 0 : index
    %c0_3 = arith.constant 0 : index
    %6 = vector.load %arg3[%c0_2, %c0_3] : memref<128x128xf32, #tpu.memory_space<vmem>>, vector<128x128xf32>
    %cst = arith.constant dense<0.000000e+00> : vector<432x128xf32>
    %7 = tpu.matmul %5, %6, %cst {dimension_numbers = #tpu.dot_dimension_numbers<[1], [0], [0], [1], [0, 0, 1, 1], [], []>} : vector<432x128xf32>, vector<128x128xf32>, vector<432x128xf32> -> vector<432x128xf32>
    %c0_4 = arith.constant 0 : index
    %c0_5 = arith.constant 0 : index
    %8 = vector.load %arg4[%c0_4, %c0_5] : memref<1x128xf32, #tpu.memory_space<vmem>>, vector<1x128xf32>
    %9 = vector.broadcast %8 : vector<1x128xf32> to vector<432x128xf32>
    %10 = arith.addf %7, %9 : vector<432x128xf32>
    %cst_6 = arith.constant 0.000000e+00 : f32
    %cst_7 = arith.constant 6.000000e+00 : f32
    %11 = vector.broadcast %cst_6 : f32 to vector<432x128xf32>
    %12 = arith.maximumf %11, %10 : vector<432x128xf32>
    %13 = vector.broadcast %cst_7 : f32 to vector<432x128xf32>
    %14 = arith.minimumf %13, %12 : vector<432x128xf32>
    %15 = vector.shape_cast %14 : vector<432x128xf32> to vector<18x24x128xf32>
    %16 = tpu.iota {dimensions = array<i32: 0>} : vector<18x24x1xi32>
    %17 = vector.broadcast %1 : i32 to vector<18x24x1xi32>
    %18 = arith.addi %17, %16 : vector<18x24x1xi32>
    %19 = tpu.iota {dimensions = array<i32: 1>} : vector<18x24x1xi32>
    %c1_i32 = arith.constant 1 : i32
    %20 = vector.broadcast %c1_i32 : i32 to vector<18x24x1xi32>
    %21 = arith.cmpi sge, %18, %20 : vector<18x24x1xi32>
    %c16_i32_8 = arith.constant 16 : i32
    %22 = vector.broadcast %c16_i32_8 : i32 to vector<18x24x1xi32>
    %23 = arith.cmpi sle, %18, %22 : vector<18x24x1xi32>
    %24 = arith.andi %21, %23 : vector<18x24x1xi1>
    %c1_i32_9 = arith.constant 1 : i32
    %25 = vector.broadcast %c1_i32_9 : i32 to vector<18x24x1xi32>
    %26 = arith.cmpi sge, %19, %25 : vector<18x24x1xi32>
    %27 = arith.andi %24, %26 : vector<18x24x1xi1>
    %c16_i32_10 = arith.constant 16 : i32
    %28 = vector.broadcast %c16_i32_10 : i32 to vector<18x24x1xi32>
    %29 = arith.cmpi sle, %19, %28 : vector<18x24x1xi32>
    %30 = arith.andi %27, %29 : vector<18x24x1xi1>
    %cst_11 = arith.constant 0.000000e+00 : f32
    %31 = vector.shape_cast %30 : vector<18x24x1xi1> to vector<18x24x1xi1>
    %32 = vector.broadcast %31 : vector<18x24x1xi1> to vector<18x24x128xi1>
    %33 = vector.broadcast %cst_11 : f32 to vector<18x24x128xf32>
    %34 = arith.select %32, %15, %33 : vector<18x24x128xi1>, vector<18x24x128xf32>
    %c0_12 = arith.constant 0 : index
    %c0_13 = arith.constant 0 : index
    %35 = vector.load %arg5[%c0_12, %c0_13] : memref<9x128xf32, #tpu.memory_space<vmem>>, vector<9x128xf32>
    %36 = vector.extract_strided_slice %34 {offsets = [0, 0, 0], sizes = [18, 16, 128], strides = [1, 1, 1]} : vector<18x24x128xf32> to vector<18x16x128xf32>
    %37 = vector.extract_strided_slice %34 {offsets = [0, 1, 0], sizes = [18, 16, 128], strides = [1, 1, 1]} : vector<18x24x128xf32> to vector<18x16x128xf32>
    %38 = vector.extract_strided_slice %34 {offsets = [0, 2, 0], sizes = [18, 16, 128], strides = [1, 1, 1]} : vector<18x24x128xf32> to vector<18x16x128xf32>
    %cst_14 = arith.constant 0.000000e+00 : f32
    %39 = vector.broadcast %cst_14 : f32 to vector<16x16x128xf32>
    %40 = vector.extract_strided_slice %36 {offsets = [0, 0, 0], sizes = [16, 16, 128], strides = [1, 1, 1]} : vector<18x16x128xf32> to vector<16x16x128xf32>
    %41 = vector.extract_strided_slice %35 {offsets = [0, 0], sizes = [1, 128], strides = [1, 1]} : vector<9x128xf32> to vector<1x128xf32>
    %42 = vector.shape_cast %41 : vector<1x128xf32> to vector<128xf32>
    %43 = vector.shape_cast %42 : vector<128xf32> to vector<1x1x128xf32>
    %44 = vector.broadcast %43 : vector<1x1x128xf32> to vector<16x16x128xf32>
    %45 = arith.mulf %40, %44 : vector<16x16x128xf32>
    %46 = arith.addf %39, %45 : vector<16x16x128xf32>
    %47 = vector.extract_strided_slice %37 {offsets = [0, 0, 0], sizes = [16, 16, 128], strides = [1, 1, 1]} : vector<18x16x128xf32> to vector<16x16x128xf32>
    %48 = vector.extract_strided_slice %35 {offsets = [1, 0], sizes = [1, 128], strides = [1, 1]} : vector<9x128xf32> to vector<1x128xf32>
    %49 = vector.shape_cast %48 : vector<1x128xf32> to vector<128xf32>
    %50 = vector.shape_cast %49 : vector<128xf32> to vector<1x1x128xf32>
    %51 = vector.broadcast %50 : vector<1x1x128xf32> to vector<16x16x128xf32>
    %52 = arith.mulf %47, %51 : vector<16x16x128xf32>
    %53 = arith.addf %46, %52 : vector<16x16x128xf32>
    %54 = vector.extract_strided_slice %38 {offsets = [0, 0, 0], sizes = [16, 16, 128], strides = [1, 1, 1]} : vector<18x16x128xf32> to vector<16x16x128xf32>
    %55 = vector.extract_strided_slice %35 {offsets = [2, 0], sizes = [1, 128], strides = [1, 1]} : vector<9x128xf32> to vector<1x128xf32>
    %56 = vector.shape_cast %55 : vector<1x128xf32> to vector<128xf32>
    %57 = vector.shape_cast %56 : vector<128xf32> to vector<1x1x128xf32>
    %58 = vector.broadcast %57 : vector<1x1x128xf32> to vector<16x16x128xf32>
    %59 = arith.mulf %54, %58 : vector<16x16x128xf32>
    %60 = arith.addf %53, %59 : vector<16x16x128xf32>
    %61 = vector.extract_strided_slice %36 {offsets = [1, 0, 0], sizes = [16, 16, 128], strides = [1, 1, 1]} : vector<18x16x128xf32> to vector<16x16x128xf32>
    %62 = vector.extract_strided_slice %35 {offsets = [3, 0], sizes = [1, 128], strides = [1, 1]} : vector<9x128xf32> to vector<1x128xf32>
    %63 = vector.shape_cast %62 : vector<1x128xf32> to vector<128xf32>
    %64 = vector.shape_cast %63 : vector<128xf32> to vector<1x1x128xf32>
    %65 = vector.broadcast %64 : vector<1x1x128xf32> to vector<16x16x128xf32>
    %66 = arith.mulf %61, %65 : vector<16x16x128xf32>
    %67 = arith.addf %60, %66 : vector<16x16x128xf32>
    %68 = vector.extract_strided_slice %37 {offsets = [1, 0, 0], sizes = [16, 16, 128], strides = [1, 1, 1]} : vector<18x16x128xf32> to vector<16x16x128xf32>
    %69 = vector.extract_strided_slice %35 {offsets = [4, 0], sizes = [1, 128], strides = [1, 1]} : vector<9x128xf32> to vector<1x128xf32>
    %70 = vector.shape_cast %69 : vector<1x128xf32> to vector<128xf32>
    %71 = vector.shape_cast %70 : vector<128xf32> to vector<1x1x128xf32>
    %72 = vector.broadcast %71 : vector<1x1x128xf32> to vector<16x16x128xf32>
    %73 = arith.mulf %68, %72 : vector<16x16x128xf32>
    %74 = arith.addf %67, %73 : vector<16x16x128xf32>
    %75 = vector.extract_strided_slice %38 {offsets = [1, 0, 0], sizes = [16, 16, 128], strides = [1, 1, 1]} : vector<18x16x128xf32> to vector<16x16x128xf32>
    %76 = vector.extract_strided_slice %35 {offsets = [5, 0], sizes = [1, 128], strides = [1, 1]} : vector<9x128xf32> to vector<1x128xf32>
    %77 = vector.shape_cast %76 : vector<1x128xf32> to vector<128xf32>
    %78 = vector.shape_cast %77 : vector<128xf32> to vector<1x1x128xf32>
    %79 = vector.broadcast %78 : vector<1x1x128xf32> to vector<16x16x128xf32>
    %80 = arith.mulf %75, %79 : vector<16x16x128xf32>
    %81 = arith.addf %74, %80 : vector<16x16x128xf32>
    %82 = vector.extract_strided_slice %36 {offsets = [2, 0, 0], sizes = [16, 16, 128], strides = [1, 1, 1]} : vector<18x16x128xf32> to vector<16x16x128xf32>
    %83 = vector.extract_strided_slice %35 {offsets = [6, 0], sizes = [1, 128], strides = [1, 1]} : vector<9x128xf32> to vector<1x128xf32>
    %84 = vector.shape_cast %83 : vector<1x128xf32> to vector<128xf32>
    %85 = vector.shape_cast %84 : vector<128xf32> to vector<1x1x128xf32>
    %86 = vector.broadcast %85 : vector<1x1x128xf32> to vector<16x16x128xf32>
    %87 = arith.mulf %82, %86 : vector<16x16x128xf32>
    %88 = arith.addf %81, %87 : vector<16x16x128xf32>
    %89 = vector.extract_strided_slice %37 {offsets = [2, 0, 0], sizes = [16, 16, 128], strides = [1, 1, 1]} : vector<18x16x128xf32> to vector<16x16x128xf32>
    %90 = vector.extract_strided_slice %35 {offsets = [7, 0], sizes = [1, 128], strides = [1, 1]} : vector<9x128xf32> to vector<1x128xf32>
    %91 = vector.shape_cast %90 : vector<1x128xf32> to vector<128xf32>
    %92 = vector.shape_cast %91 : vector<128xf32> to vector<1x1x128xf32>
    %93 = vector.broadcast %92 : vector<1x1x128xf32> to vector<16x16x128xf32>
    %94 = arith.mulf %89, %93 : vector<16x16x128xf32>
    %95 = arith.addf %88, %94 : vector<16x16x128xf32>
    %96 = vector.extract_strided_slice %38 {offsets = [2, 0, 0], sizes = [16, 16, 128], strides = [1, 1, 1]} : vector<18x16x128xf32> to vector<16x16x128xf32>
    %97 = vector.extract_strided_slice %35 {offsets = [8, 0], sizes = [1, 128], strides = [1, 1]} : vector<9x128xf32> to vector<1x128xf32>
    %98 = vector.shape_cast %97 : vector<1x128xf32> to vector<128xf32>
    %99 = vector.shape_cast %98 : vector<128xf32> to vector<1x1x128xf32>
    %100 = vector.broadcast %99 : vector<1x1x128xf32> to vector<16x16x128xf32>
    %101 = arith.mulf %96, %100 : vector<16x16x128xf32>
    %102 = arith.addf %95, %101 : vector<16x16x128xf32>
    %c0_15 = arith.constant 0 : index
    %c0_16 = arith.constant 0 : index
    %103 = vector.load %arg6[%c0_15, %c0_16] : memref<1x128xf32, #tpu.memory_space<vmem>>, vector<1x128xf32>
    %104 = vector.shape_cast %103 : vector<1x128xf32> to vector<1x1x128xf32>
    %105 = vector.broadcast %104 : vector<1x1x128xf32> to vector<16x16x128xf32>
    %106 = arith.addf %102, %105 : vector<16x16x128xf32>
    %cst_17 = arith.constant 0.000000e+00 : f32
    %cst_18 = arith.constant 6.000000e+00 : f32
    %107 = vector.broadcast %cst_17 : f32 to vector<16x16x128xf32>
    %108 = arith.maximumf %107, %106 : vector<16x16x128xf32>
    %109 = vector.broadcast %cst_18 : f32 to vector<16x16x128xf32>
    %110 = arith.minimumf %109, %108 : vector<16x16x128xf32>
    %111 = vector.shape_cast %110 : vector<16x16x128xf32> to vector<256x128xf32>
    %c0_19 = arith.constant 0 : index
    %c0_20 = arith.constant 0 : index
    %112 = vector.load %arg7[%c0_19, %c0_20] : memref<128x128xf32, #tpu.memory_space<vmem>>, vector<128x128xf32>
    %cst_21 = arith.constant dense<0.000000e+00> : vector<256x128xf32>
    %113 = tpu.matmul %111, %112, %cst_21 {dimension_numbers = #tpu.dot_dimension_numbers<[1], [0], [0], [1], [0, 0, 1, 1], [], []>} : vector<256x128xf32>, vector<128x128xf32>, vector<256x128xf32> -> vector<256x128xf32>
    %c0_22 = arith.constant 0 : index
    %c0_23 = arith.constant 0 : index
    %114 = vector.load %arg8[%c0_22, %c0_23] : memref<1x128xf32, #tpu.memory_space<vmem>>, vector<1x128xf32>
    %115 = vector.broadcast %114 : vector<1x128xf32> to vector<256x128xf32>
    %116 = arith.addf %113, %115 : vector<256x128xf32>
    %c0_24 = arith.constant 0 : index
    %c0_25 = arith.constant 0 : index
    %c0_26 = arith.constant 0 : index
    %c0_27 = arith.constant 0 : index
    %117 = vector.load %arg9[%c0_24, %c0_25, %c0_26, %c0_27] : memref<1x16x16x128xf32, #tpu.memory_space<vmem>>, vector<1x16x16x128xf32>
    %118 = vector.shape_cast %117 : vector<1x16x16x128xf32> to vector<16x16x128xf32>
    %119 = vector.shape_cast %118 : vector<16x16x128xf32> to vector<256x128xf32>
    %120 = arith.addf %116, %119 : vector<256x128xf32>
    %121 = vector.shape_cast %120 : vector<256x128xf32> to vector<16x16x128xf32>
    %c0_28 = arith.constant 0 : index
    %c0_29 = arith.constant 0 : index
    %c0_30 = arith.constant 0 : index
    %c0_31 = arith.constant 0 : index
    %122 = vector.load %arg10[%c0_28, %c0_29, %c0_30, %c0_31] : memref<1x16x16x128xf32, #tpu.memory_space<vmem>>, vector<1x16x16x128xf32>
    %123 = vector.shape_cast %122 : vector<1x16x16x128xf32> to vector<16x16x128xf32>
    %124 = vector.shape_cast %121 : vector<16x16x128xf32> to vector<1x16x16x128xf32>
    tpu.vector_store %arg10[%c0_28, %c0_29, %c0_30, %c0_31], %124 {strides = array<i32>} : memref<1x16x16x128xf32, #tpu.memory_space<vmem>>, vector<1x16x16x128xf32>,
    return
  }
  func.func @transform_0(%arg0: i32, %arg1: i32) -> (i32, i32, i32, i32) {
    %c0_i32 = arith.constant 0 : i32
    %c0_i32_0 = arith.constant 0 : i32
    %c0_i32_1 = arith.constant 0 : i32
    %c0_i32_2 = arith.constant 0 : i32
    return %arg0, %c0_i32, %c0_i32_0, %c0_i32_1 : i32, i32, i32, i32
  }
  func.func @transform_1(%arg0: i32, %arg1: i32) -> (i32, i32) {
    %c0_i32 = arith.constant 0 : i32
    %c0_i32_0 = arith.constant 0 : i32
    %c0_i32_1 = arith.constant 0 : i32
    return %c0_i32, %c0_i32_0 : i32, i32
  }
  func.func @transform_2(%arg0: i32, %arg1: i32) -> (i32, i32) {
    %c0_i32 = arith.constant 0 : i32
    %c0_i32_0 = arith.constant 0 : i32
    %c0_i32_1 = arith.constant 0 : i32
    return %c0_i32, %c0_i32_0 : i32, i32
  }
  func.func @transform_3(%arg0: i32, %arg1: i32) -> (i32, i32) {
    %c0_i32 = arith.constant 0 : i32
    %c0_i32_0 = arith.constant 0 : i32
    %c0_i32_1 = arith.constant 0 : i32
    return %c0_i32, %c0_i32_0 : i32, i32
  }
  func.func @transform_4(%arg0: i32, %arg1: i32) -> (i32, i32) {
    %c0_i32 = arith.constant 0 : i32
    %c0_i32_0 = arith.constant 0 : i32
    %c0_i32_1 = arith.constant 0 : i32
    return %c0_i32, %c0_i32_0 : i32, i32
  }
  func.func @transform_5(%arg0: i32, %arg1: i32) -> (i32, i32) {
    %c0_i32 = arith.constant 0 : i32
    %c0_i32_0 = arith.constant 0 : i32
    %c0_i32_1 = arith.constant 0 : i32
    return %c0_i32, %c0_i32_0 : i32, i32
  }
  func.func @transform_6(%arg0: i32, %arg1: i32) -> (i32, i32) {
    %c0_i32 = arith.constant 0 : i32
    %c0_i32_0 = arith.constant 0 : i32
    %c0_i32_1 = arith.constant 0 : i32
    return %c0_i32, %c0_i32_0 : i32, i32
  }
  func.func @transform_7(%arg0: i32, %arg1: i32) -> (i32, i32, i32, i32) {
    %c0_i32 = arith.constant 0 : i32
    %c0_i32_0 = arith.constant 0 : i32
    %c0_i32_1 = arith.constant 0 : i32
    return %arg0, %arg1, %c0_i32, %c0_i32_0 : i32, i32, i32, i32
  }
  func.func @transform_8(%arg0: i32, %arg1: i32) -> (i32, i32, i32, i32) {
    %c0_i32 = arith.constant 0 : i32
    %c0_i32_0 = arith.constant 0 : i32
    %c0_i32_1 = arith.constant 0 : i32
    return %arg0, %arg1, %c0_i32, %c0_i32_0 : i32, i32, i32, i32
  }
}

</mosaic_0001>

<bundles_post_ra>
// kernel: tpu_custom_call.1
= control target key start
LH: loop header
LB: loop body
LE: loop exit
PB: predicated region body
PF: predicated region fallthrough
CT: control target
= control target key end

     0   :  { %s6636_s0 = inlined_call_operand.hbm [shape: f32[2,18,24,128], index: 0, kind: input, shape index: {}]   ;;  %s6637_s1 = inlined_call_operand.hbm [shape: f32[128,128], index: 1, kind: input, shape index: {}]   ;;  %s6638_s2 = inlined_call_operand.vmem [shape: f32[1,128], index: 2, kind: input, shape index: {}]   ;;  %s6639_s3 = inlined_call_operand.hbm [shape: f32[9,128], index: 3, kind: input, shape index: {}]   ;;  %s6640_s4 = inlined_call_operand.vmem [shape: f32[1,128], index: 4, kind: input, shape index: {}]   ;;  %s6641_s5 = inlined_call_operand.hbm [shape: f32[128,128], index: 5, kind: input, shape index: {}]   ;;  %s6642_s6 = inlined_call_operand.vmem [shape: f32[1,128], index: 6, kind: input, shape index: {}]   ;;  %s6643_s7 = inlined_call_operand.hbm [shape: f32[2,16,16,128], index: 7, kind: input, shape index: {}]   ;;  %s6644_s8 = inlined_call_operand.hbm [shape: f32[2,16,16,128], index: 8, kind: output, shape index: {}]  }
   0x1   :  { %6763 = sst [smem:[#allocation79_spill]] %s6637_s1 }
   0x2   :  { %13 = vsyncpa [#allocation3], 0 }
   0x3   :  { %15 = vsyncpa [#allocation3 + $0x1], 0 }
   0x4   :  { %16 = vsyncpa [#allocation6], 0 }
   0x5   :  { %17 = vsyncpa [#allocation9], 0 }
   0x6   :  { %18 = vsyncpa [#allocation4], 0 }
   0x7   :  { %20 = vsyncpa [#allocation4 + $0x1], 0  ;;  %s4308_s27 = smov 0   ;;  %s4310_s28 = smov 0  }
   0x8   :  { %s4312_s29 = smov 0   ;;  %s4314_s30 = smov 0  }
   0x9   :  { %s4316_s9 = smov 0   ;;  %s4318_s10 = smov 0  }
   0xa LB: > { %6764 = sst [smem:[#allocation17_spill]] %s4231_s27  ;;  %s4339_s11 = sadd.s32 4294967295, %s4251_s10   ;;  %s4251_s10 = sphi %s4318_s10, %s26_s10   ;;  %s4247_s9 = sphi %s4316_s9, %s7133_s9   ;;  %s4243_s30 = sphi %s4314_s30, %s7132_s30   ;;  %s4239_s29 = sphi %s4312_s29, %s7128_s29   ;;  %s4235_s28 = sphi %s4310_s28, %s7131_s28   ;;  %s4231_s27 = sphi %s4308_s27, %s7130_s27  }
   0xb   : > { %6765 = sst [smem:[#allocation18_spill]] %s4239_s29  ;;  %s3576_s12 = sadd.s32 4294967294, %s4251_s10  }
   0xc   : > { %6766 = sst [smem:[#allocation19_spill]] %s4251_s10  ;;  %p58_p0 = scmp.ne.s32.totalorder %s4235_s28, %s4231_s27 }
   0xd   : > { %p6645_p1 = scmp.eq.s32.totalorder %s4339_s11, 0  ;;  %p244_p3 = scmp.eq.s32.totalorder %s3576_s12, 1 }
   0xe   : > { %p3577_p5 = scmp.ge.s32.totalorder %s4251_s10, 1  ;;  %p251_p7 = scmp.lt.s32.totalorder %s4251_s10, 3 }
   0xf   : > { %p4348_p4 = por %p6645_p1, %p58_p0  ;;  %p4353_p6 = por %p244_p3, %p58_p0 }
  0x10   : > { %p4358_p8 = pnand %p3577_p5, %p251_p7  ;;  %s4253_s16 = smov [#allocation5]  }
  0x11   : > { %s6768_s14 = scalar_select %p4353_p6, 1, 0 }
  0x12   : > { %s263_s17 = sshll.u32 %s4253_s16, 4  ;;  %p3935_p9 = pneg %p4358_p8  ;;  %s264_s17 = int_to_ptr.vmem [resolvable:$true] %s263_s17 }
  0x13   : > { %6769 = sst [smem:[#allocation20_spill]] %s6768_s14  ;;  %s38_s19 = sadd.s32 1, %s4247_s9 }
  0x14   : > { %p4367_p11 = pnand %p3935_p9, %p6645_p1  ;;  %s4036_s20 = scalar_lea.vmem %s264_s17, 2048 }
  0x15   : > { %p4037_p13 = scmp.ne.s32.totalorder %s264_s17, %s4036_s20  ;;  %p4044_p5 = scmp.lt.s32.totalorder %s264_s17, %s264_s17 }
  0x16   : > { %p6656_p12 = pneg %p4367_p11  ;;  %p4045_p7 = scmp.lt.s32.totalorder %s4036_s20, %s4036_s20 }
  0x18   : > { %p4039_p0 = pnand %p4037_p13, %p6656_p12  ;;  %p4046_p2 = por %p4045_p7, %p4044_p5 }
  0x1a   : > { %p4040_p3 = pneg %p4039_p0 }
  0x1c   : > { %p4047_p10 = pnand %p4046_p2, %p4040_p3 }
  0x1e   : > { %4050 = shalt.err (!%p4047_p10)
}
  0x1f   : > { %s6646_s21 = smov 128   ;;  %s6648_s22 = smov 8  }
  0x20   : > { %s6772_s1 = sld [smem:[#allocation79_spill]]  ;;  %p40_p2 = scmp.ge.s32.totalorder %s38_s19, 2 }
  0x21   : > { %s45_s25 = sadd.s32 1, %s4239_s29  ;;  %p52_p9 = scmp.ne.s32.totalorder %s4239_s29, %s4235_s28 }
  0x22   : > { %p53_p10 = scmp.eq.s32.totalorder %s4251_s10, 0  ;;  %s7135_s19 = smov (%p40_p2, %s38_s19), 0 }
  0x23   : > { %6773 = sst [smem:[#allocation21_spill]] %s7135_s19  ;;  %p6774_p0 = scmp.eq.s32.totalorder %s4339_s11, 1 }
  0x24   : > { %p54_p13 = por %p53_p10, %p52_p9  ;;  %s42_s12 = ssub.s32 %s4247_s9, %s7135_s19 }
  0x25   : > { %p4393_p3 = por %p6774_p0, %p52_p9  ;;  %p3959_p5 = scmp.lt.s32.totalorder %s4251_s10, 2 }
  0x26   : > { %3938 = dma.hbm_to_vmem [thread:$0]  (!%p4367_p11), %s6772_s1, 2048, %s264_s17, [#allocation6], %s6646_s21, %s6646_s21, %s6648_s22  }
  0x27   : > { %s6775_s26 = scalar_select %p4393_p3, 1, 0 }
  0x28   : > { %p43_p7 = scmp.eq.s32.totalorder %s42_s12, 0  ;;  %s312_s16 = sand.u32 1, %s4251_s10  }
  0x29   : > { %s314_s20 = sand.u32 1, %s4239_s29   ;;  %p4405_p1 = pnand %p3959_p5, %p54_p13 }
  0x2a   : > { %s4403_s17 = scalar_select %p43_p7, %s4239_s29, %s45_s25  }
  0x2b   : > { %s3914_s23 = smul.u32 432, %s314_s20  ;;  %s4410_s22 = sshll.u32 %s314_s20, 8 }
  0x2c   : > { %6776 = sst [smem:[#allocation22_spill]] %s4403_s17  ;;  %s3915_s21 = smul.u32 6912, %s4247_s9 }
  0x2d   : > { %s316_s27 = scalar_lea.vmem [#allocation2], %s3914_s23  ;;  %s4415_s10 = scalar_lea.sflag [#allocation3], %s312_s16 }
  0x2e   : > { %s322_s19 = scalar_lea.hbm %s6636_s0, %s3915_s21  ;;  %s323_s12 = sshll.u32 %s316_s27, 4  ;;  %s324_s12 = int_to_ptr.vmem [resolvable:$true] %s323_s12 }
  0x2f   : > { %p6657_p2 = pneg %p4405_p1  ;;  %s4064_s25 = scalar_lea.vmem %s324_s12, 6912 }
  0x30   : > { %p4065_p9 = scmp.ne.s32.totalorder %s324_s12, %s4064_s25  ;;  %s4256_s17 = smov [#allocation2]  }
  0x31   : > { %s4069_s20 = sshll.u32 %s4256_s17, 4  ;;  %s4070_s20 = int_to_ptr.vmem [resolvable:$false] %s4069_s20 }
  0x32   : > { %p4067_p10 = pnand %p4065_p9, %p6657_p2  ;;  %s4071_s29 = scalar_lea.vmem %s4070_s20, 13824 }
  0x33   : > { %p4072_p0 = scmp.lt.s32.totalorder %s324_s12, %s4070_s20  ;;  %p4073_p5 = scmp.lt.s32.totalorder %s4071_s29, %s4064_s25 }
  0x34   : > { %p4068_p13 = pneg %p4067_p10 }
  0x35   : > { %p4074_p7 = por %p4073_p5, %p4072_p0 }
  0x37   : > { %p4075_p12 = pnand %p4074_p7, %p4068_p13 }
  0x39   : > { %4078 = shalt.err (!%p4075_p12)
}
  0x3a   : > { %s6778_s1 = smov 8   ;;  %s6779_s27 = smov 128  }
  0x3b   : > { %3948 = dma.hbm_to_vmem [thread:$0]  (!%p4405_p1), %s322_s19, 6912, %s324_s12, %s4415_s10, %s6779_s27, %s6779_s27, %s6778_s1  }
  0x3c   : > { %s4257_s14 = smov [#allocation7]   ;;  %s4258_s16 = smov [#allocation8]  }
  0x3d   : > { %s279_s21 = sshll.u32 %s4257_s14, 4  ;;  %s295_s23 = sshll.u32 %s4258_s16, 4  ;;  %s280_s21 = int_to_ptr.vmem [resolvable:$true] %s279_s21  ;;  %s296_s23 = int_to_ptr.vmem [resolvable:$true] %s295_s23 }
  0x3e   : > { %s4090_s17 = scalar_lea.vmem %s280_s21, 256  ;;  %p6780_p10 = pneg %p4367_p11 }
  0x3f   : > { %p4091_p9 = scmp.ne.s32.totalorder %s280_s21, %s4090_s17  ;;  %p4098_p0 = scmp.lt.s32.totalorder %s280_s21, %s280_s21 }
  0x40   : > { %p4099_p5 = scmp.lt.s32.totalorder %s4090_s17, %s4090_s17 }
  0x41   : > { %p4093_p13 = pnand %p4091_p9, %p6780_p10 }
  0x42   : > { %p4100_p7 = por %p4099_p5, %p4098_p0 }
  0x43   : > { %p4094_p12 = pneg %p4093_p13 }
  0x45   : > { %p4101_p2 = pnand %p4100_p7, %p4094_p12 }
  0x47   : > { %4104 = shalt.err (!%p4101_p2)
}
  0x48   : > { %3941 = dma.hbm_to_vmem [thread:$0]  (!%p4367_p11), %s6639_s3, 256, %s280_s21, [#allocation6], %s6779_s27, %s6779_s27, %s6778_s1  }
  0x49   : > { %s4116_s12 = scalar_lea.vmem %s296_s23, 2048  ;;  %p6781_p9 = pmov %p6780_p10 }
  0x4a   : > { %p4117_p6 = scmp.ne.s32.totalorder %s296_s23, %s4116_s12  ;;  %p4124_p3 = scmp.lt.s32.totalorder %s296_s23, %s296_s23 }
  0x4b   : > { %p4125_p0 = scmp.lt.s32.totalorder %s4116_s12, %s4116_s12 }
  0x4c   : > { %p4119_p10 = pnand %p4117_p6, %p6781_p9 }
  0x4d   : > { %p4126_p12 = por %p4125_p0, %p4124_p3 }
  0x4e   : > { %p4120_p13 = pneg %p4119_p10 }
  0x50   : > { %p4127_p2 = pnand %p4126_p12, %p4120_p13 }
  0x52   : > { %4130 = shalt.err (!%p4127_p2)
}
  0x53   : > { %3944 = dma.hbm_to_vmem [thread:$0]  (!%p4367_p11), %s6641_s5, 2048, %s296_s23, [#allocation9], %s6779_s27, %s6779_s27, %s6778_s1  }
  0x54   : > { %s3601_s14 = sshll.u32 %s4247_s9, 12  ;;  %s337_s21 = scalar_lea.vmem [#allocation10], %s4410_s22 }
  0x55   : > { %s347_s16 = sshll.u32 %s337_s21, 4  ;;  %s346_s19 = scalar_lea.hbm %s6643_s7, %s3601_s14  ;;  %s348_s16 = int_to_ptr.vmem [resolvable:$true] %s347_s16 }
  0x56   : > { %s4144_s12 = scalar_lea.vmem %s348_s16, 4096  ;;  %p6782_p3 = pneg %p4405_p1 }
  0x57   : > { %p4145_p6 = scmp.ne.s32.totalorder %s348_s16, %s4144_s12  ;;  %s4259_s18 = smov [#allocation10]  }
  0x58   : > { %s4149_s25 = sshll.u32 %s4259_s18, 4  ;;  %s4150_s25 = int_to_ptr.vmem [resolvable:$false] %s4149_s25 }
  0x59   : > { %p4147_p5 = pnand %p4145_p6, %p6782_p3  ;;  %s4151_s20 = scalar_lea.vmem %s4150_s25, 8192 }
  0x5a   : > { %p4152_p9 = scmp.lt.s32.totalorder %s348_s16, %s4150_s25  ;;  %p4153_p11 = scmp.lt.s32.totalorder %s4151_s20, %s4144_s12 }
  0x5b   : > { %p4148_p7 = pneg %p4147_p5 }
  0x5c   : > { %p4154_p10 = por %p4153_p11, %p4152_p9 }
  0x5e   : > { %p4155_p13 = pnand %p4154_p10, %p4148_p7 }
  0x60   : > { %4158 = shalt.err (!%p4155_p13)
}
  0x61   : > { %3951 = dma.hbm_to_vmem [thread:$0]  (!%p4405_p1), %s346_s19, 4096, %s348_s16, %s4415_s10, %s6779_s27, %s6779_s27, %s6778_s1  }
  0x62   : > { %359 = sbr.rel (%p4358_p8) target bundleno = 927 (0x39f), region = 52 }
  0x67   : > { %s361_s22 = sand.u32 1, %s4339_s11   ;;  %s4468_s23 = sand.u32 1, %s4235_s28  }
  0x68   : > { %s3916_s14 = smul.u32 432, %s4468_s23  ;;  %s362_s21 = scalar_lea.sflag [#allocation3], %s361_s22 }
  0x6a   : > { %s4471_s17 = scalar_lea.vmem [#allocation2], %s3916_s14 }
  0x6b   : > { %4210 = dma.done.wait (%p4348_p4), %s362_s21, 6912  }
  0x6c   : > { %4212 = vsyncadd (%p4348_p4), %s362_s21, 4294960384  ;;  %p6783_p1 = scmp.eq.s32.totalorder %s4339_s11, 0 }
  0x6e   : > { %4214 = dma.done.wait (%p6783_p1), [#allocation6], 2304   ;;  %p6784_p8 = pmov %p6783_p1 }
  0x6f   : > { %p6785_p0 = pmov %p6783_p1 }
  0x70   : > { %4216 = vsyncadd (%p6784_p8), [#allocation6], 4294964992 }
  0x71   : > { %4218 = dma.done.wait (%p6785_p0), [#allocation9], 2048   ;;  %p6786_p12 = pmov %p6785_p0 }
  0x72   : > { %s3590_s10 = sshll.u32 %s4468_s23, 8 }
  0x73   : > { %4220 = vsyncadd (%p6786_p12), [#allocation9], 4294965248  ;;  %s4488_s15 = scalar_lea.vmem [#allocation10], %s3590_s10 }
  0x74   : > { %4222 = dma.done.wait (%p4348_p4), %s362_s21, 4096  }
  0x75   : > { %4224 = vsyncadd (%p4348_p4), %s362_s21, 4294963200  ;;  %v498_v0 = vld [vmem:[#allocation5 + $0x78] sm:$0xff]  ;;  %v497_v1 = vld [vmem:[#allocation5 + $0x70] sm:$0xff]  ;;  %vm1471_vm2 = vcmask 1046528   ;;  %vm1716_vm3 = vcmask 1045504   ;;  %s6488_s21 = scalar_lea.vmem [#allocation11], %s3590_s10 }
  0x76   : > { %3721 = vmatprep.subr.mxu0 %v498_v0  ;;  %v496_v2 = vld [vmem:[#allocation5 + $0x68] sm:$0xff]  ;;  %v495_v3 = vld [vmem:[#allocation5 + $0x60] sm:$0xff]  ;;  %v494_v5 = vld [vmem:[#allocation5 + $0x58] sm:$0xff]  ;;  %s3437_s10 = sshll.u32 %s6488_s21, 4  ;;  %p7121_p2 = scmp.ne.s32.totalorder %s6775_s26, 0  ;;  %s6586_s10 = int_to_ptr.vmem [resolvable:$true] %s3437_s10 }
  0x77   : > { %3722 = vmatpush3.msra.mxu0 %v498_v0  ;;  %v429_v4 = vld [vmem:[%s4471_s17] sm:$0xff]  ;;  %v492_v7 = vld [vmem:[#allocation5 + $0x48] sm:$0xff]  ;;  %v490_v9 = vld [vmem:[#allocation5 + $0x38] sm:$0xff]  ;;  %s4159_s1 = scalar_lea.vmem %s6586_s10, 4096 }
  0x78   : > { %3723 = vmatprep.subr.mxu0 %v497_v1  ;;  %3753 = vmatprep.mubr.f32.mxu0 %v429_v4  ;;  %v493_v6 = vld [vmem:[#allocation5 + $0x50] sm:$0xff]  ;;  %v491_v8 = vld [vmem:[#allocation5 + $0x40] sm:$0xff]  ;;  %v488_v11 = vld [vmem:[#allocation5 + $0x28] sm:$0xff]  ;;  %p4160_p4 = scmp.ne.s32.totalorder %s6586_s10, %s4159_s1 }
  0x79   : > { %3724 = vmatpush3.msra.mxu0 %v497_v1  ;;  %v489_v10 = vld [vmem:[#allocation5 + $0x30] sm:$0xff]  ;;  %v487_v12 = vld [vmem:[#allocation5 + $0x20] sm:$0xff]  ;;  %v486_v13 = vld [vmem:[#allocation5 + $0x18] sm:$0xff] }
  0x7a   : > { %3725 = vmatprep.subr.mxu0 %v496_v2  ;;  %v485_v14 = vld [vmem:[#allocation5 + $0x10] sm:$0xff]  ;;  %v484_v15 = vld [vmem:[#allocation5 + $0x8] sm:$0xff]  ;;  %v483_v16 = vld [vmem:[#allocation5] sm:$0xff]  ;;  %p4161_p6 = pnand %p4160_p4, %p7121_p2 }
  0x7b   : > { %3726 = vmatpush3.msra.mxu0 %v496_v2  ;;  %v430_v17 = vld [vmem:[%s4471_s17 + $0x8] sm:$0xff]  ;;  %v431_v18 = vld [vmem:[%s4471_s17 + $0x10] sm:$0xff]  ;;  %v432_v19 = vld [vmem:[%s4471_s17 + $0x18] sm:$0xff] }
  0x7c   : > { %3727 = vmatprep.subr.mxu0 %v495_v3  ;;  %v433_v20 = vld [vmem:[%s4471_s17 + $0x20] sm:$0xff]  ;;  %v434_v21 = vld [vmem:[%s4471_s17 + $0x28] sm:$0xff]  ;;  %v435_v22 = vld [vmem:[%s4471_s17 + $0x30] sm:$0xff]  ;;  %p4162_p3 = pneg %p4161_p6 }
  0x7d   : > { %3728 = vmatpush3.msra.mxu0 %v495_v3  ;;  %v436_v23 = vld [vmem:[%s4471_s17 + $0x38] sm:$0xff]  ;;  %v437_v24 = vld [vmem:[%s4471_s17 + $0x40] sm:$0xff]  ;;  %v438_v25 = vld [vmem:[%s4471_s17 + $0x48] sm:$0xff] }
  0x7e   : > { %3729 = vmatprep.subr.mxu0 %v494_v5  ;;  %v439_v26 = vld [vmem:[%s4471_s17 + $0x50] sm:$0xff]  ;;  %v440_v27 = vld [vmem:[%s4471_s17 + $0x58] sm:$0xff]  ;;  %v441_v28 = vld [vmem:[%s4471_s17 + $0x60] sm:$0xff] }
  0x7f   : > { %3730 = vmatpush3.msra.mxu0 %v494_v5  ;;  %v442_v29 = vld [vmem:[%s4471_s17 + $0x68] sm:$0xff]  ;;  %v443_v30 = vld [vmem:[%s4471_s17 + $0x70] sm:$0xff]  ;;  %v444_v31 = vld [vmem:[%s4471_s17 + $0x78] sm:$0xff] }
  0x80   : > { %3731 = vmatprep.subr.mxu0 %v493_v6  ;;  %v445_v32 = vld [vmem:[%s4471_s17 + $0x80] sm:$0xff]  ;;  %v446_v33 = vld [vmem:[%s4471_s17 + $0x88] sm:$0xff]  ;;  %v447_v34 = vld [vmem:[%s4471_s17 + $0x90] sm:$0xff] }
  0x81   : > { %3732 = vmatpush3.msra.mxu0 %v493_v6  ;;  %v448_v35 = vld [vmem:[%s4471_s17 + $0x98] sm:$0xff]  ;;  %v449_v36 = vld [vmem:[%s4471_s17 + $0xa0] sm:$0xff]  ;;  %v450_v37 = vld [vmem:[%s4471_s17 + $0xa8] sm:$0xff] }
  0x82   : > { %3733 = vmatprep.subr.mxu0 %v492_v7  ;;  %v451_v38 = vld [vmem:[%s4471_s17 + $0xb0] sm:$0xff]  ;;  %v452_v39 = vld [vmem:[%s4471_s17 + $0xb8] sm:$0xff]  ;;  %v453_v40 = vld [vmem:[%s4471_s17 + $0xc0] sm:$0xff] }
  0x83   : > { %3734 = vmatpush3.msra.mxu0 %v492_v7  ;;  %v454_v41 = vld [vmem:[%s4471_s17 + $0xc8] sm:$0xff]  ;;  %v455_v42 = vld [vmem:[%s4471_s17 + $0xd0] sm:$0xff]  ;;  %v456_v43 = vld [vmem:[%s4471_s17 + $0xd8] sm:$0xff] }
  0x84   : > { %3735 = vmatprep.subr.mxu0 %v491_v8  ;;  %v457_v44 = vld [vmem:[%s4471_s17 + $0xe0] sm:$0xff]  ;;  %v458_v45 = vld [vmem:[%s4471_s17 + $0xe8] sm:$0xff]  ;;  %v459_v46 = vld [vmem:[%s4471_s17 + $0xf0] sm:$0xff] }
  0x85   : > { %3736 = vmatpush3.msra.mxu0 %v491_v8  ;;  %v460_v47 = vld [vmem:[%s4471_s17 + $0xf8] sm:$0xff]  ;;  %v461_v48 = vld [vmem:[%s4471_s17 + $0x100] sm:$0xff]  ;;  %v462_v49 = vld [vmem:[%s4471_s17 + $0x108] sm:$0xff] }
  0x86   : > { %3737 = vmatprep.subr.mxu0 %v490_v9  ;;  %v463_v50 = vld [vmem:[%s4471_s17 + $0x110] sm:$0xff]  ;;  %v464_v51 = vld [vmem:[%s4471_s17 + $0x118] sm:$0xff]  ;;  %v465_v52 = vld [vmem:[%s4471_s17 + $0x120] sm:$0xff] }
  0x87   : > { %3738 = vmatpush3.msra.mxu0 %v490_v9  ;;  %v466_v53 = vld [vmem:[%s4471_s17 + $0x128] sm:$0xff]  ;;  %v467_v54 = vld [vmem:[%s4471_s17 + $0x130] sm:$0xff]  ;;  %v468_v55 = vld [vmem:[%s4471_s17 + $0x138] sm:$0xff] }
  0x88   : > { %3739 = vmatprep.subr.mxu0 %v489_v10  ;;  %v3091_v56 = vld [vmem:[#allocation8 + $0x78] sm:$0xff]  ;;  %v469_v57 = vld [vmem:[%s4471_s17 + $0x140] sm:$0xff]  ;;  %v471_v60 = vld [vmem:[%s4471_s17 + $0x150] sm:$0xff] }
  0x89   : > { %3740 = vmatpush3.msra.mxu0 %v489_v10  ;;  %3834 = vmatprep.subr.mxu1 %v3091_v56  ;;  %v3090_v58 = vld [vmem:[#allocation8 + $0x70] sm:$0xff]  ;;  %v470_v59 = vld [vmem:[%s4471_s17 + $0x148] sm:$0xff]  ;;  %v472_v62 = vld [vmem:[%s4471_s17 + $0x158] sm:$0xff] }
  0x8a   : > { %3741 = vmatprep.subr.mxu0 %v488_v11  ;;  %3835 = vmatpush3.msra.mxu1 %v3091_v56  ;;  %v3089_v61 = vld [vmem:[#allocation8 + $0x68] sm:$0xff]  ;;  %v473_v63 = vld [vmem:[%s4471_s17 + $0x160] sm:$0xff]  ;;  %v3087_v1 = vld [vmem:[#allocation8 + $0x58] sm:$0xff] }
  0x8b   : > { %3742 = vmatpush3.msra.mxu0 %v488_v11  ;;  %3836 = vmatprep.subr.mxu1 %v3090_v58  ;;  %v3088_v0 = vld [vmem:[#allocation8 + $0x60] sm:$0xff]  ;;  %v474_v2 = vld [vmem:[%s4471_s17 + $0x168] sm:$0xff]  ;;  %v3086_v4 = vld [vmem:[#allocation8 + $0x50] sm:$0xff] }
  0x8c   : > { %3743 = vmatprep.subr.mxu0 %v487_v12  ;;  %3837 = vmatpush3.msra.mxu1 %v3090_v58  ;;  %v475_v3 = vld [vmem:[%s4471_s17 + $0x170] sm:$0xff]  ;;  %v476_v5 = vld [vmem:[%s4471_s17 + $0x178] sm:$0xff]  ;;  %v477_v6 = vld [vmem:[%s4471_s17 + $0x180] sm:$0xff] }
  0x8d   : > { %3744 = vmatpush3.msra.mxu0 %v487_v12  ;;  %3838 = vmatprep.subr.mxu1 %v3089_v61  ;;  %v3085_v7 = vld [vmem:[#allocation8 + $0x48] sm:$0xff]  ;;  %v3084_v9 = vld [vmem:[#allocation8 + $0x40] sm:$0xff]  ;;  %v3083_v11 = vld [vmem:[#allocation8 + $0x38] sm:$0xff] }
  0x8e   : > { %3745 = vmatprep.subr.mxu0 %v486_v13  ;;  %3839 = vmatpush3.msra.mxu1 %v3089_v61  ;;  %v478_v8 = vld [vmem:[%s4471_s17 + $0x188] sm:$0xff]  ;;  %v479_v10 = vld [vmem:[%s4471_s17 + $0x190] sm:$0xff]  ;;  %v480_v12 = vld [vmem:[%s4471_s17 + $0x198] sm:$0xff] }
  0x8f   : > { %3746 = vmatpush3.msra.mxu0 %v486_v13  ;;  %3840 = vmatprep.subr.mxu1 %v3088_v0  ;;  %v3082_v13 = vld [vmem:[#allocation8 + $0x30] sm:$0xff] }
  0x90   : > { %3747 = vmatprep.subr.mxu0 %v485_v14  ;;  %3841 = vmatpush3.msra.mxu1 %v3088_v0 }
  0x91   : > { %3748 = vmatpush3.msra.mxu0 %v485_v14  ;;  %3842 = vmatprep.subr.mxu1 %v3087_v1  ;;  %v3081_v14 = vld [vmem:[#allocation8 + $0x28] sm:$0xff] }
  0x92   : > { %3749 = vmatprep.subr.mxu0 %v484_v15  ;;  %3843 = vmatpush3.msra.mxu1 %v3087_v1 }
  0x93   : > { %3750 = vmatpush3.msra.mxu0 %v484_v15  ;;  %3844 = vmatprep.subr.mxu1 %v3086_v4  ;;  %v3080_v15 = vld [vmem:[#allocation8 + $0x20] sm:$0xff] }
  0x94   : > { %3751 = vmatprep.subr.mxu0 %v483_v16  ;;  %3845 = vmatpush3.msra.mxu1 %v3086_v4 }
  0x95   : > { %3752 = vmatpush3.msra.mxu0 %v483_v16  ;;  %3846 = vmatprep.subr.mxu1 %v3085_v7  ;;  %v3079_v16 = vld [vmem:[#allocation8 + $0x18] sm:$0xff] }
  0x96   : > { %3754 = vmatmul.mubr.f32.vlgmr.msra.gmra.mxu0 %v430_v17  ;;  %3847 = vmatpush3.msra.mxu1 %v3085_v7  ;;  %v3078_v17 = vld [vmem:[#allocation8 + $0x10] sm:$0xff] }
  0x97   : > { %3756 = vmatprep.mubr.f32.mxu0 %v431_v18  ;;  %3848 = vmatprep.subr.mxu1 %v3084_v9  ;;  %v3077_v18 = vld [vmem:[#allocation8 + $0x8] sm:$0xff] }
  0x98   : > { %3849 = vmatpush3.msra.mxu1 %v3084_v9 }
  0x99   : > { %3850 = vmatprep.subr.mxu1 %v3083_v11 }
  0x9a   : > { %3757 = vmatmul.mubr.f32.gmra.mxu0 %v432_v19  ;;  %3851 = vmatpush3.msra.mxu1 %v3083_v11  ;;  %v3076_v19 = vld [vmem:[#allocation8] sm:$0xff] }
  0x9b   : > { %3759 = vmatprep.mubr.f32.mxu0 %v433_v20  ;;  %3852 = vmatprep.subr.mxu1 %v3082_v13  ;;  %v967_v20 = vlaneseq }
  0x9c   : > { %3853 = vmatpush3.msra.mxu1 %v3082_v13 }
  0x9d   : > { %3854 = vmatprep.subr.mxu1 %v3081_v14 }
  0x9e   : > { %3760 = vmatmul.mubr.f32.gmra.mxu0 %v434_v21  ;;  %3855 = vmatpush3.msra.mxu1 %v3081_v14  ;;  %v4546_v21 = vshrl.u32 %v967_v20, 7 }
  0x9f   : > { %3762 = vmatprep.mubr.f32.mxu0 %v435_v22  ;;  %3856 = vmatprep.subr.mxu1 %v3080_v15 }
  0xa0   : > { %3857 = vmatpush3.msra.mxu1 %v3080_v15  ;;  %v1373_v22 = vsub.s32 1, %v4546_v21  ;;  %vm1025_vm0 = vcmp.ge.s32.totalorder %v4546_v21, 1 }
  0xa1   : > { %3858 = vmatprep.subr.mxu1 %v3079_v16 }
  0xa2   : > { %3763 = vmatmul.mubr.f32.gmra.mxu0 %v436_v23  ;;  %3859 = vmatpush3.msra.mxu1 %v3079_v16  ;;  %v1301_v23 = vld [vmem:[#allocation7] sm:$0xff] }
  0xa3   : > { %3765 = vmatprep.mubr.f32.mxu0 %v437_v24  ;;  %3860 = vmatprep.subr.mxu1 %v3078_v17  ;;  %v1305_v24 = vsub.s32 0, %v4546_v21 }
  0xa4   : > { %3861 = vmatpush3.msra.mxu1 %v3078_v17 }
  0xa5   : > { %3862 = vmatprep.subr.mxu1 %v3077_v18 }
  0xa6   : > { %3766 = vmatmul.mubr.f32.gmra.mxu0 %v438_v25  ;;  %3863 = vmatpush3.msra.mxu1 %v3077_v18  ;;  %v4550_v25 = vrot.slane %v1301_v23, %v1373_v22 }
  0xa7   : > { %3768 = vmatprep.mubr.f32.mxu0 %v439_v26  ;;  %3864 = vmatprep.subr.mxu1 %v3076_v19  ;;  %v1618_v26 = vsub.s32 2, %v4546_v21 }
  0xa8   : > { %3865 = vmatpush3.msra.mxu1 %v3076_v19 }
  0xaa   : > { %3769 = vmatmul.mubr.f32.gmra.mxu0 %v440_v27  ;;  %v4553_v27 = vrot.slane %v1301_v23, %v1305_v24 }
  0xab   : > { %3771 = vmatprep.mubr.f32.mxu0 %v441_v28  ;;  %v4555_v28 = vrot.slane %v1301_v23, %v1618_v26 }
  0xae   : > { %3772 = vmatmul.mubr.f32.gmra.mxu0 %v442_v29  ;;  %v1375_v29 = vmul.f32 0.0, %v4550_v25 }
  0xaf   : > { %3774 = vmatprep.mubr.f32.mxu0 %v443_v30 }
  0xb2   : > { %3775 = vmatmul.mubr.f32.gmra.mxu0 %v444_v31 }
  0xb3   : > { %3777 = vmatprep.mubr.f32.mxu0 %v445_v32  ;;  %v4561_v32 = vld [vmem:[%s6638_s2] ss:$0 sm:$0xff] }
  0xb6   : > { %3778 = vmatmul.mubr.f32.gmra.mxu0 %v446_v33  ;;  %v1307_v33 = vmul.f32 0.0, %v4553_v27 }
  0xb7   : > { %3780 = vmatprep.mubr.f32.mxu0 %v447_v34  ;;  %v1472_v34 = vrot.slane %v1375_v29, 1 }
  0xba   : > { %3781 = vmatmul.mubr.f32.gmra.mxu0 %v448_v35  ;;  %v1620_v35 = vmul.f32 0.0, %v4555_v28 }
  0xbb   : > { %3783 = vmatprep.mubr.f32.mxu0 %v449_v36 }
  0xbe   : > { %3784 = vmatmul.mubr.f32.gmra.mxu0 %v450_v37  ;;  %v1863_v37 = vsub.s32 3, %v4546_v21 }
  0xbf   : > { %3786 = vmatprep.mubr.f32.mxu0 %v451_v38 }
  0xc2   : > { %3787 = vmatmul.mubr.f32.gmra.mxu0 %v452_v39  ;;  %v1931_v39 = vsub.s32 4, %v4546_v21 }
  0xc3   : > { %3789 = vmatprep.mubr.f32.mxu0 %v453_v40  ;;  %v2175_v40 = vsub.s32 5, %v4546_v21 }
  0xc6   : > { %3790 = vmatmul.mubr.f32.gmra.mxu0 %v454_v41  ;;  %v2419_v41 = vsub.s32 6, %v4546_v21 }
  0xc7   : > { %3792 = vmatprep.mubr.f32.mxu0 %v455_v42 }
  0xca   : > { %3793 = vmatmul.mubr.f32.gmra.mxu0 %v456_v43  ;;  %v4571_v43 = vadd.s32 16, %v4546_v21 }
  0xcb   : > { %3795 = vmatprep.mubr.f32.mxu0 %v457_v44  ;;  %v1584_v44 = vadd.f32 %v1472_v34, %v1307_v33 }
  0xcc   : > { %vm1084_vm1 = vcmp.le.s32.totalorder %v4571_v43, 16 }
  0xce   : > { %3796 = vmatmul.mubr.f32.gmra.mxu0 %v458_v45  ;;  %v1717_v45 = vrot.slane %v1620_v35, 2 }
  0xcf   : > { %3798 = vmatprep.mubr.f32.mxu0 %v459_v46 }
  0xd0   : > { %v4585_v56 = vadd.f32 %v1717_v45, %v1584_v44 }
  0xd2   : > { %3799 = vmatmul.mubr.f32.gmra.mxu0 %v460_v47  ;;  %v2487_v47 = vsub.s32 7, %v4546_v21 }
  0xd3   : > { %3801 = vmatprep.mubr.f32.mxu0 %v461_v48  ;;  %v4575_v48 = vrot.slane %v1301_v23, %v1863_v37 }
  0xd4   : > { %v4589_v58 = vrot.slane %v1301_v23, %v2487_v47 }
  0xd6   : > { %3802 = vmatmul.mubr.f32.gmra.mxu0 %v462_v49 }
  0xd7   : > { %3804 = vmatprep.mubr.f32.mxu0 %v463_v50 }
  0xda   : > { %3805 = vmatmul.mubr.f32.gmra.mxu0 %v464_v51  ;;  %v4577_v51 = vrot.slane %v1301_v23, %v1931_v39 }
  0xdb   : > { %3807 = vmatprep.mubr.f32.mxu0 %v465_v52  ;;  %v4579_v52 = vrot.slane %v1301_v23, %v2175_v40 }
  0xde   : > { %3808 = vmatmul.mubr.f32.gmra.mxu0 %v466_v53 }
  0xdf   : > { %3810 = vmatprep.mubr.f32.mxu0 %v467_v54  ;;  %v4582_v54 = vrot.slane %v1301_v23, %v2419_v41 }
  0xe2   : > { %3811 = vmatmul.mubr.f32.gmra.mxu0 %v468_v55 }
  0xe3   : > { %3813 = vmatprep.mubr.f32.mxu0 %v469_v57 }
  0xe6   : > { %3814 = vmatmul.mubr.f32.gmra.mxu0 %v470_v59 }
  0xe7   : > { %3816 = vmatprep.mubr.f32.mxu0 %v471_v60 }
  0xea   : > { %3817 = vmatmul.mubr.f32.gmra.mxu0 %v472_v62 }
  0xeb   : > { %3819 = vmatprep.mubr.f32.mxu0 %v473_v63 }
  0xee   : > { %3820 = vmatmul.mubr.f32.gmra.mxu0 %v474_v2 }
  0xef   : > { %3822 = vmatprep.mubr.f32.mxu0 %v475_v3 }
  0xf2   : > { %3823 = vmatmul.mubr.f32.gmra.mxu0 %v476_v5 }
  0xf3   : > { %3825 = vmatprep.mubr.f32.mxu0 %v477_v6 }
  0xf6   : > { %3826 = vmatmul.mubr.f32.gmra.mxu0 %v478_v8 }
  0xf7   : > { %3828 = vmatprep.mubr.f32.mxu0 %v479_v10 }
  0xfa   : > { %3829 = vmatmul.mubr.f32.gmra.mxu0 %v480_v12 }
 0x156   : > { %v3755_v30 = vpop.f32.mrf.mxu0 }
 0x158   : > { %v572_v31 = vpop.f32.mrf.mxu0 }
 0x15a   : > { %v3758_v36 = vpop.f32.mrf.mxu0 }
 0x15b   : > { %v588_v38 = vadd.f32 %v3758_v36, %v4561_v32 }
 0x15c   : > { %v582_v42 = vpop.f32.mrf.mxu0 }
 0x15d   : > { %v844_v46 = vmax.f32 %v588_v38, 0.0 }
 0x15e   : > { %v3761_v49 = vpop.f32.mrf.mxu0 }
 0x15f   : > { %v898_v50 = vmin.f32 %v844_v46, 6.0  ;;  %v598_v53 = vadd.f32 %v3761_v49, %v4561_v32 }
 0x160   : > { %v592_v55 = vpop.f32.mrf.mxu0 }
 0x161   : > { %v1250_v57 = vsel %vm1025_vm0, %v898_v50, 0.0  ;;  %v846_v59 = vmax.f32 %v598_v53, 0.0  ;;  %v593_v60 = vadd.f32 %v4561_v32, %v592_v55 }
 0x162   : > { %v4593_v61 = vmul.f32 %v4553_v27, %v1250_v57  ;;  %v4596_v62 = vmul.f32 %v4550_v25, %v1250_v57  ;;  %v4599_v63 = vmul.f32 %v4555_v28, %v1250_v57  ;;  %v1865_v0 = vmul.f32 %v4575_v48, %v1250_v57  ;;  %v3764_v1 = vpop.f32.mrf.mxu0 }
 0x163   : > { %v1933_v2 = vmul.f32 %v4577_v51, %v1250_v57  ;;  %v4604_v3 = vmul.f32 %v4579_v52, %v1250_v57  ;;  %v900_v4 = vmin.f32 %v846_v59, 6.0  ;;  %v845_v5 = vmax.f32 %v593_v60, 0.0 }
 0x164   : > { %v608_v8 = vadd.f32 %v3764_v1, %v4561_v32  ;;  %v602_v9 = vpop.f32.mrf.mxu0  ;;  %v1897_v10 = vadd.f32 %v1865_v0, %v4585_v56 }
 0x165   : > { %v2029_v11 = vrot.slane %v1933_v2, 1  ;;  %v1252_v13 = vsel %vm1084_vm1, %v900_v4, 0.0  ;;  %v4613_v14 = vmin.f32 %v845_v5, 6.0  ;;  %v603_v37 = vadd.f32 %v4561_v32, %v602_v9 }
 0x166   : > { %v4616_v15 = vmul.f32 %v4550_v25, %v1252_v13  ;;  %v4619_v16 = vmul.f32 %v4555_v28, %v1252_v13  ;;  %v4622_v17 = vmul.f32 %v4577_v51, %v1252_v13  ;;  %v4625_v18 = vmul.f32 %v4579_v52, %v1252_v13  ;;  %v3767_v19 = vpop.f32.mrf.mxu0 }
 0x167   : > { %v4629_v20 = vmul.f32 %v4553_v27, %v4613_v14  ;;  %v4633_v22 = vmul.f32 %v4550_v25, %v4613_v14  ;;  %v4637_v23 = vmul.f32 %v4555_v28, %v4613_v14  ;;  %v848_v24 = vmax.f32 %v608_v8, 0.0 }
 0x168   : > { %v612_v33 = vpop.f32.mrf.mxu0  ;;  %v618_v38 = vadd.f32 %v3767_v19, %v4561_v32  ;;  %v4652_v41 = vmul.f32 %v4577_v51, %v4613_v14  ;;  %v4656_v42 = vmul.f32 %v4579_v52, %v4613_v14  ;;  %v847_v44 = vmax.f32 %v603_v37, 0.0 }
 0x169   : > { %v4645_v36 = vmin.f32 %v848_v24, 6.0  ;;  %v613_v39 = vadd.f32 %v4561_v32, %v612_v33 }
 0x16a   : > { %v3770_v40 = vpop.f32.mrf.mxu0  ;;  %v850_v49 = vmax.f32 %v618_v38, 0.0  ;;  %v6659_v57 = vrot.slane %v4652_v41, 1  ;;  %v901_v59 = vmin.f32 %v847_v44, 6.0 }
 0x16b   : > { %v1312_v45 = vmul.f32 %v4553_v27, %v4645_v36  ;;  %v4662_v46 = vmul.f32 %v4550_v25, %v4645_v36  ;;  %v4666_v47 = vmul.f32 %v4555_v28, %v4645_v36  ;;  %v849_v50 = vmax.f32 %v613_v39, 0.0 }
 0x16c   : > { %v628_v53 = vadd.f32 %v3770_v40, %v4561_v32  ;;  %v622_v55 = vpop.f32.mrf.mxu0  ;;  %v904_v2 = vmin.f32 %v850_v49, 6.0  ;;  %v2031_v9 = vsel %vm1471_vm2, %v2029_v11, %v6659_v57  ;;  %v4678_v13 = vsel %vm1025_vm0, %v901_v59, 0.0 }
 0x16d   : > { %6787 = vst [vmem:[#allocation23_spill] sm:$0xff] %v4662_v46  ;;  %6788 = vst [vmem:[#allocation24_spill] sm:$0xff] %v4666_v47  ;;  %v6660_v60 = vrot.slane %v4662_v46, 1  ;;  %v6661_v0 = vrot.slane %v4666_v47, 2  ;;  %v623_v1 = vadd.f32 %v4561_v32, %v622_v55  ;;  %v903_v4 = vmin.f32 %v849_v50, 6.0 }
 0x16e   : > { %v852_v5 = vmax.f32 %v628_v53, 0.0  ;;  %v3773_v8 = vpop.f32.mrf.mxu0  ;;  %v4681_v33 = vadd.f32 %v2031_v9, %v1897_v10  ;;  %v4685_v37 = vmul.f32 %v4550_v25, %v4678_v13  ;;  %v4689_v38 = vmul.f32 %v4555_v28, %v4678_v13  ;;  %v4717_v9 = vld [vmem:[#allocation7 + $0x8] ss:$0 sm:$0xff] }
 0x16f   : > { %v851_v19 = vmax.f32 %v623_v1, 0.0  ;;  %v638_v24 = vadd.f32 %v3773_v8, %v4561_v32  ;;  %v4693_v11 = vsel %vm1025_vm0, %v904_v2, 0.0  ;;  %v1255_v39 = vsel %vm1084_vm1, %v903_v4, 0.0 }
 0x170   : > { %6789 = vst [vmem:[#allocation25_spill] sm:$0xff] %v4685_v37  ;;  %6790 = vst [vmem:[#allocation26_spill] sm:$0xff] %v4689_v38  ;;  %v632_v40 = vpop.f32.mrf.mxu0  ;;  %v4699_v10 = vmul.f32 %v4550_v25, %v4693_v11  ;;  %v4703_v44 = vmul.f32 %v4555_v28, %v4693_v11  ;;  %v1383_v49 = vmul.f32 %v4550_v25, %v1255_v39 }
 0x171   : > { %v1628_v50 = vmul.f32 %v4555_v28, %v1255_v39  ;;  %v4710_v59 = vmul.f32 %v4577_v51, %v1255_v39  ;;  %v4713_v1 = vmul.f32 %v4579_v52, %v1255_v39  ;;  %v4722_v55 = vmul.f32 %v4589_v58, %v1255_v39 }
 0x172   : > { %6791 = vst [vmem:[#allocation27_spill] sm:$0xff] %v4699_v10  ;;  %6792 = vst [vmem:[#allocation28_spill] sm:$0xff] %v4703_v44  ;;  %v3776_v2 = vpop.f32.mrf.mxu0  ;;  %v1485_v29 = vrot.slane %v1383_v49, 1  ;;  %v4725_v35 = vmul.f32 %v4717_v9, %v1255_v39  ;;  %v4733_v8 = vmin.f32 %v851_v19, 6.0  ;;  %v854_v34 = vmax.f32 %v638_v24, 0.0 }
 0x173   : > { %v1730_v26 = vrot.slane %v1628_v50, 2  ;;  %v906_v50 = vmin.f32 %v852_v5, 6.0  ;;  %v633_v31 = vadd.f32 %v4561_v32, %v632_v40  ;;  %v648_v30 = vadd.f32 %v3776_v2, %v4561_v32 }
 0x174   : > { %v642_v6 = vpop.f32.mrf.mxu0  ;;  %v1486_v4 = vsel %vm1471_vm2, %v6660_v60, %v1485_v29 }
 0x175   : > { %v1731_v49 = vsel %vm1716_vm3, %v6661_v0, %v1730_v26  ;;  %v1589_v7 = vadd.f32 %v1486_v4, %v1312_v45  ;;  %v1258_v57 = vsel %vm1084_vm1, %v906_v50, 0.0  ;;  %v643_v29 = vadd.f32 %v4561_v32, %v642_v6 }
 0x176   : > { %v3779_v39 = vpop.f32.mrf.mxu0  ;;  %v4745_v5 = vmul.f32 %v4550_v25, %v1258_v57  ;;  %v4748_v45 = vmul.f32 %v4555_v28, %v1258_v57  ;;  %v4751_v19 = vmul.f32 %v4577_v51, %v1258_v57  ;;  %v4754_v40 = vmul.f32 %v4579_v52, %v1258_v57 }
 0x177   : > { %v658_v60 = vadd.f32 %v3779_v39, %v4561_v32  ;;  %v4742_v26 = vadd.f32 %v1731_v49, %v1589_v7  ;;  %v4757_v2 = vmul.f32 %v4589_v58, %v1258_v57  ;;  %v4760_v6 = vmul.f32 %v4717_v9, %v1258_v57 }
 0x178   : > { %6794 = vst [vmem:[#allocation30_spill] sm:$0xff] %v4745_v5  ;;  %6795 = vst [vmem:[#allocation31_spill] sm:$0xff] %v4748_v45  ;;  %v652_v24 = vpop.f32.mrf.mxu0  ;;  %v4762_v7 = vmin.f32 %v854_v34, 6.0  ;;  %v853_v39 = vmax.f32 %v633_v31, 0.0  ;;  %v856_v44 = vmax.f32 %v648_v30, 0.0  ;;  %v855_v10 = vmax.f32 %v643_v29, 0.0 }
 0x179   : > { %6793 = vst [vmem:[#allocation29_spill] sm:$0xff] %v4742_v26  ;;  %6796 = vst [vmem:[#allocation32_spill] sm:$0xff] %v4751_v19  ;;  %v858_v53 = vmax.f32 %v658_v60, 0.0  ;;  %v653_v12 = vadd.f32 %v4561_v32, %v652_v24 }
 0x17a   : > { %6797 = vst [vmem:[#allocation33_spill] sm:$0xff] %v4754_v40  ;;  %6798 = vst [vmem:[#allocation34_spill] sm:$0xff] %v4762_v7  ;;  %v3782_v0 = vpop.f32.mrf.mxu0  ;;  %v907_v26 = vmin.f32 %v853_v39, 6.0  ;;  %v1316_v57 = vmul.f32 %v4553_v27, %v4762_v7  ;;  %v4773_v34 = vmul.f32 %v4550_v25, %v4762_v7  ;;  %v4777_v49 = vmul.f32 %v4555_v28, %v4762_v7 }
 0x17b   : > { %v910_v4 = vmin.f32 %v856_v44, 6.0  ;;  %v909_v50 = vmin.f32 %v855_v10, 6.0  ;;  %v668_v45 = vadd.f32 %v3782_v0, %v4561_v32  ;;  %v857_v37 = vmax.f32 %v653_v12, 0.0 }
 0x17c   : > { %6799 = vst [vmem:[#allocation35_spill] sm:$0xff] %v4773_v34  ;;  %6800 = vst [vmem:[#allocation36_spill] sm:$0xff] %v4777_v49  ;;  %v662_v31 = vpop.f32.mrf.mxu0  ;;  %v4782_v30 = vsel %vm1025_vm0, %v907_v26, 0.0 }
 0x17d   : > { %6801 = vst [vmem:[#allocation37_spill] sm:$0xff] %v4782_v30  ;;  %v4789_v40 = vmul.f32 %v4550_v25, %v4782_v30  ;;  %v4793_v60 = vmul.f32 %v4555_v28, %v4782_v30  ;;  %v4797_v10 = vsel %vm1025_vm0, %v910_v4, 0.0  ;;  %v1261_v44 = vsel %vm1084_vm1, %v909_v50, 0.0 }
 0x17e   : > { %v3785_v5 = vpop.f32.mrf.mxu0  ;;  %6804 = vst [vmem:[#allocation40_spill] sm:$0xff] %v4797_v10  ;;  %v4803_v26 = vmul.f32 %v4550_v25, %v4797_v10  ;;  %v4807_v0 = vmul.f32 %v4555_v28, %v4797_v10  ;;  %v1389_v24 = vmul.f32 %v4550_v25, %v1261_v44  ;;  %v1634_v39 = vmul.f32 %v4555_v28, %v1261_v44 }
 0x17f   : > { %6802 = vst [vmem:[#allocation38_spill] sm:$0xff] %v4789_v40  ;;  %6803 = vst [vmem:[#allocation39_spill] sm:$0xff] %v4793_v60  ;;  %v4816_v50 = vmul.f32 %v4577_v51, %v1261_v44  ;;  %v4819_v7 = vmul.f32 %v4579_v52, %v1261_v44  ;;  %v4826_v4 = vmul.f32 %v4589_v58, %v1261_v44  ;;  %v6809_v40 = vrot.slane %v4773_v34, 1 }
 0x180   : > { %6805 = vst [vmem:[#allocation41_spill] sm:$0xff] %v4803_v26  ;;  %6806 = vst [vmem:[#allocation42_spill] sm:$0xff] %v4807_v0  ;;  %v4811_v29 = vpop.f32.mrf.mxu0  ;;  %v1495_v38 = vrot.slane %v1389_v24, 1  ;;  %v1740_v47 = vrot.slane %v1634_v39, 2  ;;  %v4829_v19 = vmul.f32 %v4717_v9, %v1261_v44  ;;  %v6810_v10 = vrot.slane %v4777_v49, 2 }
 0x181   : > { %6807 = vst [vmem:[#allocation43_spill] sm:$0xff] %v4816_v50  ;;  %6808 = vst [vmem:[#allocation44_spill] sm:$0xff] %v4819_v7  ;;  %v912_v24 = vmin.f32 %v858_v53, 6.0  ;;  %v860_v26 = vmax.f32 %v668_v45, 0.0  ;;  %v663_v7 = vadd.f32 %v4561_v32, %v662_v31  ;;  %v4843_v50 = vmin.f32 %v857_v37, 6.0 }
 0x182   : > { %v4831_v60 = vpop.f32.mrf.mxu0  ;;  %v1496_v30 = vsel %vm1471_vm2, %v6809_v40, %v1495_v38  ;;  %v1741_v39 = vsel %vm1716_vm3, %v6810_v10, %v1740_v47  ;;  %v2274_v34 = vrot.slane %v4656_v42, 2  ;;  %v2421_v38 = vmul.f32 %v4582_v54, %v4678_v13 }
 0x183   : > { %v1593_v0 = vadd.f32 %v1496_v30, %v1316_v57  ;;  %v1264_v44 = vsel %vm1084_vm1, %v912_v24, 0.0  ;;  %v4870_v31 = vmin.f32 %v860_v26, 6.0  ;;  %v2490_v10 = vmul.f32 %v4589_v58, %v4645_v36 }
 0x184   : > { %v4851_v12 = vmul.f32 %v4550_v25, %v1264_v44  ;;  %v4854_v47 = vmul.f32 %v4555_v28, %v1264_v44  ;;  %v4857_v53 = vmul.f32 %v4577_v51, %v1264_v44  ;;  %v4859_v45 = vpop.f32.mrf.mxu0  ;;  %v4862_v37 = vmul.f32 %v4579_v52, %v1264_v44 }
 0x185   : > { %v4848_v40 = vadd.f32 %v1741_v39, %v1593_v0  ;;  %v4865_v42 = vmul.f32 %v4589_v58, %v1264_v44  ;;  %v4868_v57 = vmul.f32 %v4717_v9, %v1264_v44  ;;  %v859_v39 = vmax.f32 %v663_v7, 0.0 }
 0x186   : > { %6812 = vst [vmem:[#allocation46_spill] sm:$0xff] %v4851_v12  ;;  %6813 = vst [vmem:[#allocation47_spill] sm:$0xff] %v4854_v47  ;;  %v2489_v44 = vmul.f32 %v4589_v58, %v4678_v13  ;;  %v2733_v7 = vmul.f32 %v4717_v9, %v4678_v13  ;;  %v4887_v30 = vpop.f32.mrf.mxu0  ;;  %v1866_v0 = vmul.f32 %v4575_v48, %v4613_v14 }
 0x187   : > { %6811 = vst [vmem:[#allocation45_spill] sm:$0xff] %v4848_v40  ;;  %6814 = vst [vmem:[#allocation48_spill] sm:$0xff] %v4857_v53  ;;  %v6817_v40 = vrot.slane %v4604_v3, 2  ;;  %v913_v26 = vmin.f32 %v859_v39, 6.0  ;;  %v2734_v3 = vmul.f32 %v4717_v9, %v4645_v36  ;;  %v2586_v39 = vrot.slane %v2490_v10, 1 }
 0x188   : > { %6815 = vst [vmem:[#allocation49_spill] sm:$0xff] %v4862_v37  ;;  %6816 = vst [vmem:[#allocation50_spill] sm:$0xff] %v4868_v57  ;;  %v2585_v24 = vrot.slane %v2489_v44, 1  ;;  %v2829_v46 = vrot.slane %v2733_v7, 2  ;;  %v1898_v14 = vadd.f32 %v1866_v0, %v4585_v56  ;;  %v6823_v10 = vrot.slane %v4625_v18, 2  ;;  %v4916_v53 = vpop.f32.mrf.mxu0 }
 0x189   : > { %v2275_v49 = vsel %vm1716_vm3, %v6817_v40, %v2274_v34  ;;  %v678_v40 = vadd.f32 %v3785_v5, %v4561_v32  ;;  %v2830_v12 = vrot.slane %v2734_v3, 2  ;;  %v4924_v56 = vld [vmem:[%s6640_s4] ss:$0 sm:$0xff]  ;;  %v2422_v18 = vmul.f32 %v4582_v54, %v4645_v36 }
 0x18a   : > { %v2385_v57 = vadd.f32 %v2275_v49, %v4681_v33  ;;  %v4896_v33 = vsel %vm1025_vm0, %v913_v26, 0.0  ;;  %v2587_v37 = vsel %vm1471_vm2, %v2585_v24, %v2586_v39  ;;  %v6821_v26 = vrot.slane %v4622_v17, 1 }
 0x18b   : > { %6818 = vst [vmem:[#allocation51_spill] sm:$0xff] %v4896_v33  ;;  %v4900_v47 = vmul.f32 %v4550_v25, %v4896_v33  ;;  %v4904_v44 = vmul.f32 %v4555_v28, %v4896_v33  ;;  %v862_v5 = vmax.f32 %v678_v40, 0.0  ;;  %v2277_v7 = vsel %vm1716_vm3, %v2274_v34, %v6823_v10 }
 0x18c   : > { %v2453_v49 = vadd.f32 %v2421_v38, %v2385_v57  ;;  %v6822_v38 = vrot.slane %v4652_v41, 1  ;;  %v2831_v24 = vsel %vm1716_vm3, %v2829_v46, %v2830_v12  ;;  %v6824_v34 = vrot.slane %v4722_v55, 1 }
 0x18d   : > { %6819 = vst [vmem:[#allocation52_spill] sm:$0xff] %v4900_v47  ;;  %6820 = vst [vmem:[#allocation53_spill] sm:$0xff] %v4904_v44  ;;  %v916_v17 = vmin.f32 %v862_v5, 6.0  ;;  %v673_v46 = vadd.f32 %v4561_v32, %v4811_v29  ;;  %v4946_v55 = vmul.f32 %v4555_v28, %v4870_v31  ;;  %v688_v3 = vadd.f32 %v4831_v60, %v4561_v32 }
 0x18e   : > { %v2033_v57 = vsel %vm1471_vm2, %v6822_v38, %v6821_v26  ;;  %v2697_v40 = vadd.f32 %v2587_v37, %v2453_v49  ;;  %v2589_v0 = vsel %vm1471_vm2, %v2586_v39, %v6824_v34  ;;  %v2832_v38 = vrot.slane %v4725_v35, 2  ;;  %v4948_v35 = vpop.f32.mrf.mxu0 }
 0x18f   : > { %v2142_v41 = vadd.f32 %v2033_v57, %v1898_v14  ;;  %v1320_v37 = vmul.f32 %v4553_v27, %v4870_v31  ;;  %v4938_v49 = vsel %vm1025_vm0, %v916_v17, 0.0  ;;  %v4942_v14 = vmul.f32 %v4550_v25, %v4870_v31  ;;  %6827 = vst [vmem:[#allocation56_spill] sm:$0xff] %v4946_v55 }
 0x190   : > { %v2941_v26 = vadd.f32 %v2831_v24, %v2697_v40  ;;  %6825 = vst [vmem:[#allocation54_spill] sm:$0xff] %v4938_v49  ;;  %v4953_v39 = vmul.f32 %v4550_v25, %v4938_v49  ;;  %v4957_v57 = vmul.f32 %v4555_v28, %v4938_v49  ;;  %v2833_v10 = vsel %vm1716_vm3, %v2830_v12, %v2832_v38 }
 0x191   : > { %v2386_v5 = vadd.f32 %v2277_v7, %v2142_v41  ;;  %6826 = vst [vmem:[#allocation55_spill] sm:$0xff] %v4942_v14  ;;  %v861_v40 = vmax.f32 %v673_v46, 0.0  ;;  %v6830_v47 = vrot.slane %v4633_v22, 1  ;;  %v6831_v12 = vrot.slane %v4596_v62, 1 }
 0x192   : > { %v2980_v29 = vadd.f32 %v4924_v56, %v2941_v26  ;;  %6828 = vst [vmem:[#allocation57_spill] sm:$0xff] %v4953_v39  ;;  %6829 = vst [vmem:[#allocation58_spill] sm:$0xff] %v4957_v57  ;;  %v6832_v38 = vrot.slane %v4637_v23, 2  ;;  %v6833_v46 = vrot.slane %v4599_v63, 2  ;;  %v864_v34 = vmax.f32 %v688_v3, 0.0 }
 0x193   : > { %v2454_v7 = vadd.f32 %v2422_v18, %v2386_v5  ;;  %v915_v44 = vmin.f32 %v861_v40, 6.0  ;;  %v1479_v18 = vsel %vm1471_vm2, %v6831_v12, %v6830_v47  ;;  %v1936_v47 = vmul.f32 %v4577_v51, %v4678_v13 }
 0x194   : > { %v3012_v41 = vmax.f32 %v2980_v29, 0.0  ;;  %v1724_v5 = vsel %vm1716_vm3, %v6833_v46, %v6832_v38  ;;  %v4976_v29 = vpop.f32.mrf.mxu0  ;;  %v1586_v60 = vadd.f32 %v1479_v18, %v4593_v61  ;;  %v4987_v63 = vmul.f32 %v4577_v51, %v4645_v36 }
 0x195   : > { %v2698_v33 = vadd.f32 %v2589_v0, %v2454_v7  ;;  %v1867_v0 = vmul.f32 %v4575_v48, %v4678_v13  ;;  %v1267_v62 = vsel %vm1084_vm1, %v915_v44, 0.0  ;;  %v918_v12 = vmin.f32 %v864_v34, 6.0 }
 0x196   : > { %v3044_v26 = vmin.f32 %v3012_v41, 6.0  ;;  %v1395_v40 = vmul.f32 %v4550_v25, %v1267_v62  ;;  %v1640_v3 = vmul.f32 %v4555_v28, %v1267_v62  ;;  %v4992_v61 = vmul.f32 %v4577_v51, %v1267_v62 }
 0x197   : > { %v2942_v7 = vadd.f32 %v2833_v10, %v2698_v33  ;;  %v4995_v33 = vmul.f32 %v4579_v52, %v1267_v62  ;;  %v4999_v10 = vmul.f32 %v4589_v58, %v1267_v62  ;;  %v5002_v41 = vmul.f32 %v4717_v9, %v1267_v62 }
 0x198   : > { %3866 = vmatprep.mubr.f32.mxu1 %v3044_v26  ;;  %v5004_v26 = vpop.f32.mrf.mxu0  ;;  %v1505_v18 = vrot.slane %v1395_v40, 1  ;;  %v1750_v38 = vrot.slane %v1640_v3, 2  ;;  %v1831_v39 = vadd.f32 %v1724_v5, %v1586_v60  ;;  %v6835_v49 = vrot.slane %v4942_v14, 1 }
 0x199   : > { %6834 = vst [vmem:[#allocation59_spill] sm:$0xff] %v4995_v33  ;;  %v2981_v44 = vadd.f32 %v4924_v56, %v2942_v7  ;;  %v1270_v7 = vsel %vm1084_vm1, %v918_v12, 0.0  ;;  %v6836_v34 = vrot.slane %v4946_v55, 2  ;;  %v2034_v14 = vrot.slane %v1936_v47, 1 }
 0x19a   : > { %v1506_v62 = vsel %vm1471_vm2, %v6835_v49, %v1505_v18  ;;  %v5018_v3 = vmul.f32 %v4550_v25, %v1270_v7  ;;  %v5021_v17 = vmul.f32 %v4555_v28, %v1270_v7  ;;  %v5024_v57 = vmul.f32 %v4577_v51, %v1270_v7  ;;  %v5029_v60 = vpop.f32.mrf.mxu0 }
 0x19b   : > { %v3013_v24 = vmax.f32 %v2981_v44, 0.0  ;;  %v1751_v40 = vsel %vm1716_vm3, %v6836_v34, %v1750_v38  ;;  %v1597_v46 = vadd.f32 %v1506_v62, %v1320_v37  ;;  %v5027_v5 = vmul.f32 %v4579_v52, %v1270_v7 }
 0x19c   : > { %6837 = vst [vmem:[#allocation60_spill] sm:$0xff] %v5018_v3  ;;  %6838 = vst [vmem:[#allocation61_spill] sm:$0xff] %v5021_v17  ;;  %v5034_v18 = vmul.f32 %v4589_v58, %v1270_v7  ;;  %v5037_v38 = vmul.f32 %v4717_v9, %v1270_v7  ;;  %v1899_v34 = vadd.f32 %v1867_v0, %v1831_v39  ;;  %v2035_v49 = vrot.slane %v4987_v63, 1  ;;  %v5055_v0 = vpop.f32.mrf.mxu0 }
 0x19d   : > { %v3045_v44 = vmin.f32 %v3013_v24, 6.0  ;;  %6839 = vst [vmem:[#allocation62_spill] sm:$0xff] %v5024_v57  ;;  %6840 = vst [vmem:[#allocation63_spill] sm:$0xff] %v5027_v5  ;;  %v5039_v37 = vadd.f32 %v1751_v40, %v1597_v46  ;;  %v2180_v12 = vmul.f32 %v4579_v52, %v4678_v13  ;;  %v2181_v7 = vmul.f32 %v4579_v52, %v4645_v36 }
 0x19e   : > { %6841 = vst [vmem:[#allocation64_spill] sm:$0xff] %v5034_v18  ;;  %6842 = vst [vmem:[#allocation65_spill] sm:$0xff] %v5037_v38  ;;  %v2423_v46 = vmul.f32 %v4582_v54, %v4693_v11  ;;  %v2492_v40 = vmul.f32 %v4589_v58, %v4693_v11  ;;  %v2493_v39 = vmul.f32 %v4589_v58, %v4733_v8  ;;  %v6844_v38 = vrot.slane %v4616_v15, 1 }
 0x19f   : > { %3867 = vmatmul.mubr.f32.vlgmr.msra.gmra.mxu1 %v3045_v44  ;;  %6843 = vst [vmem:[#allocation66_spill] sm:$0xff] %v5039_v37  ;;  %v2036_v47 = vsel %vm1471_vm2, %v2034_v14, %v2035_v49  ;;  %v2278_v63 = vrot.slane %v2180_v12, 2  ;;  %v2736_v44 = vmul.f32 %v4717_v9, %v4693_v11  ;;  %v2737_v62 = vmul.f32 %v4717_v9, %v4733_v8 }
 0x1a0   : > { %v2143_v24 = vadd.f32 %v2036_v47, %v1899_v34  ;;  %v2279_v55 = vrot.slane %v2181_v7, 2  ;;  %v2590_v17 = vrot.slane %v2492_v40, 1  ;;  %v2591_v3 = vrot.slane %v2493_v39, 1  ;;  %v5077_v39 = vpop.f32.mrf.mxu0 }
 0x1a1   : > { %v2834_v5 = vrot.slane %v2736_v44, 2  ;;  %v2835_v37 = vrot.slane %v2737_v62, 2  ;;  %v683_v57 = vadd.f32 %v4561_v32, %v4859_v45  ;;  %v6845_v14 = vrot.slane %v4633_v22, 1 }
 0x1a2   : > { %v2280_v18 = vsel %vm1716_vm3, %v2278_v63, %v2279_v55  ;;  %v2592_v33 = vsel %vm1471_vm2, %v2590_v17, %v2591_v3  ;;  %v6846_v7 = vrot.slane %v4619_v16, 2  ;;  %v6847_v40 = vrot.slane %v4637_v23, 2 }
 0x1a3   : > { %v1481_v12 = vsel %vm1471_vm2, %v6845_v14, %v6844_v38  ;;  %v2387_v45 = vadd.f32 %v2280_v18, %v2143_v24  ;;  %v2836_v15 = vsel %vm1716_vm3, %v2834_v5, %v2835_v37  ;;  %v863_v22 = vmax.f32 %v683_v57, 0.0 }
 0x1a4   : > { %v1587_v34 = vadd.f32 %v1481_v12, %v4629_v20  ;;  %v1726_v62 = vsel %vm1716_vm3, %v6847_v40, %v6846_v7  ;;  %v1868_v38 = vmul.f32 %v4575_v48, %v4645_v36  ;;  %v6848_v17 = vrot.slane %v4710_v59, 1  ;;  %v6855_v7 = vld [vmem:[#allocation24_spill] sm:$0xff] }
 0x1a5   : > { %v6849_v16 = vrot.slane %v4713_v1, 2  ;;  %v2424_v63 = vmul.f32 %v4582_v54, %v4733_v8  ;;  %v2455_v44 = vadd.f32 %v2423_v46, %v2387_v45  ;;  %v5090_v18 = vmin.f32 %v863_v22, 6.0 }
 0x1a6   : > { %v1832_v47 = vadd.f32 %v1726_v62, %v1587_v34  ;;  %v2038_v20 = vsel %vm1471_vm2, %v2035_v49, %v6848_v17  ;;  %v6850_v57 = vrot.slane %v4757_v2, 1  ;;  %v2837_v36 = vrot.slane %v4760_v6, 2  ;;  %v5102_v49 = vpop.f32.mrf.mxu0  ;;  %v6851_v2 = vld [vmem:[#allocation23_spill] sm:$0xff] }
 0x1a7   : > { %v2282_v23 = vsel %vm1716_vm3, %v2279_v55, %v6849_v16  ;;  %v698_v59 = vadd.f32 %v4887_v30, %v4561_v32  ;;  %v693_v1 = vadd.f32 %v4561_v32, %v4916_v53  ;;  %v1311_v55 = vmul.f32 %v4553_v27, %v4678_v13  ;;  %v6857_v30 = vld [vmem:[#allocation26_spill] sm:$0xff] }
 0x1a8   : > { %v2594_v5 = vsel %vm1471_vm2, %v2591_v3, %v6850_v57  ;;  %v1900_v24 = vadd.f32 %v1868_v38, %v1832_v47  ;;  %v2699_v46 = vadd.f32 %v2592_v33, %v2455_v44  ;;  %v2838_v14 = vsel %vm1716_vm3, %v2835_v37, %v2837_v36  ;;  %v6853_v3 = vld [vmem:[#allocation25_spill] sm:$0xff] }
 0x1a9   : > { %v6852_v12 = vrot.slane %v6851_v2, 1  ;;  %v6854_v34 = vrot.slane %v6853_v3, 1  ;;  %v6856_v40 = vrot.slane %v6855_v7, 2  ;;  %v6858_v62 = vrot.slane %v6857_v30, 2  ;;  %v5123_v2 = vpop.f32.mrf.mxu0 }
 0x1aa   : > { %v2144_v45 = vadd.f32 %v2038_v20, %v1900_v24  ;;  %v866_v22 = vmax.f32 %v698_v59, 0.0  ;;  %v865_v13 = vmax.f32 %v693_v1, 0.0  ;;  %v2943_v47 = vadd.f32 %v2836_v15, %v2699_v46 }
 0x1ab   : > { %v1484_v6 = vsel %vm1471_vm2, %v6854_v34, %v6852_v12  ;;  %v1729_v53 = vsel %vm1716_vm3, %v6858_v62, %v6856_v40  ;;  %v1869_v33 = vmul.f32 %v4575_v48, %v4693_v11  ;;  %v1939_v37 = vmul.f32 %v4577_v51, %v4693_v11  ;;  %v5143_v62 = vpop.f32.mrf.mxu0 }
 0x1ac   : > { %v1588_v38 = vadd.f32 %v1484_v6, %v1311_v55  ;;  %v1940_v17 = vmul.f32 %v4577_v51, %v4733_v8  ;;  %v2388_v16 = vadd.f32 %v2282_v23, %v2144_v45  ;;  %v5121_v44 = vmin.f32 %v866_v22, 6.0  ;;  %v6864_v22 = vld [vmem:[#allocation32_spill] sm:$0xff] }
 0x1ad   : > { %v919_v57 = vmin.f32 %v865_v13, 6.0  ;;  %v2982_v20 = vadd.f32 %v4924_v56, %v2943_v47  ;;  %v2039_v24 = vrot.slane %v1939_v37, 1  ;;  %v2183_v59 = vmul.f32 %v4579_v52, %v4693_v11  ;;  %v6861_v13 = vld [vmem:[#allocation37_spill] sm:$0xff] }
 0x1ae   : > { %v1833_v36 = vadd.f32 %v1729_v53, %v1588_v38  ;;  %v2040_v15 = vrot.slane %v1940_v17, 1  ;;  %v2456_v1 = vadd.f32 %v2424_v63, %v2388_v16  ;;  %v2184_v23 = vmul.f32 %v4579_v52, %v4733_v8 }
 0x1af   : > { %v5130_v55 = vsel %vm1025_vm0, %v919_v57, 0.0  ;;  %v3014_v12 = vmax.f32 %v2982_v20, 0.0  ;;  %v2283_v40 = vrot.slane %v2183_v59, 2  ;;  %v2425_v38 = vmul.f32 %v4582_v54, %v6861_v13 }
 0x1b0   : > { %v1901_v46 = vadd.f32 %v1869_v33, %v1833_v36  ;;  %v5136_v3 = vmul.f32 %v4550_v25, %v5130_v55  ;;  %v5140_v34 = vmul.f32 %v4555_v28, %v5130_v55  ;;  %v2041_v6 = vsel %vm1471_vm2, %v2039_v24, %v2040_v15 }
 0x1b1   : > { %v2700_v63 = vadd.f32 %v2594_v5, %v2456_v1  ;;  %v2284_v30 = vrot.slane %v2184_v23, 2  ;;  %v3046_v53 = vmin.f32 %v3014_v12, 6.0  ;;  %v2495_v37 = vmul.f32 %v4589_v58, %v6861_v13  ;;  %v6862_v5 = vld [vmem:[#allocation34_spill] sm:$0xff] }
 0x1b2   : > { %6859 = vst [vmem:[#allocation23_spill] sm:$0xff] %v5136_v3  ;;  %6860 = vst [vmem:[#allocation25_spill] sm:$0xff] %v5140_v34  ;;  %v2145_v7 = vadd.f32 %v2041_v6, %v1901_v46  ;;  %v2496_v17 = vmul.f32 %v4589_v58, %v6862_v5  ;;  %v2739_v57 = vmul.f32 %v4717_v9, %v6861_v13  ;;  %v5163_v46 = vpop.f32.mrf.mxu0  ;;  %v6866_v34 = vld [vmem:[#allocation33_spill] sm:$0xff] }
 0x1b3   : > { %v2944_v47 = vadd.f32 %v2838_v14, %v2700_v63  ;;  %v2285_v33 = vsel %vm1716_vm3, %v2283_v40, %v2284_v30  ;;  %3869 = vmatprep.mubr.f32.mxu1 %v3046_v53  ;;  %v2740_v36 = vmul.f32 %v4717_v9, %v6862_v5  ;;  %v708_v20 = vadd.f32 %v4948_v35, %v4561_v32  ;;  %v6863_v53 = vld [vmem:[#allocation29_spill] sm:$0xff] }
 0x1b4   : > { %v2389_v16 = vadd.f32 %v2285_v33, %v2145_v7  ;;  %v2595_v24 = vrot.slane %v2495_v37, 1  ;;  %v2596_v59 = vrot.slane %v2496_v17, 1  ;;  %v1870_v1 = vmul.f32 %v4575_v48, %v4733_v8 }
 0x1b5   : > { %v2983_v14 = vadd.f32 %v4924_v56, %v2944_v47  ;;  %v2839_v12 = vrot.slane %v2739_v57, 2  ;;  %v2840_v6 = vrot.slane %v2740_v36, 2  ;;  %v868_v63 = vmax.f32 %v708_v20, 0.0 }
 0x1b6   : > { %v2457_v23 = vadd.f32 %v2425_v38, %v2389_v16  ;;  %v2597_v40 = vsel %vm1471_vm2, %v2595_v24, %v2596_v59  ;;  %v1902_v33 = vadd.f32 %v1870_v1, %v6863_v53  ;;  %v6865_v35 = vrot.slane %v6864_v22, 1  ;;  %v5179_v22 = vpop.f32.mrf.mxu0 }
 0x1b7   : > { %v3015_v7 = vmax.f32 %v2983_v14, 0.0  ;;  %v2841_v17 = vsel %vm1716_vm3, %v2839_v12, %v2840_v6  ;;  %v922_v45 = vmin.f32 %v868_v63, 6.0  ;;  %v6867_v3 = vrot.slane %v6866_v34, 2 }
 0x1b8   : > { %v2043_v47 = vsel %vm1471_vm2, %v2040_v15, %v6865_v35  ;;  %v2701_v37 = vadd.f32 %v2597_v40, %v2457_v23  ;;  %v2426_v36 = vmul.f32 %v4582_v54, %v6862_v5  ;;  %v6868_v20 = vrot.slane %v4826_v4, 1  ;;  %v5210_v53 = vpop.f32.mrf.mxu0 }
 0x1b9   : > { %v2287_v38 = vsel %vm1716_vm3, %v2284_v30, %v6867_v3  ;;  %v3047_v16 = vmin.f32 %v3015_v7, 6.0  ;;  %v2146_v57 = vadd.f32 %v2043_v47, %v1902_v33  ;;  %v5183_v24 = vsel %vm1025_vm0, %v922_v45, 0.0 }
 0x1ba   : > { %v2599_v14 = vsel %vm1471_vm2, %v2596_v59, %v6868_v20  ;;  %v2945_v15 = vadd.f32 %v2841_v17, %v2701_v37  ;;  %6869 = vst [vmem:[#allocation24_spill] sm:$0xff] %v5183_v24  ;;  %v2842_v34 = vrot.slane %v4829_v19, 2  ;;  %v703_v3 = vadd.f32 %v4561_v32, %v4976_v29 }
 0x1bb   : > { %3870 = vmatmul.mubr.f32.gmra.mxu1 %v3047_v16  ;;  %v5190_v30 = vmul.f32 %v4550_v25, %v5183_v24  ;;  %v5194_v4 = vmul.f32 %v4555_v28, %v5183_v24  ;;  %v2390_v59 = vadd.f32 %v2287_v38, %v2146_v57  ;;  %v1324_v1 = vmul.f32 %v4553_v27, %v5121_v44 }
 0x1bc   : > { %v2984_v45 = vadd.f32 %v4924_v56, %v2945_v15  ;;  %v2843_v19 = vsel %vm1716_vm3, %v2840_v6, %v2842_v34  ;;  %v867_v23 = vmax.f32 %v703_v3, 0.0  ;;  %v5202_v29 = vmul.f32 %v4550_v25, %v5121_v44  ;;  %v5233_v34 = vpop.f32.mrf.mxu0 }
 0x1bd   : > { %6870 = vst [vmem:[#allocation26_spill] sm:$0xff] %v5190_v30  ;;  %6871 = vst [vmem:[#allocation37_spill] sm:$0xff] %v5194_v4  ;;  %v2458_v7 = vadd.f32 %v2426_v36, %v2390_v59  ;;  %v5208_v40 = vmul.f32 %v4555_v28, %v5121_v44  ;;  %v718_v47 = vadd.f32 %v5004_v26, %v4561_v32 }
 0x1be   : > { %6872 = vst [vmem:[#allocation34_spill] sm:$0xff] %v5202_v29  ;;  %v3016_v33 = vmax.f32 %v2984_v45, 0.0  ;;  %v921_v35 = vmin.f32 %v867_v23, 6.0  ;;  %v6709_v6 = vrot.slane %v5202_v29, 1  ;;  %v1313_v38 = vmul.f32 %v4553_v27, %v4693_v11 }
 0x1bf   : > { %6873 = vst [vmem:[#allocation29_spill] sm:$0xff] %v5208_v40  ;;  %v2702_v37 = vadd.f32 %v2599_v14, %v2458_v7  ;;  %v6708_v17 = vrot.slane %v5208_v40, 2  ;;  %v5220_v16 = vmul.f32 %v4550_v25, %v4733_v8  ;;  %v870_v20 = vmax.f32 %v718_v47, 0.0 }
 0x1c0   : > { %v3048_v57 = vmin.f32 %v3016_v33, 6.0  ;;  %v1273_v36 = vsel %vm1084_vm1, %v921_v35, 0.0  ;;  %v5226_v15 = vmul.f32 %v4555_v28, %v4733_v8  ;;  %v2186_v35 = vmul.f32 %v4579_v52, %v6861_v13 }
 0x1c1   : > { %v2946_v32 = vadd.f32 %v2843_v19, %v2702_v37  ;;  %v1401_v26 = vmul.f32 %v4550_v25, %v1273_v36  ;;  %v1646_v14 = vmul.f32 %v4555_v28, %v1273_v36  ;;  %v5231_v11 = vmul.f32 %v4577_v51, %v1273_v36  ;;  %v6890_v37 = vld [vmem:[#allocation40_spill] sm:$0xff] }
 0x1c2   : > { %3872 = vmatprep.mubr.f32.mxu1 %v3048_v57  ;;  %v5236_v3 = vmul.f32 %v4579_v52, %v1273_v36  ;;  %v5239_v59 = vmul.f32 %v4589_v58, %v1273_v36  ;;  %v5242_v45 = vmul.f32 %v4717_v9, %v1273_v36  ;;  %v924_v19 = vmin.f32 %v870_v20, 6.0 }
 0x1c3   : > { %6874 = vst [vmem:[#allocation32_spill] sm:$0xff] %v5231_v11  ;;  %v2985_v23 = vadd.f32 %v4924_v56, %v2946_v32  ;;  %v1515_v7 = vrot.slane %v1401_v26, 1  ;;  %v1760_v33 = vrot.slane %v1646_v14, 2  ;;  %v1488_v63 = vrot.slane %v5220_v16, 1  ;;  %v5260_v26 = vpop.f32.mrf.mxu0 }
 0x1c4   : > { %6875 = vst [vmem:[#allocation33_spill] sm:$0xff] %v5236_v3  ;;  %6876 = vst [vmem:[#allocation67_spill] sm:$0xff] %v5242_v45  ;;  %v1276_v57 = vsel %vm1084_vm1, %v924_v19, 0.0  ;;  %v2499_v40 = vmul.f32 %v4589_v58, %v4843_v50  ;;  %v2743_v3 = vmul.f32 %v4717_v9, %v4843_v50 }
 0x1c5   : > { %v3017_v12 = vmax.f32 %v2985_v23, 0.0  ;;  %v1516_v36 = vsel %vm1471_vm2, %v6709_v6, %v1515_v7  ;;  %v1761_v20 = vsel %vm1716_vm3, %v6708_v17, %v1760_v33  ;;  %v5258_v32 = vmul.f32 %v4550_v25, %v1276_v57  ;;  %6878 = vst [vmem:[#allocation69_spill] sm:$0xff] %v5260_v26  ;;  %v6894_v26 = vld [vmem:[#allocation31_spill] sm:$0xff] }
 0x1c6   : > { %v1601_v14 = vadd.f32 %v1516_v36, %v1324_v1  ;;  %v5263_v47 = vmul.f32 %v4555_v28, %v1276_v57  ;;  %v5266_v16 = vmul.f32 %v4577_v51, %v1276_v57  ;;  %v5269_v19 = vmul.f32 %v4579_v52, %v1276_v57 }
 0x1c7   : > { %6877 = vst [vmem:[#allocation68_spill] sm:$0xff] %v5258_v32  ;;  %v3049_v23 = vmin.f32 %v3017_v12, 6.0  ;;  %v5273_v33 = vmul.f32 %v4589_v58, %v1276_v57  ;;  %v5276_v17 = vmul.f32 %v4717_v9, %v1276_v57  ;;  %v6885_v12 = vld [vmem:[#allocation27_spill] sm:$0xff]  ;;  %v1733_v32 = vrot.slane %v5226_v15, 2 }
 0x1c8   : > { %6879 = vst [vmem:[#allocation70_spill] sm:$0xff] %v5263_v47  ;;  %6880 = vst [vmem:[#allocation71_spill] sm:$0xff] %v5266_v16  ;;  %v5278_v6 = vadd.f32 %v1761_v20, %v1601_v14  ;;  %v6886_v4 = vrot.slane %v6885_v12, 1  ;;  %v1871_v57 = vmul.f32 %v4575_v48, %v6861_v13  ;;  %v5290_v20 = vpop.f32.mrf.mxu0  ;;  %v1942_v1 = vmul.f32 %v4577_v51, %v6861_v13  ;;  %v6888_v12 = vld [vmem:[#allocation28_spill] sm:$0xff] }
 0x1c9   : > { %6881 = vst [vmem:[#allocation72_spill] sm:$0xff] %v5269_v19  ;;  %6882 = vst [vmem:[#allocation73_spill] sm:$0xff] %v5273_v33  ;;  %3873 = vmatmul.mubr.f32.gmra.mxu1 %v3049_v23  ;;  %v1943_v23 = vmul.f32 %v4577_v51, %v6862_v5  ;;  %v6889_v36 = vrot.slane %v6888_v12, 2  ;;  %v2187_v15 = vmul.f32 %v4579_v52, %v6862_v5  ;;  %v2288_v16 = vrot.slane %v2186_v35, 2  ;;  %v5319_v35 = vld [vmem:[%s6638_s2] ss:$0 sm:$0xff] }
 0x1ca   : > { %6883 = vst [vmem:[#allocation74_spill] sm:$0xff] %v5276_v17  ;;  %6884 = vst [vmem:[#allocation75_spill] sm:$0xff] %v5278_v6  ;;  %v1489_v7 = vsel %vm1471_vm2, %v6886_v4, %v1488_v63  ;;  %v2427_v47 = vmul.f32 %v4582_v54, %v6890_v37  ;;  %v2044_v30 = vrot.slane %v1942_v1, 1  ;;  %v5311_v29 = vpop.f32.mrf.mxu0  ;;  %v713_v1 = vadd.f32 %v5319_v35, %v5029_v60 }
 0x1cb   : > { %6887 = vst [vmem:[#allocation27_spill] sm:$0xff] %v5290_v20  ;;  %v1590_v14 = vadd.f32 %v1489_v7, %v1313_v38  ;;  %v1734_v4 = vsel %vm1716_vm3, %v6889_v36, %v1733_v32  ;;  %v2498_v38 = vmul.f32 %v4589_v58, %v6890_v37  ;;  %v2045_v19 = vrot.slane %v1943_v23, 1  ;;  %6891 = vst [vmem:[#allocation28_spill] sm:$0xff] %v5311_v29 }
 0x1cc   : > { %v2289_v6 = vrot.slane %v2187_v15, 2  ;;  %v2742_v36 = vmul.f32 %v4717_v9, %v6890_v37  ;;  %v2601_v23 = vrot.slane %v2499_v40, 1  ;;  %v6895_v45 = vrot.slane %v6894_v26, 2 }
 0x1cd   : > { %v1835_v7 = vadd.f32 %v1734_v4, %v1590_v14  ;;  %v2600_v12 = vrot.slane %v2498_v38, 1  ;;  %v2046_v33 = vsel %vm1471_vm2, %v2044_v30, %v2045_v19  ;;  %v2845_v30 = vrot.slane %v2743_v3, 2 }
 0x1ce   : > { %v2290_v14 = vsel %vm1716_vm3, %v2288_v16, %v2289_v6  ;;  %v2844_v4 = vrot.slane %v2742_v36, 2  ;;  %v869_v38 = vmax.f32 %v713_v1, 0.0  ;;  %v1736_v60 = vsel %vm1716_vm3, %v1733_v32, %v6895_v45  ;;  %v5335_v16 = vpop.f32.mrf.mxu0 }
 0x1cf   : > { %v1903_v17 = vadd.f32 %v1871_v57, %v1835_v7  ;;  %v1314_v57 = vmul.f32 %v4553_v27, %v4733_v8  ;;  %v6892_v7 = vld [vmem:[#allocation30_spill] sm:$0xff]  ;;  %v2602_v24 = vsel %vm1471_vm2, %v2600_v12, %v2601_v23  ;;  %v1872_v40 = vmul.f32 %v4575_v48, %v6862_v5 }
 0x1d0   : > { %v6893_v11 = vrot.slane %v6892_v7, 1  ;;  %v5338_v3 = vmin.f32 %v869_v38, 6.0  ;;  %v2428_v45 = vmul.f32 %v4582_v54, %v4843_v50  ;;  %v6900_v5 = vrot.slane %v4865_v42, 1  ;;  %v6904_v7 = vld [vmem:[#allocation38_spill] sm:$0xff] }
 0x1d1   : > { %v2147_v15 = vadd.f32 %v2046_v33, %v1903_v17  ;;  %v2846_v17 = vsel %vm1716_vm3, %v2844_v4, %v2845_v30  ;;  %v6896_v33 = vld [vmem:[#allocation43_spill] sm:$0xff] }
 0x1d2   : > { %v1491_v29 = vsel %vm1471_vm2, %v1488_v63, %v6893_v11  ;;  %v6897_v36 = vrot.slane %v6896_v33, 1  ;;  %v2604_v32 = vsel %vm1471_vm2, %v2601_v23, %v6900_v5  ;;  %v6906_v23 = vld [vmem:[#allocation36_spill] sm:$0xff]  ;;  %v1873_v5 = vmul.f32 %v4575_v48, %v6890_v37 }
 0x1d3   : > { %v1591_v20 = vadd.f32 %v1491_v29, %v1314_v57  ;;  %v2391_v8 = vadd.f32 %v2290_v14, %v2147_v15  ;;  %v6898_v29 = vld [vmem:[#allocation44_spill] sm:$0xff]  ;;  %v6901_v14 = vld [vmem:[#allocation50_spill] sm:$0xff]  ;;  %v728_v57 = vadd.f32 %v5319_v35, %v5055_v0  ;;  %v6902_v15 = vld [vmem:[#allocation35_spill] sm:$0xff]  ;;  %v5368_v0 = vpop.f32.mrf.mxu0 }
 0x1d4   : > { %v2048_v63 = vsel %vm1471_vm2, %v2045_v19, %v6897_v36  ;;  %v6899_v12 = vrot.slane %v6898_v29, 2  ;;  %v2847_v4 = vrot.slane %v6901_v14, 2  ;;  %v723_v19 = vadd.f32 %v5319_v35, %v5077_v39 }
 0x1d5   : > { %v1836_v11 = vadd.f32 %v1736_v60, %v1591_v20  ;;  %v2459_v1 = vadd.f32 %v2427_v47, %v2391_v8  ;;  %v6903_v38 = vrot.slane %v6902_v15, 1  ;;  %v6905_v60 = vrot.slane %v6904_v7, 1  ;;  %v6908_v8 = vld [vmem:[#allocation39_spill] sm:$0xff] }
 0x1d6   : > { %v2292_v26 = vsel %vm1716_vm3, %v2289_v6, %v6899_v12  ;;  %v1315_v6 = vmul.f32 %v4553_v27, %v6861_v13  ;;  %v6907_v47 = vrot.slane %v6906_v23, 2  ;;  %v6909_v33 = vrot.slane %v6908_v8, 2 }
 0x1d7   : > { %v1904_v20 = vadd.f32 %v1872_v40, %v1836_v11  ;;  %v1494_v42 = vsel %vm1471_vm2, %v6905_v60, %v6903_v38  ;;  %v2703_v29 = vadd.f32 %v2602_v24, %v2459_v1  ;;  %v2848_v39 = vsel %vm1716_vm3, %v2845_v30, %v2847_v4  ;;  %v5381_v4 = vpop.f32.mrf.mxu0 }
 0x1d8   : > { %v1739_v36 = vsel %vm1716_vm3, %v6909_v33, %v6907_v47  ;;  %v872_v40 = vmax.f32 %v728_v57, 0.0  ;;  %v871_v11 = vmax.f32 %v723_v19, 0.0  ;;  %v1592_v12 = vadd.f32 %v1494_v42, %v1315_v6 }
 0x1d9   : > { %v2148_v13 = vadd.f32 %v2048_v63, %v1904_v20  ;;  %v1945_v14 = vmul.f32 %v4577_v51, %v6890_v37  ;;  %v2947_v15 = vadd.f32 %v2846_v17, %v2703_v29  ;;  %v1946_v60 = vmul.f32 %v4577_v51, %v4843_v50 }
 0x1da   : > { %v5375_v38 = vmin.f32 %v872_v40, 6.0  ;;  %v925_v7 = vmin.f32 %v871_v11, 6.0  ;;  %v1837_v1 = vadd.f32 %v1739_v36, %v1592_v12  ;;  %v2189_v63 = vmul.f32 %v4579_v52, %v6890_v37  ;;  %v6916_v40 = vld [vmem:[#allocation49_spill] sm:$0xff] }
 0x1db   : > { %v2392_v24 = vadd.f32 %v2292_v26, %v2148_v13  ;;  %v2049_v30 = vrot.slane %v1945_v14, 1  ;;  %v2986_v57 = vadd.f32 %v4924_v56, %v2947_v15  ;;  %v2050_v17 = vrot.slane %v1946_v60, 1  ;;  %v5401_v13 = vpop.f32.mrf.mxu0  ;;  %v6912_v15 = vld [vmem:[#allocation51_spill] sm:$0xff] }
 0x1dc   : > { %v5386_v19 = vsel %vm1025_vm0, %v925_v7, 0.0  ;;  %v2190_v20 = vmul.f32 %v4579_v52, %v4843_v50  ;;  %v1905_v23 = vadd.f32 %v1873_v5, %v1837_v1  ;;  %v2293_v33 = vrot.slane %v2189_v63, 2 }
 0x1dd   : > { %v2460_v6 = vadd.f32 %v2428_v45, %v2392_v24  ;;  %v5392_v26 = vmul.f32 %v4550_v25, %v5386_v19  ;;  %v5396_v42 = vmul.f32 %v4555_v28, %v5386_v19  ;;  %v3018_v47 = vmax.f32 %v2986_v57, 0.0 }
 0x1de   : > { %v2051_v8 = vsel %vm1471_vm2, %v2049_v30, %v2050_v17  ;;  %v2294_v36 = vrot.slane %v2190_v20, 2  ;;  %v2429_v7 = vmul.f32 %v4582_v54, %v6912_v15  ;;  %v2501_v5 = vmul.f32 %v4589_v58, %v6912_v15 }
 0x1df   : > { %6910 = vst [vmem:[#allocation40_spill] sm:$0xff] %v5392_v26  ;;  %6911 = vst [vmem:[#allocation30_spill] sm:$0xff] %v5396_v42  ;;  %v2704_v29 = vadd.f32 %v2604_v32, %v2460_v6  ;;  %v2149_v45 = vadd.f32 %v2051_v8, %v1905_v23  ;;  %v3050_v12 = vmin.f32 %v3018_v47, 6.0  ;;  %v2502_v32 = vmul.f32 %v4589_v58, %v4870_v31  ;;  %v5419_v8 = vpop.f32.mrf.mxu0 }
 0x1e0   : > { %v2295_v14 = vsel %vm1716_vm3, %v2293_v33, %v2294_v36  ;;  %v2745_v1 = vmul.f32 %v4717_v9, %v6912_v15  ;;  %v2605_v30 = vrot.slane %v2501_v5, 1  ;;  %v2746_v63 = vmul.f32 %v4717_v9, %v4870_v31 }
 0x1e1   : > { %v2948_v60 = vadd.f32 %v2848_v39, %v2704_v29  ;;  %v2393_v24 = vadd.f32 %v2295_v14, %v2149_v45  ;;  %3875 = vmatprep.mubr.f32.mxu1 %v3050_v12  ;;  %v738_v57 = vadd.f32 %v5319_v35, %v5102_v49  ;;  %v1874_v20 = vmul.f32 %v4575_v48, %v4843_v50  ;;  %v6913_v45 = vld [vmem:[#allocation45_spill] sm:$0xff]  ;;  %v6914_v14 = vld [vmem:[#allocation48_spill] sm:$0xff] }
 0x1e2   : > { %v2606_v23 = vrot.slane %v2502_v32, 1  ;;  %v2849_v47 = vrot.slane %v2745_v1, 2  ;;  %v2850_v33 = vrot.slane %v2746_v63, 2  ;;  %v6915_v5 = vrot.slane %v6914_v14, 1  ;;  %v6936_v14 = vld [vmem:[#allocation41_spill] sm:$0xff] }
 0x1e3   : > { %v2987_v39 = vadd.f32 %v4924_v56, %v2948_v60  ;;  %v2461_v6 = vadd.f32 %v2429_v7, %v2393_v24  ;;  %v874_v29 = vmax.f32 %v738_v57, 0.0  ;;  %v1906_v12 = vadd.f32 %v1874_v20, %v6913_v45 }
 0x1e4   : > { %v2053_v9 = vsel %vm1471_vm2, %v2050_v17, %v6915_v5  ;;  %v2607_v49 = vsel %vm1471_vm2, %v2605_v30, %v2606_v23  ;;  %v6917_v42 = vrot.slane %v6916_v40, 2  ;;  %v2430_v7 = vmul.f32 %v4582_v54, %v4870_v31  ;;  %v5438_v30 = vpop.f32.mrf.mxu0 }
 0x1e5   : > { %v3019_v11 = vmax.f32 %v2987_v39, 0.0  ;;  %v2705_v24 = vadd.f32 %v2607_v49, %v2461_v6  ;;  %v2851_v32 = vsel %vm1716_vm3, %v2849_v47, %v2850_v33  ;;  %v928_v1 = vmin.f32 %v874_v29, 6.0 }
 0x1e6   : > { %v2297_v60 = vsel %vm1716_vm3, %v2294_v36, %v6917_v42  ;;  %v2150_v63 = vadd.f32 %v2053_v9, %v1906_v12  ;;  %v6918_v20 = vrot.slane %v4999_v10, 1  ;;  %v2852_v39 = vrot.slane %v5002_v41, 2  ;;  %v5468_v49 = vpop.f32.mrf.mxu0 }
 0x1e7   : > { %v3051_v57 = vmin.f32 %v3019_v11, 6.0  ;;  %v733_v40 = vadd.f32 %v5319_v35, %v5123_v2  ;;  %v2949_v42 = vadd.f32 %v2851_v32, %v2705_v24  ;;  %v5442_v36 = vsel %vm1025_vm0, %v928_v1, 0.0  ;;  %6923 = vst [vmem:[#allocation35_spill] sm:$0xff] %v5468_v49 }
 0x1e8   : > { %v2609_v17 = vsel %vm1471_vm2, %v2606_v23, %v6918_v20  ;;  %v2394_v6 = vadd.f32 %v2297_v60, %v2150_v63  ;;  %v1328_v11 = vmul.f32 %v4553_v27, %v5375_v38  ;;  %v5448_v10 = vmul.f32 %v4550_v25, %v5442_v36 }
 0x1e9   : > { %3876 = vmatmul.mubr.f32.gmra.mxu1 %v3051_v57  ;;  %v5452_v41 = vmul.f32 %v4555_v28, %v5442_v36  ;;  %v2853_v2 = vsel %vm1716_vm3, %v2850_v33, %v2852_v39  ;;  %v873_v23 = vmax.f32 %v733_v40, 0.0  ;;  %v2988_v47 = vadd.f32 %v4924_v56, %v2949_v42 }
 0x1ea   : > { %6919 = vst [vmem:[#allocation31_spill] sm:$0xff] %v5448_v10  ;;  %v2462_v29 = vadd.f32 %v2430_v7, %v2394_v6  ;;  %v5458_v45 = vmul.f32 %v4550_v25, %v5375_v38  ;;  %v5462_v12 = vmul.f32 %v4555_v28, %v5375_v38  ;;  %v748_v33 = vadd.f32 %v5319_v35, %v5143_v62  ;;  %v5480_v62 = vpop.f32.mrf.mxu0 }
 0x1eb   : > { %6920 = vst [vmem:[#allocation43_spill] sm:$0xff] %v5452_v41  ;;  %v927_v9 = vmin.f32 %v873_v23, 6.0  ;;  %v3020_v60 = vmax.f32 %v2988_v47, 0.0  ;;  %v1317_v57 = vmul.f32 %v4553_v27, %v6890_v37  ;;  %v5478_v20 = vmul.f32 %v4550_v25, %v4843_v50  ;;  %6924 = vst [vmem:[#allocation38_spill] sm:$0xff] %v5480_v62  ;;  %v5493_v47 = vld [vmem:[#allocation7 + $0x8] ss:$0 sm:$0xff] }
 0x1ec   : > { %6921 = vst [vmem:[#allocation44_spill] sm:$0xff] %v5458_v45  ;;  %6922 = vst [vmem:[#allocation50_spill] sm:$0xff] %v5462_v12  ;;  %v2706_v7 = vadd.f32 %v2609_v17, %v2462_v29  ;;  %v876_v63 = vmax.f32 %v748_v33, 0.0  ;;  %v6927_v10 = vrot.slane %v5458_v45, 1  ;;  %v6937_v5 = vrot.slane %v6936_v14, 1 }
 0x1ed   : > { %v1279_v1 = vsel %vm1084_vm1, %v927_v9, 0.0  ;;  %v3052_v39 = vmin.f32 %v3020_v60, 6.0  ;;  %v3830_v9 = vpop.f32.mrf.mxu0  ;;  %v1498_v24 = vrot.slane %v5478_v20, 1  ;;  %v2193_v14 = vmul.f32 %v4579_v52, %v4870_v31 }
 0x1ee   : > { %v2950_v40 = vadd.f32 %v2853_v2, %v2706_v7  ;;  %v1407_v17 = vmul.f32 %v4550_v25, %v1279_v1  ;;  %v1652_v42 = vmul.f32 %v4555_v28, %v1279_v1  ;;  %v5485_v6 = vmul.f32 %v4577_v51, %v1279_v1 }
 0x1ef   : > { %v5488_v23 = vmul.f32 %v4579_v52, %v1279_v1  ;;  %v5491_v37 = vmul.f32 %v4589_v58, %v1279_v1  ;;  %v5496_v29 = vmul.f32 %v5493_v47, %v1279_v1  ;;  %3878 = vmatprep.mubr.f32.mxu1 %v3052_v39  ;;  %v930_v7 = vmin.f32 %v876_v63, 6.0 }
 0x1f0   : > { %6925 = vst [vmem:[#allocation36_spill] sm:$0xff] %v5485_v6  ;;  %v2989_v2 = vadd.f32 %v4924_v56, %v2950_v40  ;;  %v1525_v33 = vrot.slane %v1407_v17, 1  ;;  %v1770_v60 = vrot.slane %v1652_v42, 2  ;;  %v6928_v39 = vrot.slane %v5462_v12, 2 }
 0x1f1   : > { %6926 = vst [vmem:[#allocation39_spill] sm:$0xff] %v5488_v23  ;;  %v1282_v63 = vsel %vm1084_vm1, %v930_v7, 0.0  ;;  %v1499_v32 = vsel %vm1471_vm2, %v6937_v5, %v1498_v24  ;;  %v1948_v7 = vmul.f32 %v4577_v51, %v6912_v15  ;;  %v6938_v5 = vld [vmem:[#allocation54_spill] sm:$0xff]  ;;  %v2749_v49 = vmul.f32 %v5493_v47, %v5090_v18 }
 0x1f2   : > { %v3021_v41 = vmax.f32 %v2989_v2, 0.0  ;;  %v1526_v1 = vsel %vm1471_vm2, %v6927_v10, %v1525_v33  ;;  %v1771_v56 = vsel %vm1716_vm3, %v6928_v39, %v1770_v60  ;;  %v5512_v17 = vmul.f32 %v4550_v25, %v1282_v63 }
 0x1f3   : > { %v1605_v40 = vadd.f32 %v1526_v1, %v1328_v11  ;;  %v5515_v42 = vmul.f32 %v4555_v28, %v1282_v63  ;;  %v5518_v20 = vmul.f32 %v4577_v51, %v1282_v63  ;;  %v5521_v10 = vmul.f32 %v4579_v52, %v1282_v63 }
 0x1f4   : > { %6929 = vst [vmem:[#allocation51_spill] sm:$0xff] %v5512_v17  ;;  %v3053_v9 = vmin.f32 %v3021_v41, 6.0  ;;  %v5524_v2 = vmul.f32 %v4589_v58, %v1282_v63  ;;  %v5527_v33 = vmul.f32 %v5493_v47, %v1282_v63  ;;  %v1636_v63 = vmul.f32 %v4555_v28, %v4843_v50  ;;  %v6939_v17 = vld [vmem:[#allocation42_spill] sm:$0xff] }
 0x1f5   : > { %6930 = vst [vmem:[#allocation45_spill] sm:$0xff] %v5515_v42  ;;  %6931 = vst [vmem:[#allocation48_spill] sm:$0xff] %v5518_v20  ;;  %v5529_v11 = vadd.f32 %v1771_v56, %v1605_v40  ;;  %v1594_v56 = vadd.f32 %v1499_v32, %v1317_v57  ;;  %v1875_v40 = vmul.f32 %v4575_v48, %v6912_v15  ;;  %v2054_v32 = vrot.slane %v1948_v7, 1 }
 0x1f6   : > { %6932 = vst [vmem:[#allocation49_spill] sm:$0xff] %v5521_v10  ;;  %6933 = vst [vmem:[#allocation76_spill] sm:$0xff] %v5524_v2  ;;  %3879 = vmatmul.mubr.f32.gmra.mxu1 %v3053_v9  ;;  %v1949_v9 = vmul.f32 %v4577_v51, %v4870_v31  ;;  %v1743_v60 = vrot.slane %v1636_v63, 2  ;;  %v2192_v41 = vmul.f32 %v4579_v52, %v6912_v15  ;;  %v6940_v10 = vrot.slane %v6939_v17, 2 }
 0x1f7   : > { %6934 = vst [vmem:[#allocation77_spill] sm:$0xff] %v5527_v33  ;;  %6935 = vst [vmem:[#allocation78_spill] sm:$0xff] %v5529_v11  ;;  %v2431_v1 = vmul.f32 %v4582_v54, %v6938_v5  ;;  %v2504_v39 = vmul.f32 %v4589_v58, %v6938_v5  ;;  %v2505_v42 = vmul.f32 %v4589_v58, %v5090_v18  ;;  %v2299_v11 = vrot.slane %v2193_v14, 2 }
 0x1f8   : > { %v2055_v57 = vrot.slane %v1949_v9, 1  ;;  %v1744_v63 = vsel %vm1716_vm3, %v6940_v10, %v1743_v60  ;;  %v2298_v20 = vrot.slane %v2192_v41, 2  ;;  %v2748_v12 = vmul.f32 %v5493_v47, %v6938_v5 }
 0x1f9   : > { %v1839_v26 = vadd.f32 %v1744_v63, %v1594_v56  ;;  %v2610_v7 = vrot.slane %v2504_v39, 1  ;;  %v2611_v9 = vrot.slane %v2505_v42, 1  ;;  %v743_v17 = vadd.f32 %v5319_v35, %v5163_v46  ;;  %v6941_v56 = vld [vmem:[#allocation46_spill] sm:$0xff] }
 0x1fa   : > { %v2056_v45 = vsel %vm1471_vm2, %v2054_v32, %v2055_v57  ;;  %v2300_v62 = vsel %vm1716_vm3, %v2298_v20, %v2299_v11  ;;  %v2854_v33 = vrot.slane %v2748_v12, 2  ;;  %v1318_v14 = vmul.f32 %v4553_v27, %v4843_v50  ;;  %v6943_v20 = vld [vmem:[#allocation47_spill] sm:$0xff] }
 0x1fb   : > { %v1907_v10 = vadd.f32 %v1875_v40, %v1839_v26  ;;  %v2612_v41 = vsel %vm1471_vm2, %v2610_v7, %v2611_v9  ;;  %v6942_v63 = vrot.slane %v6941_v56, 1  ;;  %v2855_v42 = vrot.slane %v2749_v49, 2  ;;  %v6946_v50 = vld [vmem:[#allocation59_spill] sm:$0xff] }
 0x1fc   : > { %v875_v32 = vmax.f32 %v743_v17, 0.0  ;;  %v6944_v2 = vrot.slane %v6943_v20, 2  ;;  %v1876_v12 = vmul.f32 %v4575_v48, %v4870_v31  ;;  %v6945_v40 = vrot.slane %v4992_v61, 1  ;;  %v6950_v61 = vld [vmem:[#allocation65_spill] sm:$0xff] }
 0x1fd   : > { %v1501_v39 = vsel %vm1471_vm2, %v1498_v24, %v6942_v63  ;;  %v2151_v46 = vadd.f32 %v2056_v45, %v1907_v10  ;;  %v6947_v6 = vrot.slane %v6946_v50, 2  ;;  %v2856_v49 = vsel %vm1716_vm3, %v2854_v33, %v2855_v42 }
 0x1fe   : > { %v1746_v23 = vsel %vm1716_vm3, %v1743_v60, %v6944_v2  ;;  %v1595_v26 = vadd.f32 %v1501_v39, %v1318_v14  ;;  %v2058_v7 = vsel %vm1471_vm2, %v2055_v57, %v6945_v40  ;;  %v5586_v24 = vmin.f32 %v875_v32, 6.0  ;;  %v6948_v60 = vld [vmem:[#allocation64_spill] sm:$0xff] }
 0x1ff   : > { %v2302_v56 = vsel %vm1716_vm3, %v2299_v11, %v6947_v6  ;;  %v2432_v2 = vmul.f32 %v4582_v54, %v5090_v18  ;;  %v6949_v17 = vrot.slane %v6948_v60, 1  ;;  %v2395_v45 = vadd.f32 %v2300_v62, %v2151_v46  ;;  %v6951_v11 = vld [vmem:[#allocation55_spill] sm:$0xff]  ;;  %v6953_v39 = vld [vmem:[#allocation52_spill] sm:$0xff] }
 0x200   : > { %v1840_v10 = vadd.f32 %v1746_v23, %v1595_v26  ;;  %v2857_v14 = vrot.slane %v6950_v61, 2  ;;  %v758_v57 = vadd.f32 %v5319_v35, %v5179_v22  ;;  %v753_v6 = vadd.f32 %v5319_v35, %v5210_v53  ;;  %v6957_v23 = vld [vmem:[#allocation53_spill] sm:$0xff] }
 0x201   : > { %v2614_v31 = vsel %vm1471_vm2, %v2611_v9, %v6949_v17  ;;  %v1319_v33 = vmul.f32 %v4553_v27, %v6912_v15  ;;  %v6952_v63 = vrot.slane %v6951_v11, 1  ;;  %v6954_v32 = vrot.slane %v6953_v39, 1  ;;  %v6955_v9 = vld [vmem:[#allocation56_spill] sm:$0xff] }
 0x202   : > { %v6956_v62 = vrot.slane %v6955_v9, 2  ;;  %v6958_v46 = vrot.slane %v6957_v23, 2  ;;  %v2463_v40 = vadd.f32 %v2431_v1, %v2395_v45  ;;  %v1908_v22 = vadd.f32 %v1876_v12, %v1840_v10  ;;  %v5632_v9 = vld [vmem:[%s6640_s4] ss:$0 sm:$0xff] }
 0x203   : > { %v1504_v20 = vsel %vm1471_vm2, %v6954_v32, %v6952_v63  ;;  %v2858_v50 = vsel %vm1716_vm3, %v2855_v42, %v2857_v14  ;;  %v878_v53 = vmax.f32 %v758_v57, 0.0  ;;  %v877_v60 = vmax.f32 %v753_v6, 0.0 }
 0x204   : > { %v1749_v26 = vsel %vm1716_vm3, %v6958_v46, %v6956_v62  ;;  %v1596_v17 = vadd.f32 %v1504_v20, %v1319_v33  ;;  %v1877_v15 = vmul.f32 %v4575_v48, %v6938_v5  ;;  %v1951_v61 = vmul.f32 %v4577_v51, %v6938_v5 }
 0x205   : > { %v2707_v11 = vadd.f32 %v2612_v41, %v2463_v40  ;;  %v2152_v63 = vadd.f32 %v2058_v7, %v1908_v22  ;;  %v5615_v39 = vmin.f32 %v878_v53, 6.0  ;;  %v1952_v32 = vmul.f32 %v4577_v51, %v5090_v18 }
 0x206   : > { %v931_v1 = vmin.f32 %v877_v60, 6.0  ;;  %v1841_v12 = vadd.f32 %v1749_v26, %v1596_v17  ;;  %v2059_v45 = vrot.slane %v1951_v61, 1  ;;  %v2195_v42 = vmul.f32 %v4579_v52, %v6938_v5 }
 0x207   : > { %v2951_v10 = vadd.f32 %v2856_v49, %v2707_v11  ;;  %v2396_v14 = vadd.f32 %v2302_v56, %v2152_v63  ;;  %v2060_v57 = vrot.slane %v1952_v32, 1  ;;  %v2196_v6 = vmul.f32 %v4579_v52, %v5090_v18 }
 0x208   : > { %v5625_v41 = vsel %vm1025_vm0, %v931_v1, 0.0  ;;  %v1909_v7 = vadd.f32 %v1877_v15, %v1841_v12  ;;  %v2303_v33 = vrot.slane %v2195_v42, 2  ;;  %v2433_v20 = vmul.f32 %v4582_v54, %v5130_v55 }
 0x209   : > { %v2990_v56 = vadd.f32 %v5632_v9, %v2951_v10  ;;  %v2464_v49 = vadd.f32 %v2432_v2, %v2396_v14  ;;  %v5637_v62 = vmul.f32 %v4550_v25, %v5625_v41  ;;  %v5641_v23 = vmul.f32 %v4555_v28, %v5625_v41 }
 0x20a   : > { %v2061_v46 = vsel %vm1471_vm2, %v2059_v45, %v2060_v57  ;;  %v2304_v26 = vrot.slane %v2196_v6, 2  ;;  %v2507_v40 = vmul.f32 %v4589_v58, %v5130_v55  ;;  %v2508_v22 = vmul.f32 %v4589_v58, %v5121_v44 }
 0x20b   : > { %6959 = vst [vmem:[#allocation41_spill] sm:$0xff] %v5637_v62  ;;  %6960 = vst [vmem:[#allocation54_spill] sm:$0xff] %v5641_v23  ;;  %v3022_v53 = vmax.f32 %v2990_v56, 0.0  ;;  %v2708_v60 = vadd.f32 %v2614_v31, %v2464_v49  ;;  %v2153_v15 = vadd.f32 %v2061_v46, %v1909_v7  ;;  %v2751_v12 = vmul.f32 %v5493_v47, %v5130_v55 }
 0x20c   : > { %v2305_v61 = vsel %vm1716_vm3, %v2303_v33, %v2304_v26  ;;  %v2615_v11 = vrot.slane %v2507_v40, 1  ;;  %v2616_v63 = vrot.slane %v2508_v22, 1  ;;  %v2752_v45 = vmul.f32 %v5493_v47, %v5121_v44  ;;  %v6961_v33 = vld [vmem:[#allocation62_spill] sm:$0xff] }
 0x20d   : > { %v3054_v32 = vmin.f32 %v3022_v53, 6.0  ;;  %v2952_v1 = vadd.f32 %v2858_v50, %v2708_v60  ;;  %v2397_v42 = vadd.f32 %v2305_v61, %v2153_v15  ;;  %v768_v10 = vadd.f32 %v5319_v35, %v5233_v34  ;;  %v6963_v22 = vld [vmem:[#allocation66_spill] sm:$0xff]  ;;  %v6964_v60 = vld [vmem:[#allocation63_spill] sm:$0xff] }
 0x20e   : > { %v2617_v31 = vsel %vm1471_vm2, %v2615_v11, %v2616_v63  ;;  %v1878_v14 = vmul.f32 %v4575_v48, %v5090_v18  ;;  %v2859_v7 = vrot.slane %v2751_v12, 2  ;;  %v2860_v50 = vrot.slane %v2752_v45, 2 }
 0x20f   : > { %3881 = vmatprep.mubr.f32.mxu1 %v3054_v32  ;;  %v2991_v6 = vadd.f32 %v5632_v9, %v2952_v1  ;;  %v6962_v56 = vrot.slane %v6961_v33, 1  ;;  %v2465_v46 = vadd.f32 %v2433_v20, %v2397_v42  ;;  %v880_v40 = vmax.f32 %v768_v10, 0.0  ;;  %v6967_v42 = vld [vmem:[#allocation67_spill] sm:$0xff]  ;;  %v6968_v33 = vld [vmem:[#allocation69_spill] sm:$0xff] }
 0x210   : > { %v1910_v53 = vadd.f32 %v1878_v14, %v6963_v22  ;;  %v6965_v15 = vrot.slane %v6964_v60, 2  ;;  %v2861_v11 = vsel %vm1716_vm3, %v2859_v7, %v2860_v50  ;;  %v2434_v32 = vmul.f32 %v4582_v54, %v5121_v44 }
 0x211   : > { %v2063_v49 = vsel %vm1471_vm2, %v2060_v57, %v6962_v56  ;;  %v3023_v61 = vmax.f32 %v2991_v6, 0.0  ;;  %v6966_v1 = vrot.slane %v5239_v59, 1  ;;  %v2709_v45 = vadd.f32 %v2617_v31, %v2465_v46 }
 0x212   : > { %v2307_v34 = vsel %vm1716_vm3, %v2304_v26, %v6965_v15  ;;  %v934_v57 = vmin.f32 %v880_v40, 6.0  ;;  %v2154_v20 = vadd.f32 %v2063_v49, %v1910_v53  ;;  %v2862_v10 = vrot.slane %v6967_v42, 2 }
 0x213   : > { %v2619_v12 = vsel %vm1471_vm2, %v2616_v63, %v6966_v1  ;;  %v3055_v14 = vmin.f32 %v3023_v61, 6.0  ;;  %v763_v56 = vadd.f32 %v5319_v35, %v6968_v33  ;;  %v1332_v26 = vmul.f32 %v4553_v27, %v5615_v39 }
 0x214   : > { %v5681_v6 = vmul.f32 %v4550_v25, %v5615_v39  ;;  %v2953_v7 = vadd.f32 %v2861_v11, %v2709_v45  ;;  %v5685_v59 = vsel %vm1025_vm0, %v934_v57, 0.0  ;;  %v2398_v63 = vadd.f32 %v2307_v34, %v2154_v20 }
 0x215   : > { %v2863_v31 = vsel %vm1716_vm3, %v2860_v50, %v2862_v10  ;;  %3882 = vmatmul.mubr.f32.gmra.mxu1 %v3055_v14  ;;  %v5690_v49 = vmul.f32 %v4550_v25, %v5685_v59  ;;  %v5694_v46 = vmul.f32 %v4555_v28, %v5685_v59  ;;  %v879_v40 = vmax.f32 %v763_v56, 0.0  ;;  %v6973_v50 = vld [vmem:[#allocation27_spill] sm:$0xff] }
 0x216   : > { %6969 = vst [vmem:[#allocation42_spill] sm:$0xff] %v5681_v6  ;;  %v6736_v22 = vrot.slane %v5681_v6, 1  ;;  %v2992_v53 = vadd.f32 %v5632_v9, %v2953_v7  ;;  %v2466_v60 = vadd.f32 %v2434_v32, %v2398_v63  ;;  %v5700_v15 = vmul.f32 %v4555_v28, %v5615_v39  ;;  %v6988_v6 = vld [vmem:[#allocation60_spill] sm:$0xff] }
 0x217   : > { %6970 = vst [vmem:[#allocation46_spill] sm:$0xff] %v5690_v49  ;;  %6971 = vst [vmem:[#allocation47_spill] sm:$0xff] %v5694_v46  ;;  %v778_v34 = vadd.f32 %v5319_v35, %v6973_v50  ;;  %v933_v1 = vmin.f32 %v879_v40, 6.0  ;;  %v1321_v45 = vmul.f32 %v4553_v27, %v6938_v5  ;;  %v5713_v14 = vmul.f32 %v4550_v25, %v5090_v18 }
 0x218   : > { %6972 = vst [vmem:[#allocation59_spill] sm:$0xff] %v5700_v15  ;;  %v3024_v57 = vmax.f32 %v2992_v53, 0.0  ;;  %v2710_v20 = vadd.f32 %v2619_v12, %v2466_v60  ;;  %v6737_v42 = vrot.slane %v5700_v15, 2  ;;  %v5717_v33 = vmul.f32 %v4555_v28, %v5090_v18  ;;  %v6987_v15 = vld [vmem:[#allocation28_spill] sm:$0xff] }
 0x219   : > { %v882_v32 = vmax.f32 %v778_v34, 0.0  ;;  %v1285_v10 = vsel %vm1084_vm1, %v933_v1, 0.0  ;;  %v1879_v56 = vmul.f32 %v4575_v48, %v5130_v55  ;;  %v1508_v17 = vrot.slane %v5713_v14, 1 }
 0x21a   : > { %v3056_v5 = vmin.f32 %v3024_v57, 6.0  ;;  %v2954_v7 = vadd.f32 %v2863_v31, %v2710_v20  ;;  %v1413_v12 = vmul.f32 %v4550_v25, %v1285_v10  ;;  %v1658_v63 = vmul.f32 %v4555_v28, %v1285_v10  ;;  %v6982_v20 = vld [vmem:[#allocation57_spill] sm:$0xff] }
 0x21b   : > { %v5724_v40 = vmul.f32 %v4577_v51, %v1285_v10  ;;  %v5727_v53 = vmul.f32 %v4579_v52, %v1285_v10  ;;  %v5730_v60 = vmul.f32 %v4589_v58, %v1285_v10  ;;  %v5733_v50 = vmul.f32 %v5493_v47, %v1285_v10 }
 0x21c   : > { %3884 = vmatprep.mubr.f32.mxu1 %v3056_v5  ;;  %v2993_v34 = vadd.f32 %v5632_v9, %v2954_v7  ;;  %v1535_v31 = vrot.slane %v1413_v12, 1  ;;  %v1780_v1 = vrot.slane %v1658_v63, 2  ;;  %v936_v57 = vmin.f32 %v882_v32, 6.0 }
 0x21d   : > { %6974 = vst [vmem:[#allocation64_spill] sm:$0xff] %v5727_v53  ;;  %v6983_v61 = vrot.slane %v6982_v20, 1  ;;  %v2199_v20 = vmul.f32 %v4579_v52, %v5121_v44  ;;  %v2755_v23 = vmul.f32 %v5493_v47, %v5338_v3 }
 0x21e   : > { %v3025_v2 = vmax.f32 %v2993_v34, 0.0  ;;  %v1536_v10 = vsel %vm1471_vm2, %v6736_v22, %v1535_v31  ;;  %v1781_v5 = vsel %vm1716_vm3, %v6737_v42, %v1780_v1  ;;  %v1288_v32 = vsel %vm1084_vm1, %v936_v57, 0.0 }
 0x21f   : > { %v1609_v7 = vadd.f32 %v1536_v10, %v1332_v26  ;;  %v5749_v12 = vmul.f32 %v4550_v25, %v1288_v32  ;;  %v5752_v63 = vmul.f32 %v4555_v28, %v1288_v32  ;;  %v5755_v14 = vmul.f32 %v4577_v51, %v1288_v32  ;;  %v6984_v10 = vld [vmem:[#allocation58_spill] sm:$0xff] }
 0x220   : > { %v3057_v34 = vmin.f32 %v3025_v2, 6.0  ;;  %v5758_v31 = vmul.f32 %v4579_v52, %v1288_v32  ;;  %v5761_v22 = vmul.f32 %v4589_v58, %v1288_v32  ;;  %v5764_v1 = vmul.f32 %v5493_v47, %v1288_v32 }
 0x221   : > { %6975 = vst [vmem:[#allocation65_spill] sm:$0xff] %v5749_v12  ;;  %6976 = vst [vmem:[#allocation55_spill] sm:$0xff] %v5752_v63  ;;  %v5766_v26 = vadd.f32 %v1781_v5, %v1609_v7  ;;  %v1509_v46 = vsel %vm1471_vm2, %v6983_v61, %v1508_v17  ;;  %v1753_v32 = vrot.slane %v5717_v33, 2  ;;  %v1954_v5 = vmul.f32 %v4577_v51, %v5130_v55  ;;  %v6986_v61 = vld [vmem:[#allocation24_spill] sm:$0xff] }
 0x222   : > { %6977 = vst [vmem:[#allocation52_spill] sm:$0xff] %v5755_v14  ;;  %6978 = vst [vmem:[#allocation56_spill] sm:$0xff] %v5758_v31  ;;  %3885 = vmatmul.mubr.f32.gmra.mxu1 %v3057_v34  ;;  %v1598_v49 = vadd.f32 %v1509_v46, %v1321_v45  ;;  %v1955_v7 = vmul.f32 %v4577_v51, %v5121_v44  ;;  %v2198_v34 = vmul.f32 %v4579_v52, %v5130_v55 }
 0x223   : > { %6979 = vst [vmem:[#allocation53_spill] sm:$0xff] %v5761_v22  ;;  %6980 = vst [vmem:[#allocation62_spill] sm:$0xff] %v5764_v1  ;;  %v6985_v57 = vrot.slane %v6984_v10, 2  ;;  %v2435_v33 = vmul.f32 %v4582_v54, %v6986_v61  ;;  %v2510_v46 = vmul.f32 %v4589_v58, %v6986_v61  ;;  %v2064_v42 = vrot.slane %v1954_v5, 1  ;;  %v6990_v22 = vld [vmem:[#allocation61_spill] sm:$0xff] }
 0x224   : > { %6981 = vst [vmem:[#allocation66_spill] sm:$0xff] %v5766_v26  ;;  %v2065_v11 = vrot.slane %v1955_v7, 1  ;;  %v2308_v63 = vrot.slane %v2198_v34, 2  ;;  %v2309_v12 = vrot.slane %v2199_v20, 2  ;;  %v2511_v26 = vmul.f32 %v4589_v58, %v5338_v3 }
 0x225   : > { %v1754_v2 = vsel %vm1716_vm3, %v6985_v57, %v1753_v32  ;;  %v2620_v10 = vrot.slane %v2510_v46, 1  ;;  %v2754_v57 = vmul.f32 %v5493_v47, %v6986_v61  ;;  %v1322_v34 = vmul.f32 %v4553_v27, %v5090_v18 }
 0x226   : > { %v1843_v45 = vadd.f32 %v1754_v2, %v1598_v49  ;;  %v2066_v14 = vsel %vm1471_vm2, %v2064_v42, %v2065_v11  ;;  %v773_v49 = vadd.f32 %v5319_v35, %v6987_v15  ;;  %v2310_v2 = vsel %vm1716_vm3, %v2308_v63, %v2309_v12 }
 0x227   : > { %v2621_v5 = vrot.slane %v2511_v26, 1  ;;  %v2864_v7 = vrot.slane %v2754_v57, 2  ;;  %v2865_v46 = vrot.slane %v2755_v23, 2  ;;  %v6991_v53 = vrot.slane %v6990_v22, 2  ;;  %v6992_v23 = vld [vmem:[#allocation32_spill] sm:$0xff]  ;;  %v6994_v57 = vld [vmem:[#allocation33_spill] sm:$0xff] }
 0x228   : > { %v1911_v31 = vadd.f32 %v1879_v56, %v1843_v45  ;;  %v881_v62 = vmax.f32 %v773_v49, 0.0  ;;  %v6989_v56 = vrot.slane %v6988_v6, 1  ;;  %v1880_v63 = vmul.f32 %v4575_v48, %v5121_v44 }
 0x229   : > { %v2622_v45 = vsel %vm1471_vm2, %v2620_v10, %v2621_v5  ;;  %v1756_v15 = vsel %vm1716_vm3, %v1753_v32, %v6991_v53  ;;  %v2866_v18 = vsel %vm1716_vm3, %v2864_v7, %v2865_v46  ;;  %v6995_v10 = vrot.slane %v6994_v57, 2  ;;  %v6996_v53 = vld [vmem:[#allocation73_spill] sm:$0xff]  ;;  %v6998_v7 = vld [vmem:[#allocation74_spill] sm:$0xff] }
 0x22a   : > { %v2155_v20 = vadd.f32 %v2066_v14, %v1911_v31  ;;  %v1511_v42 = vsel %vm1471_vm2, %v1508_v17, %v6989_v56  ;;  %v5814_v14 = vmin.f32 %v881_v62, 6.0  ;;  %v6993_v31 = vrot.slane %v6992_v23, 1 }
 0x22b   : > { %v1599_v1 = vadd.f32 %v1511_v42, %v1322_v34  ;;  %v2312_v49 = vsel %vm1716_vm3, %v2309_v12, %v6995_v10  ;;  %v2436_v22 = vmul.f32 %v4582_v54, %v5338_v3  ;;  %v6997_v32 = vrot.slane %v6996_v53, 1  ;;  %v7001_v42 = vld [vmem:[#allocation23_spill] sm:$0xff] }
 0x22c   : > { %v2399_v26 = vadd.f32 %v2310_v2, %v2155_v20  ;;  %v2068_v6 = vsel %vm1471_vm2, %v2065_v11, %v6993_v31  ;;  %v2867_v62 = vrot.slane %v6998_v7, 2  ;;  %v788_v34 = vadd.f32 %v5319_v35, %v5335_v16  ;;  %v6999_v20 = vld [vmem:[#allocation34_spill] sm:$0xff] }
 0x22d   : > { %v1844_v17 = vadd.f32 %v1756_v15, %v1599_v1  ;;  %v2624_v44 = vsel %vm1471_vm2, %v2621_v5, %v6997_v32  ;;  %v783_v11 = vadd.f32 %v5319_v35, %v5368_v0  ;;  %v1323_v12 = vmul.f32 %v4553_v27, %v5130_v55  ;;  %v7003_v5 = vld [vmem:[#allocation29_spill] sm:$0xff] }
 0x22e   : > { %v2467_v2 = vadd.f32 %v2435_v33, %v2399_v26  ;;  %v7000_v56 = vrot.slane %v6999_v20, 1  ;;  %v7002_v15 = vrot.slane %v7001_v42, 1  ;;  %v7004_v33 = vrot.slane %v7003_v5, 2  ;;  %v7005_v26 = vld [vmem:[#allocation25_spill] sm:$0xff] }
 0x22f   : > { %v1912_v1 = vadd.f32 %v1880_v63, %v1844_v17  ;;  %v7006_v31 = vrot.slane %v7005_v26, 2  ;;  %v2868_v10 = vsel %vm1716_vm3, %v2865_v46, %v2867_v62  ;;  %v884_v0 = vmax.f32 %v788_v34, 0.0 }
 0x230   : > { %v1514_v23 = vsel %vm1471_vm2, %v7002_v15, %v7000_v56  ;;  %v2711_v16 = vadd.f32 %v2622_v45, %v2467_v2  ;;  %v883_v63 = vmax.f32 %v783_v11, 0.0  ;;  %v1881_v55 = vmul.f32 %v4575_v48, %v6986_v61 }
 0x231   : > { %v1759_v57 = vsel %vm1716_vm3, %v7006_v31, %v7004_v33  ;;  %v2156_v17 = vadd.f32 %v2068_v6, %v1912_v1  ;;  %v1600_v53 = vadd.f32 %v1514_v23, %v1323_v12  ;;  %v1957_v32 = vmul.f32 %v4577_v51, %v6986_v61 }
 0x232   : > { %v2955_v7 = vadd.f32 %v2866_v18, %v2711_v16  ;;  %v5849_v20 = vmin.f32 %v884_v0, 6.0  ;;  %v937_v56 = vmin.f32 %v883_v63, 6.0  ;;  %v1958_v42 = vmul.f32 %v4577_v51, %v5338_v3 }
 0x233   : > { %v2400_v45 = vadd.f32 %v2312_v49, %v2156_v17  ;;  %v1845_v2 = vadd.f32 %v1759_v57, %v1600_v53  ;;  %v2069_v46 = vrot.slane %v1957_v32, 1  ;;  %v2201_v6 = vmul.f32 %v4579_v52, %v6986_v61 }
 0x234   : > { %v2994_v62 = vadd.f32 %v5632_v9, %v2955_v7  ;;  %v5858_v34 = vsel %vm1025_vm0, %v937_v56, 0.0  ;;  %v2070_v11 = vrot.slane %v1958_v42, 1  ;;  %v2202_v18 = vmul.f32 %v4579_v52, %v5338_v3 }
 0x235   : > { %v2468_v1 = vadd.f32 %v2436_v22, %v2400_v45  ;;  %v5864_v12 = vmul.f32 %v4550_v25, %v5858_v34  ;;  %v5868_v49 = vmul.f32 %v4555_v28, %v5858_v34  ;;  %v1913_v15 = vadd.f32 %v1881_v55, %v1845_v2 }
 0x236   : > { %v3026_v23 = vmax.f32 %v2994_v62, 0.0  ;;  %v2071_v5 = vsel %vm1471_vm2, %v2069_v46, %v2070_v11  ;;  %v2313_v33 = vrot.slane %v2201_v6, 2  ;;  %v2314_v26 = vrot.slane %v2202_v18, 2 }
 0x237   : > { %7007 = vst [vmem:[#allocation63_spill] sm:$0xff] %v5864_v12  ;;  %7008 = vst [vmem:[#allocation67_spill] sm:$0xff] %v5868_v49  ;;  %v2712_v31 = vadd.f32 %v2624_v44, %v2468_v1  ;;  %v2157_v22 = vadd.f32 %v2071_v5, %v1913_v15  ;;  %v2437_v17 = vmul.f32 %v4582_v54, %v5386_v19  ;;  %v7009_v15 = vld [vmem:[#allocation75_spill] sm:$0xff]  ;;  %v6029_v49 = vld [vmem:[%s6638_s2] ss:$0 sm:$0xff] }
 0x238   : > { %v3058_v0 = vmin.f32 %v3026_v23, 6.0  ;;  %v2315_v63 = vsel %vm1716_vm3, %v2313_v33, %v2314_v26  ;;  %v2513_v53 = vmul.f32 %v4589_v58, %v5386_v19  ;;  %v2514_v7 = vmul.f32 %v4589_v58, %v5375_v38  ;;  %v7010_v5 = vld [vmem:[#allocation71_spill] sm:$0xff] }
 0x239   : > { %v2956_v55 = vadd.f32 %v2868_v10, %v2712_v31  ;;  %v2401_v32 = vadd.f32 %v2315_v63, %v2157_v22  ;;  %v2757_v44 = vmul.f32 %v5493_v47, %v5386_v19  ;;  %v2758_v42 = vmul.f32 %v5493_v47, %v5375_v38 }
 0x23a   : > { %3887 = vmatprep.mubr.f32.mxu1 %v3058_v0  ;;  %v2625_v56 = vrot.slane %v2513_v53, 1  ;;  %v798_v45 = vadd.f32 %v5319_v35, %v5381_v4  ;;  %v1882_v2 = vmul.f32 %v4575_v48, %v5338_v3  ;;  %v2626_v6 = vrot.slane %v2514_v7, 1  ;;  %v7012_v0 = vld [vmem:[#allocation72_spill] sm:$0xff] }
 0x23b   : > { %v2995_v10 = vadd.f32 %v5632_v9, %v2956_v55  ;;  %v2469_v46 = vadd.f32 %v2437_v17, %v2401_v32  ;;  %v2869_v62 = vrot.slane %v2757_v44, 2  ;;  %v2870_v18 = vrot.slane %v2758_v42, 2 }
 0x23c   : > { %v886_v1 = vmax.f32 %v798_v45, 0.0  ;;  %v1914_v23 = vadd.f32 %v1882_v2, %v7009_v15  ;;  %v7011_v33 = vrot.slane %v7010_v5, 1  ;;  %v2627_v4 = vsel %vm1471_vm2, %v2625_v56, %v2626_v6 }
 0x23d   : > { %v3027_v22 = vmax.f32 %v2995_v10, 0.0  ;;  %v7013_v63 = vrot.slane %v7012_v0, 2  ;;  %v2438_v17 = vmul.f32 %v4582_v54, %v5375_v38  ;;  %v2713_v55 = vadd.f32 %v2627_v4, %v2469_v46  ;;  %v481_v10 = vld [vmem:[%s4471_s17 + $0x1a0] sm:$0xff] }
 0x23e   : > { %v2073_v31 = vsel %vm1471_vm2, %v2070_v11, %v7011_v33  ;;  %v2871_v32 = vsel %vm1716_vm3, %v2869_v62, %v2870_v18  ;;  %v940_v7 = vmin.f32 %v886_v1, 6.0  ;;  %v7014_v45 = vrot.slane %v5491_v37, 1  ;;  %3831 = vmatprep.mubr.f32.mxu0 %v481_v10 }
 0x23f   : > { %v2317_v53 = vsel %vm1716_vm3, %v2314_v26, %v7013_v63  ;;  %v2158_v44 = vadd.f32 %v2073_v31, %v1914_v23  ;;  %v3059_v42 = vmin.f32 %v3027_v22, 6.0  ;;  %v2872_v2 = vrot.slane %v5496_v29, 2  ;;  %v482_v26 = vld [vmem:[%s4471_s17 + $0x1a8] sm:$0xff]  ;;  %s3602_s17 = sshll.u32 %s4243_s30, 12  ;;  %s3421_s30 = scalar_lea.sflag [#allocation4], %s4468_s23 }
 0x240   : > { %v2629_v11 = vsel %vm1471_vm2, %v2626_v6, %v7014_v45  ;;  %v793_v56 = vadd.f32 %v5319_v35, %v5401_v13  ;;  %v2957_v15 = vadd.f32 %v2871_v32, %v2713_v55  ;;  %v5910_v46 = vsel %vm1025_vm0, %v940_v7, 0.0  ;;  %3832 = vmatmul.mubr.f32.gmra.mxu0 %v482_v26  ;;  %s6584_s24 = scalar_lea.hbm %s6644_s8, %s3602_s17 }
 0x241   : > { %v2402_v62 = vadd.f32 %v2317_v53, %v2158_v44  ;;  %v1336_v1 = vmul.f32 %v4553_v27, %v5849_v20  ;;  %3888 = vmatmul.mubr.f32.gmra.mxu1 %v3059_v42  ;;  %v5916_v37 = vmul.f32 %v4550_v25, %v5910_v46  ;;  %v2873_v29 = vsel %vm1716_vm3, %v2870_v18, %v2872_v2 }
 0x242   : > { %v885_v13 = vmax.f32 %v793_v56, 0.0  ;;  %v5921_v6 = vmul.f32 %v4550_v25, %v5849_v20  ;;  %v2996_v23 = vadd.f32 %v5632_v9, %v2957_v15  ;;  %v5926_v33 = vmul.f32 %v4555_v28, %v5849_v20 }
 0x243   : > { %v2470_v5 = vadd.f32 %v2438_v17, %v2402_v62  ;;  %v808_v31 = vadd.f32 %v5319_v35, %v5419_v8  ;;  %v1325_v18 = vmul.f32 %v4553_v27, %v6986_v61  ;;  %v5935_v0 = vmul.f32 %v4550_v25, %v5338_v3 }
 0x244   : > { %7015 = vst [vmem:[#allocation69_spill] sm:$0xff] %v5921_v6  ;;  %7016 = vst [vmem:[#allocation27_spill] sm:$0xff] %v5926_v33  ;;  %v939_v22 = vmin.f32 %v885_v13, 6.0  ;;  %v6751_v4 = vrot.slane %v5921_v6, 1  ;;  %v3028_v63 = vmax.f32 %v2996_v23, 0.0  ;;  %v6750_v17 = vrot.slane %v5926_v33, 2 }
 0x245   : > { %v2714_v53 = vadd.f32 %v2629_v11, %v2470_v5  ;;  %v888_v55 = vmax.f32 %v808_v31, 0.0  ;;  %v6752_v35 = vrot.slane %v5935_v0, 1  ;;  %v5943_v8 = vmul.f32 %v4555_v28, %v5338_v3  ;;  %v7017_v31 = vld [vmem:[#allocation26_spill] sm:$0xff] }
 0x246   : > { %v1291_v32 = vsel %vm1084_vm1, %v939_v22, 0.0  ;;  %v1883_v61 = vmul.f32 %v4575_v48, %v5386_v19  ;;  %v3060_v7 = vmin.f32 %v3028_v63, 6.0  ;;  %v7018_v22 = vrot.slane %v7017_v31, 1  ;;  %v7028_v6 = vld [vmem:[#allocation70_spill] sm:$0xff] }
 0x247   : > { %v2958_v44 = vadd.f32 %v2873_v29, %v2714_v53  ;;  %v1419_v42 = vmul.f32 %v4550_v25, %v1291_v32  ;;  %v1664_v45 = vmul.f32 %v4555_v28, %v1291_v32  ;;  %v5950_v11 = vmul.f32 %v4577_v51, %v1291_v32 }
 0x248   : > { %v5953_v2 = vmul.f32 %v4579_v52, %v1291_v32  ;;  %v5956_v56 = vmul.f32 %v4589_v58, %v1291_v32  ;;  %v5959_v10 = vmul.f32 %v5493_v47, %v1291_v32  ;;  %3890 = vmatprep.mubr.f32.mxu1 %v3060_v7  ;;  %v942_v29 = vmin.f32 %v888_v55, 6.0 }
 0x249   : > { %v2997_v26 = vadd.f32 %v5632_v9, %v2958_v44  ;;  %v1545_v15 = vrot.slane %v1419_v42, 1  ;;  %v1790_v62 = vrot.slane %v1664_v45, 2  ;;  %v1519_v63 = vsel %vm1471_vm2, %v7018_v22, %v6752_v35 }
 0x24a   : > { %v1294_v7 = vsel %vm1084_vm1, %v942_v29, 0.0  ;;  %v1602_v57 = vadd.f32 %v1519_v63, %v1325_v18  ;;  %v2205_v16 = vmul.f32 %v4579_v52, %v5375_v38  ;;  %v2439_v18 = vmul.f32 %v4582_v54, %v5442_v36 }
 0x24b   : > { %v3029_v53 = vmax.f32 %v2997_v26, 0.0  ;;  %v1546_v32 = vsel %vm1471_vm2, %v6751_v4, %v1545_v15  ;;  %v1791_v55 = vsel %vm1716_vm3, %v6750_v17, %v1790_v62  ;;  %v5979_v42 = vmul.f32 %v4550_v25, %v1294_v7 }
 0x24c   : > { %v1613_v44 = vadd.f32 %v1546_v32, %v1336_v1  ;;  %v5982_v45 = vmul.f32 %v4555_v28, %v1294_v7  ;;  %v5985_v26 = vmul.f32 %v4577_v51, %v1294_v7  ;;  %v5988_v15 = vmul.f32 %v4579_v52, %v1294_v7 }
 0x24d   : > { %v3061_v31 = vmin.f32 %v3029_v53, 6.0  ;;  %v5991_v22 = vmul.f32 %v4589_v58, %v1294_v7  ;;  %v5994_v62 = vmul.f32 %v5493_v47, %v1294_v7  ;;  %v1763_v4 = vrot.slane %v5943_v8, 2 }
 0x24e   : > { %7019 = vst [vmem:[#allocation57_spill] sm:$0xff] %v5985_v26  ;;  %7020 = vst [vmem:[#allocation58_spill] sm:$0xff] %v5988_v15  ;;  %v5996_v1 = vadd.f32 %v1791_v55, %v1613_v44  ;;  %v1960_v7 = vmul.f32 %v4577_v51, %v5386_v19  ;;  %v1961_v55 = vmul.f32 %v4577_v51, %v5375_v38  ;;  %v2319_v29 = vrot.slane %v2205_v16, 2 }
 0x24f   : > { %7021 = vst [vmem:[#allocation24_spill] sm:$0xff] %v5994_v62  ;;  %3891 = vmatmul.mubr.f32.gmra.mxu1 %v3061_v31  ;;  %v2204_v44 = vmul.f32 %v4579_v52, %v5386_v19  ;;  %v7023_v31 = vld [vmem:[#allocation37_spill] sm:$0xff]  ;;  %v2516_v8 = vmul.f32 %v4589_v58, %v5442_v36  ;;  %v2517_v63 = vmul.f32 %v4589_v58, %v5586_v24 }
 0x250   : > { %7022 = vst [vmem:[#allocation28_spill] sm:$0xff] %v5996_v1  ;;  %v7024_v23 = vrot.slane %v7023_v31, 2  ;;  %v2074_v13 = vrot.slane %v1960_v7, 1  ;;  %v2075_v5 = vrot.slane %v1961_v55, 1  ;;  %v2760_v31 = vmul.f32 %v5493_v47, %v5442_v36 }
 0x251   : > { %v2318_v32 = vrot.slane %v2204_v44, 2  ;;  %v2630_v35 = vrot.slane %v2516_v8, 1  ;;  %v2631_v1 = vrot.slane %v2517_v63, 1  ;;  %v2761_v26 = vmul.f32 %v5493_v47, %v5586_v24  ;;  %v7025_v44 = vld [vmem:[#allocation68_spill] sm:$0xff] }
 0x252   : > { %v1764_v53 = vsel %vm1716_vm3, %v7024_v23, %v1763_v4  ;;  %v2076_v15 = vsel %vm1471_vm2, %v2074_v13, %v2075_v5  ;;  %v2874_v7 = vrot.slane %v2760_v31, 2  ;;  %v7026_v8 = vrot.slane %v7025_v44, 1  ;;  %v7030_v31 = vld [vmem:[#allocation36_spill] sm:$0xff] }
 0x253   : > { %v1847_v17 = vadd.f32 %v1764_v53, %v1602_v57  ;;  %v803_v57 = vadd.f32 %v6029_v49, %v5438_v30  ;;  %v2320_v16 = vsel %vm1716_vm3, %v2318_v32, %v2319_v29  ;;  %v2632_v53 = vsel %vm1471_vm2, %v2630_v35, %v2631_v1 }
 0x254   : > { %v2875_v13 = vrot.slane %v2761_v26, 2  ;;  %v7027_v63 = vrot.slane %v5935_v0, 1  ;;  %v7029_v30 = vrot.slane %v7028_v6, 2  ;;  %v1884_v35 = vmul.f32 %v4575_v48, %v5375_v38  ;;  %v7032_v0 = vld [vmem:[#allocation39_spill] sm:$0xff] }
 0x255   : > { %v1915_v23 = vadd.f32 %v1883_v61, %v1847_v17  ;;  %v1326_v17 = vmul.f32 %v4553_v27, %v5338_v3  ;;  %v887_v55 = vmax.f32 %v803_v57, 0.0  ;;  %v7031_v62 = vrot.slane %v7030_v31, 1 }
 0x256   : > { %v1521_v33 = vsel %vm1471_vm2, %v7027_v63, %v7026_v8  ;;  %v1766_v32 = vsel %vm1716_vm3, %v1763_v4, %v7029_v30  ;;  %v7033_v57 = vrot.slane %v7032_v0, 2  ;;  %v2440_v6 = vmul.f32 %v4582_v54, %v5586_v24  ;;  %v7034_v4 = vld [vmem:[#allocation76_spill] sm:$0xff]  ;;  %v7036_v8 = vld [vmem:[#allocation77_spill] sm:$0xff] }
 0x257   : > { %v2159_v61 = vadd.f32 %v2076_v15, %v1915_v23  ;;  %v1603_v12 = vadd.f32 %v1521_v33, %v1326_v17  ;;  %v2078_v3 = vsel %vm1471_vm2, %v2075_v5, %v7031_v62  ;;  %v2876_v15 = vsel %vm1716_vm3, %v2874_v7, %v2875_v13  ;;  %v7037_v62 = vld [vmem:[#allocation35_spill] sm:$0xff]  ;;  %v7038_v7 = vld [vmem:[#allocation38_spill] sm:$0xff] }
 0x258   : > { %v6051_v23 = vmin.f32 %v887_v55, 6.0  ;;  %v2322_v33 = vsel %vm1716_vm3, %v2319_v29, %v7033_v57  ;;  %v7035_v44 = vrot.slane %v7034_v4, 1  ;;  %v2877_v63 = vrot.slane %v7036_v8, 2 }
 0x259   : > { %v2403_v26 = vadd.f32 %v2320_v16, %v2159_v61  ;;  %v1848_v17 = vadd.f32 %v1766_v32, %v1603_v12  ;;  %v818_v16 = vadd.f32 %v6029_v49, %v7037_v62  ;;  %v813_v61 = vadd.f32 %v6029_v49, %v7038_v7  ;;  %v7041_v62 = vld [vmem:[#allocation40_spill] sm:$0xff] }
 0x25a   : > { %v2634_v38 = vsel %vm1471_vm2, %v2631_v1, %v7035_v44  ;;  %v1337_v29 = vmul.f32 %v4553_v27, %v5910_v46  ;;  %v2878_v55 = vsel %vm1716_vm3, %v2875_v13, %v2877_v63  ;;  %v6071_v30 = vmul.f32 %v4550_v25, %v6051_v23  ;;  %v7039_v63 = vld [vmem:[#allocation44_spill] sm:$0xff] }
 0x25b   : > { %v2471_v5 = vadd.f32 %v2439_v18, %v2403_v26  ;;  %v1916_v12 = vadd.f32 %v1884_v35, %v1848_v17  ;;  %v1547_v1 = vrot.slane %v5916_v37, 1  ;;  %v890_v18 = vmax.f32 %v818_v16, 0.0 }
 0x25c   : > { %v889_v31 = vmax.f32 %v813_v61, 0.0  ;;  %v1665_v26 = vmul.f32 %v4555_v28, %v5910_v46  ;;  %v6760_v57 = vrot.slane %v6071_v30, 1  ;;  %v6079_v35 = vmul.f32 %v4555_v28, %v6051_v23 }
 0x25d   : > { %v2715_v32 = vadd.f32 %v2632_v53, %v2471_v5  ;;  %v2160_v0 = vadd.f32 %v2078_v3, %v1916_v12  ;;  %v1327_v13 = vmul.f32 %v4553_v27, %v5386_v19  ;;  %v6083_v4 = vmin.f32 %v890_v18, 6.0 }
 0x25e   : > { %v943_v37 = vmin.f32 %v889_v31, 6.0  ;;  %v1792_v53 = vrot.slane %v1665_v26, 2  ;;  %v1549_v8 = vsel %vm1471_vm2, %v1547_v1, %v6760_v57  ;;  %v6759_v3 = vrot.slane %v6079_v35, 2  ;;  %v7052_v57 = vld [vmem:[#allocation48_spill] sm:$0xff] }
 0x25f   : > { %v2959_v17 = vadd.f32 %v2876_v15, %v2715_v32  ;;  %v2404_v44 = vadd.f32 %v2322_v33, %v2160_v0  ;;  %v7040_v5 = vrot.slane %v7039_v63, 1  ;;  %v7042_v16 = vrot.slane %v7041_v62, 1 }
 0x260   : > { %v1295_v15 = vsel %vm1025_vm0, %v943_v37, 0.0  ;;  %v1614_v61 = vadd.f32 %v1549_v8, %v1337_v29  ;;  %v1794_v1 = vsel %vm1716_vm3, %v1792_v53, %v6759_v3  ;;  %v7047_v8 = vld [vmem:[#allocation50_spill] sm:$0xff] }
 0x261   : > { %v1524_v7 = vsel %vm1471_vm2, %v7042_v16, %v7040_v5  ;;  %v2998_v19 = vadd.f32 %v5632_v9, %v2959_v17  ;;  %v2472_v33 = vadd.f32 %v2440_v6, %v2404_v44  ;;  %v1895_v32 = vmul.f32 %v4575_v48, %v1295_v15  ;;  %v7049_v5 = vld [vmem:[#allocation30_spill] sm:$0xff]  ;;  %v822_v6 = vpop.f32.mrf.mxu0 }
 0x262   : > { %v1604_v12 = vadd.f32 %v1524_v7, %v1327_v13  ;;  %v6102_v18 = vmul.f32 %v4577_v51, %v1295_v15  ;;  %v1859_v26 = vadd.f32 %v1794_v1, %v1614_v61  ;;  %v6105_v0 = vmul.f32 %v4579_v52, %v1295_v15 }
 0x263   : > { %v3030_v31 = vmax.f32 %v2998_v19, 0.0  ;;  %v6108_v21 = vmul.f32 %v4582_v54, %v1295_v15  ;;  %v2716_v29 = vadd.f32 %v2634_v38, %v2472_v33  ;;  %v6112_v13 = vmul.f32 %v4589_v58, %v1295_v15 }
 0x264   : > { %7043 = vst [vmem:[#allocation60_spill] sm:$0xff] %v6102_v18  ;;  %7044 = vst [vmem:[#allocation61_spill] sm:$0xff] %v6105_v0  ;;  %v6115_v17 = vmul.f32 %v5493_v47, %v1295_v15  ;;  %v6117_v53 = vadd.f32 %v1895_v32, %v1859_v26  ;;  %v7048_v63 = vrot.slane %v7047_v8, 2  ;;  %v7050_v62 = vrot.slane %v7049_v5, 2 }
 0x265   : > { %7045 = vst [vmem:[#allocation32_spill] sm:$0xff] %v6108_v21  ;;  %v3062_v37 = vmin.f32 %v3030_v31, 6.0  ;;  %v2960_v38 = vadd.f32 %v2878_v55, %v2716_v29  ;;  %v1885_v61 = vmul.f32 %v4575_v48, %v5442_v36  ;;  %v1963_v15 = vmul.f32 %v4577_v51, %v5442_v36 }
 0x266   : > { %7046 = vst [vmem:[#allocation33_spill] sm:$0xff] %v6117_v53  ;;  %v1769_v16 = vsel %vm1716_vm3, %v7050_v62, %v7048_v63  ;;  %v1964_v33 = vmul.f32 %v4577_v51, %v5586_v24  ;;  %v2207_v1 = vmul.f32 %v4579_v52, %v5442_v36  ;;  %v2208_v32 = vmul.f32 %v4579_v52, %v5586_v24  ;;  %v7054_v53 = vld [vmem:[#allocation49_spill] sm:$0xff] }
 0x267   : > { %v1849_v19 = vadd.f32 %v1769_v16, %v1604_v12  ;;  %3893 = vmatprep.mubr.f32.mxu1 %v3062_v37  ;;  %v2999_v55 = vadd.f32 %v5632_v9, %v2960_v38  ;;  %v2441_v12 = vmul.f32 %v4582_v54, %v5625_v41  ;;  %v2519_v26 = vmul.f32 %v4589_v58, %v5625_v41 }
 0x268   : > { %v2079_v29 = vrot.slane %v1963_v15, 1  ;;  %v2080_v37 = vrot.slane %v1964_v33, 1  ;;  %v2323_v8 = vrot.slane %v2207_v1, 2  ;;  %v2324_v63 = vrot.slane %v2208_v32, 2 }
 0x269   : > { %v1917_v31 = vadd.f32 %v1885_v61, %v1849_v19  ;;  %v3031_v5 = vmax.f32 %v2999_v55, 0.0  ;;  %v2520_v62 = vmul.f32 %v4589_v58, %v5615_v39  ;;  %v2635_v16 = vrot.slane %v2519_v26, 1  ;;  %v7051_v26 = vld [vmem:[#allocation78_spill] sm:$0xff] }
 0x26a   : > { %v2763_v44 = vmul.f32 %v5493_v47, %v5625_v41  ;;  %v2081_v38 = vsel %vm1471_vm2, %v2079_v29, %v2080_v37  ;;  %v2325_v19 = vsel %vm1716_vm3, %v2323_v8, %v2324_v63  ;;  %v2764_v61 = vmul.f32 %v5493_v47, %v5615_v39 }
 0x26b   : > { %v1886_v15 = vmul.f32 %v4575_v48, %v5586_v24  ;;  %v3063_v33 = vmin.f32 %v3031_v5, 6.0  ;;  %v2161_v1 = vadd.f32 %v2081_v38, %v1917_v31  ;;  %v2636_v32 = vrot.slane %v2520_v62, 1 }
 0x26c   : > { %v2879_v55 = vrot.slane %v2763_v44, 2  ;;  %v2880_v7 = vrot.slane %v2764_v61, 2  ;;  %v7053_v0 = vrot.slane %v7052_v57, 1  ;;  %v7055_v8 = vrot.slane %v7054_v53, 2 }
 0x26d   : > { %v1918_v3 = vadd.f32 %v1886_v15, %v7051_v26  ;;  %3894 = vmatmul.mubr.f32.gmra.mxu1 %v3063_v33  ;;  %v2405_v47 = vadd.f32 %v2325_v19, %v2161_v1  ;;  %v2637_v18 = vsel %vm1471_vm2, %v2635_v16, %v2636_v32  ;;  %v2442_v31 = vmul.f32 %v4582_v54, %v5615_v39 }
 0x26e   : > { %v2083_v29 = vsel %vm1471_vm2, %v2080_v37, %v7053_v0  ;;  %v2327_v21 = vsel %vm1716_vm3, %v2324_v63, %v7055_v8  ;;  %v7056_v44 = vrot.slane %v5730_v60, 1  ;;  %v2881_v62 = vsel %vm1716_vm3, %v2879_v55, %v2880_v7 }
 0x26f   : > { %v2162_v57 = vadd.f32 %v2083_v29, %v1918_v3  ;;  %v2882_v0 = vrot.slane %v5733_v50, 2  ;;  %v823_v53 = vadd.f32 %v6029_v49, %v822_v6  ;;  %v2473_v37 = vadd.f32 %v2441_v12, %v2405_v47 }
 0x270   : > { %v2639_v5 = vsel %vm1471_vm2, %v2636_v32, %v7056_v44  ;;  %v1338_v63 = vmul.f32 %v4553_v27, %v6051_v23  ;;  %v7057_v16 = vrot.slane %v5979_v42, 1  ;;  %v7058_v38 = vrot.slane %v6071_v30, 1 }
 0x271   : > { %v7059_v60 = vrot.slane %v5982_v45, 2  ;;  %v7060_v61 = vrot.slane %v6079_v35, 2  ;;  %v2406_v15 = vadd.f32 %v2327_v21, %v2162_v57  ;;  %v2883_v50 = vsel %vm1716_vm3, %v2880_v7, %v2882_v0 }
 0x272   : > { %v1551_v19 = vsel %vm1471_vm2, %v7058_v38, %v7057_v16  ;;  %v891_v49 = vmax.f32 %v823_v53, 0.0  ;;  %v1896_v6 = vmul.f32 %v4575_v48, %v6083_v4  ;;  %v2717_v12 = vadd.f32 %v2637_v18, %v2473_v37  ;;  %v6206_v53 = vld [vmem:[#allocation7 + $0x8] ss:$0 sm:$0xff] }
 0x273   : > { %v1796_v3 = vsel %vm1716_vm3, %v7060_v61, %v7059_v60  ;;  %v1615_v33 = vadd.f32 %v1551_v19, %v1338_v63  ;;  %v6184_v42 = vmul.f32 %v4577_v51, %v6083_v4  ;;  %v6188_v45 = vmul.f32 %v4579_v52, %v6083_v4 }
 0x274   : > { %v2474_v30 = vadd.f32 %v2442_v31, %v2406_v15  ;;  %v945_v35 = vmin.f32 %v891_v49, 6.0  ;;  %v1329_v21 = vmul.f32 %v4553_v27, %v5442_v36  ;;  %v1409_v7 = vmul.f32 %v4550_v25, %v5586_v24 }
 0x275   : > { %v2961_v1 = vadd.f32 %v2881_v62, %v2717_v12  ;;  %v1860_v32 = vadd.f32 %v1796_v3, %v1615_v33  ;;  %v2105_v18 = vrot.slane %v6184_v42, 1  ;;  %v2349_v55 = vrot.slane %v6188_v45, 2  ;;  %v6467_v42 = vld [vmem:[%s6642_s6] ss:$0 sm:$0xff] }
 0x276   : > { %v2718_v26 = vadd.f32 %v2639_v5, %v2474_v30  ;;  %v1297_v29 = vsel %vm1084_vm1, %v945_v35, 0.0  ;;  %v1528_v8 = vrot.slane %v1409_v7, 1  ;;  %v1654_v47 = vmul.f32 %v4555_v28, %v5586_v24  ;;  %v7061_v5 = vld [vmem:[#allocation31_spill] sm:$0xff] }
 0x277   : > { %v3000_v31 = vadd.f32 %v5632_v9, %v2961_v1  ;;  %v1928_v36 = vadd.f32 %v1896_v6, %v1860_v32  ;;  %v1980_v44 = vmul.f32 %v4577_v51, %v1297_v29  ;;  %v2224_v62 = vmul.f32 %v4579_v52, %v1297_v29  ;;  %v7063_v35 = vld [vmem:[#allocation43_spill] sm:$0xff] }
 0x278   : > { %v2962_v57 = vadd.f32 %v2883_v50, %v2718_v26  ;;  %v6204_v0 = vmul.f32 %v4589_v58, %v1297_v29  ;;  %v6209_v43 = vmul.f32 %v6206_v53, %v1297_v29  ;;  %v7062_v37 = vrot.slane %v7061_v5, 1 }
 0x279   : > { %v3032_v16 = vmax.f32 %v3000_v31, 0.0  ;;  %v2107_v38 = vrot.slane %v1980_v44, 1  ;;  %v2351_v19 = vrot.slane %v2224_v62, 2  ;;  %v1773_v50 = vrot.slane %v1654_v47, 2 }
 0x27a   : > { %v1529_v63 = vsel %vm1471_vm2, %v7062_v37, %v1528_v8  ;;  %v3001_v61 = vadd.f32 %v5632_v9, %v2962_v57  ;;  %v2658_v3 = vrot.slane %v6204_v0, 1  ;;  %v2902_v15 = vrot.slane %v6209_v43, 2  ;;  %v7119_v0 = vld [vmem:[#allocation61_spill] sm:$0xff] }
 0x27b   : > { %v1606_v60 = vadd.f32 %v1529_v63, %v1329_v21  ;;  %v3064_v49 = vmin.f32 %v3032_v16, 6.0  ;;  %v2108_v6 = vsel %vm1471_vm2, %v2105_v18, %v2107_v38  ;;  %v6223_v12 = vsel %vm1716_vm3, %v2349_v55, %v2351_v19 }
 0x27c   : > { %v1887_v33 = vmul.f32 %v4575_v48, %v5625_v41  ;;  %v3033_v30 = vmax.f32 %v3001_v61, 0.0  ;;  %v6227_v9 = vadd.f32 %v2108_v6, %v1928_v36  ;;  %v7064_v21 = vrot.slane %v7063_v35, 2 }
 0x27d   : > { %v1966_v1 = vmul.f32 %v4577_v51, %v5625_v41  ;;  %3896 = vmatprep.mubr.f32.mxu1 %v3064_v49  ;;  %v1967_v26 = vmul.f32 %v4577_v51, %v5615_v39  ;;  %v2210_v29 = vmul.f32 %v4579_v52, %v5625_v41  ;;  %v2211_v47 = vmul.f32 %v4579_v52, %v5615_v39 }
 0x27e   : > { %v1774_v7 = vsel %vm1716_vm3, %v7064_v21, %v1773_v50  ;;  %v3065_v31 = vmin.f32 %v3033_v30, 6.0  ;;  %v2443_v44 = vmul.f32 %v4582_v54, %v5685_v59  ;;  %v2522_v62 = vmul.f32 %v4589_v58, %v5685_v59 }
 0x27f   : > { %v1851_v32 = vadd.f32 %v1774_v7, %v1606_v60  ;;  %v2084_v36 = vrot.slane %v1966_v1, 1  ;;  %v2085_v5 = vrot.slane %v1967_v26, 1  ;;  %v2328_v37 = vrot.slane %v2210_v29, 2  ;;  %v7067_v29 = vld [vmem:[#allocation45_spill] sm:$0xff] }
 0x280   : > { %v2329_v63 = vrot.slane %v2211_v47, 2  ;;  %3897 = vmatmul.mubr.f32.gmra.mxu1 %v3065_v31  ;;  %v2523_v16 = vmul.f32 %v4589_v58, %v5814_v14  ;;  %v2640_v38 = vrot.slane %v2522_v62, 1  ;;  %v2766_v19 = vmul.f32 %v6206_v53, %v5685_v59 }
 0x281   : > { %v1919_v57 = vadd.f32 %v1887_v33, %v1851_v32  ;;  %v2767_v60 = vmul.f32 %v6206_v53, %v5814_v14  ;;  %v2086_v61 = vsel %vm1471_vm2, %v2084_v36, %v2085_v5  ;;  %v1330_v6 = vmul.f32 %v4553_v27, %v5586_v24  ;;  %v7065_v33 = vld [vmem:[#allocation51_spill] sm:$0xff] }
 0x282   : > { %v2330_v49 = vsel %vm1716_vm3, %v2328_v37, %v2329_v63  ;;  %v7066_v30 = vrot.slane %v7065_v33, 1  ;;  %v2641_v7 = vrot.slane %v2523_v16, 1  ;;  %v2884_v1 = vrot.slane %v2766_v19, 2 }
 0x283   : > { %v2163_v21 = vadd.f32 %v2086_v61, %v1919_v57  ;;  %v2885_v32 = vrot.slane %v2767_v60, 2  ;;  %v7068_v47 = vrot.slane %v7067_v29, 2  ;;  %v1888_v36 = vmul.f32 %v4575_v48, %v5615_v39  ;;  %v7070_v57 = vld [vmem:[#allocation64_spill] sm:$0xff]  ;;  %v7072_v61 = vld [vmem:[#allocation53_spill] sm:$0xff] }
 0x284   : > { %v1531_v35 = vsel %vm1471_vm2, %v1528_v8, %v7066_v30  ;;  %v7069_v62 = vrot.slane %v5724_v40, 1  ;;  %v2642_v33 = vsel %vm1471_vm2, %v2640_v38, %v2641_v7  ;;  %v7071_v16 = vrot.slane %v7070_v57, 2  ;;  %v7074_v40 = vld [vmem:[#allocation62_spill] sm:$0xff] }
 0x285   : > { %v1607_v26 = vadd.f32 %v1531_v35, %v1330_v6  ;;  %v1776_v31 = vsel %vm1716_vm3, %v1773_v50, %v7068_v47  ;;  %v2407_v37 = vadd.f32 %v2330_v49, %v2163_v21  ;;  %v2886_v8 = vsel %vm1716_vm3, %v2884_v1, %v2885_v32  ;;  %v7075_v49 = vld [vmem:[#allocation42_spill] sm:$0xff]  ;;  %v7077_v21 = vld [vmem:[#allocation41_spill] sm:$0xff] }
 0x286   : > { %v2088_v24 = vsel %vm1471_vm2, %v2085_v5, %v7069_v62  ;;  %v2332_v19 = vsel %vm1716_vm3, %v2329_v63, %v7071_v16  ;;  %v2444_v50 = vmul.f32 %v4582_v54, %v5814_v14  ;;  %v7073_v6 = vrot.slane %v7072_v61, 1  ;;  %v7081_v47 = vld [vmem:[#allocation54_spill] sm:$0xff] }
 0x287   : > { %v1852_v60 = vadd.f32 %v1776_v31, %v1607_v26  ;;  %v2887_v30 = vrot.slane %v7074_v40, 2  ;;  %v2475_v5 = vadd.f32 %v2443_v44, %v2407_v37  ;;  %v1331_v38 = vmul.f32 %v4553_v27, %v5625_v41  ;;  %v7079_v26 = vld [vmem:[#allocation59_spill] sm:$0xff] }
 0x288   : > { %v2644_v39 = vsel %vm1471_vm2, %v2641_v7, %v7073_v6  ;;  %v7076_v35 = vrot.slane %v7075_v49, 1  ;;  %v7078_v1 = vrot.slane %v7077_v21, 1  ;;  %v7080_v29 = vrot.slane %v7079_v26, 2 }
 0x289   : > { %v7082_v31 = vrot.slane %v7081_v47, 2  ;;  %v1920_v57 = vadd.f32 %v1888_v36, %v1852_v60  ;;  %v2888_v7 = vsel %vm1716_vm3, %v2885_v32, %v2887_v30  ;;  %v1889_v44 = vmul.f32 %v4575_v48, %v5685_v59 }
 0x28a   : > { %v1534_v63 = vsel %vm1471_vm2, %v7078_v1, %v7076_v35  ;;  %v1969_v41 = vmul.f32 %v4577_v51, %v5685_v59  ;;  %v2719_v37 = vadd.f32 %v2642_v33, %v2475_v5  ;;  %v1970_v61 = vmul.f32 %v4577_v51, %v5814_v14 }
 0x28b   : > { %v1779_v62 = vsel %vm1716_vm3, %v7082_v31, %v7080_v29  ;;  %v1608_v16 = vadd.f32 %v1534_v63, %v1331_v38  ;;  %v2213_v6 = vmul.f32 %v4579_v52, %v5685_v59  ;;  %v2164_v40 = vadd.f32 %v2088_v24, %v1920_v57  ;;  %v6308_v24 = vld [vmem:[%s6640_s4] ss:$0 sm:$0xff] }
 0x28c   : > { %v2089_v49 = vrot.slane %v1969_v41, 1  ;;  %v2214_v36 = vmul.f32 %v4579_v52, %v5814_v14  ;;  %v2445_v32 = vmul.f32 %v4582_v54, %v5858_v34  ;;  %v2963_v60 = vadd.f32 %v2886_v8, %v2719_v37 }
 0x28d   : > { %v1853_v30 = vadd.f32 %v1779_v62, %v1608_v16  ;;  %v2090_v35 = vrot.slane %v1970_v61, 1  ;;  %v2333_v21 = vrot.slane %v2213_v6, 2  ;;  %v2408_v33 = vadd.f32 %v2332_v19, %v2164_v40  ;;  %v7083_v40 = vld [vmem:[#allocation52_spill] sm:$0xff] }
 0x28e   : > { %v2334_v5 = vrot.slane %v2214_v36, 2  ;;  %v2525_v38 = vmul.f32 %v4589_v58, %v5858_v34  ;;  %v2526_v1 = vmul.f32 %v4589_v58, %v5849_v20  ;;  %v3002_v63 = vadd.f32 %v6308_v24, %v2963_v60 }
 0x28f   : > { %v1921_v26 = vadd.f32 %v1889_v44, %v1853_v30  ;;  %v2091_v8 = vsel %vm1471_vm2, %v2089_v49, %v2090_v35  ;;  %v2769_v19 = vmul.f32 %v6206_v53, %v5858_v34  ;;  %v2476_v29 = vadd.f32 %v2444_v50, %v2408_v33 }
 0x290   : > { %v2335_v47 = vsel %vm1716_vm3, %v2333_v21, %v2334_v5  ;;  %v2645_v31 = vrot.slane %v2525_v38, 1  ;;  %v2646_v62 = vrot.slane %v2526_v1, 1  ;;  %v3034_v57 = vmax.f32 %v3002_v63, 0.0  ;;  %v7085_v21 = vld [vmem:[#allocation56_spill] sm:$0xff]  ;;  %v7087_v63 = vld [vmem:[#allocation66_spill] sm:$0xff] }
 0x291   : > { %v2165_v41 = vadd.f32 %v2091_v8, %v1921_v26  ;;  %v2770_v37 = vmul.f32 %v6206_v53, %v5849_v20  ;;  %v2889_v16 = vrot.slane %v2769_v19, 2  ;;  %v2720_v61 = vadd.f32 %v2644_v39, %v2476_v29 }
 0x292   : > { %v2647_v6 = vsel %vm1471_vm2, %v2645_v31, %v2646_v62  ;;  %v1890_v44 = vmul.f32 %v4575_v48, %v5814_v14  ;;  %v7084_v49 = vrot.slane %v7083_v40, 1  ;;  %v3066_v36 = vmin.f32 %v3034_v57, 6.0 }
 0x293   : > { %v2409_v60 = vadd.f32 %v2335_v47, %v2165_v41  ;;  %v2890_v30 = vrot.slane %v2770_v37, 2  ;;  %v7086_v33 = vrot.slane %v7085_v21, 2  ;;  %v2964_v1 = vadd.f32 %v2888_v7, %v2720_v61 }
 0x294   : > { %v2093_v50 = vsel %vm1471_vm2, %v2090_v35, %v7084_v49  ;;  %v1922_v26 = vadd.f32 %v1890_v44, %v7087_v63  ;;  %v2446_v39 = vmul.f32 %v4582_v54, %v5849_v20  ;;  %v7088_v8 = vrot.slane %v5956_v56, 1  ;;  %3899 = vmatprep.mubr.f32.mxu1 %v3066_v36 }
 0x295   : > { %v2337_v38 = vsel %vm1716_vm3, %v2334_v5, %v7086_v33  ;;  %v2477_v29 = vadd.f32 %v2445_v32, %v2409_v60  ;;  %v2891_v35 = vsel %vm1716_vm3, %v2889_v16, %v2890_v30  ;;  %v2892_v47 = vrot.slane %v5959_v10, 2 }
 0x296   : > { %v2649_v19 = vsel %vm1471_vm2, %v2646_v62, %v7088_v8  ;;  %v1333_v31 = vmul.f32 %v4553_v27, %v5685_v59  ;;  %v3003_v7 = vadd.f32 %v6308_v24, %v2964_v1  ;;  %v2166_v5 = vadd.f32 %v2093_v50, %v1922_v26  ;;  %v7089_v50 = vld [vmem:[#allocation46_spill] sm:$0xff] }
 0x297   : > { %v1415_v57 = vmul.f32 %v4550_v25, %v5814_v14  ;;  %v1660_v56 = vmul.f32 %v4555_v28, %v5814_v14  ;;  %v2721_v41 = vadd.f32 %v2647_v6, %v2477_v29  ;;  %v2893_v62 = vsel %vm1716_vm3, %v2890_v30, %v2892_v47  ;;  %v7091_v30 = vld [vmem:[#allocation47_spill] sm:$0xff] }
 0x298   : > { %v1891_v32 = vmul.f32 %v4575_v48, %v5858_v34  ;;  %v1972_v10 = vmul.f32 %v4577_v51, %v5858_v34  ;;  %v3035_v37 = vmax.f32 %v3003_v7, 0.0  ;;  %v2410_v59 = vadd.f32 %v2337_v38, %v2166_v5 }
 0x299   : > { %v1538_v16 = vrot.slane %v1415_v57, 1  ;;  %v1783_v61 = vrot.slane %v1660_v56, 2  ;;  %v2965_v44 = vadd.f32 %v2891_v35, %v2721_v41  ;;  %v1973_v25 = vmul.f32 %v4577_v51, %v5849_v20 }
 0x29a   : > { %v2094_v40 = vrot.slane %v1972_v10, 1  ;;  %v2216_v28 = vmul.f32 %v4579_v52, %v5858_v34  ;;  %v3067_v6 = vmin.f32 %v3035_v37, 6.0  ;;  %v2478_v49 = vadd.f32 %v2446_v39, %v2410_v59 }
 0x29b   : > { %v7090_v36 = vrot.slane %v7089_v50, 1  ;;  %v7092_v21 = vrot.slane %v7091_v30, 2  ;;  %v3004_v38 = vadd.f32 %v6308_v24, %v2965_v44  ;;  %v2095_v63 = vrot.slane %v1973_v25, 1  ;;  %v7093_v50 = vld [vmem:[#allocation65_spill] sm:$0xff] }
 0x29c   : > { %v2217_v26 = vmul.f32 %v4579_v52, %v5849_v20  ;;  %3900 = vmatmul.mubr.f32.gmra.mxu1 %v3067_v6  ;;  %v2722_v8 = vadd.f32 %v2649_v19, %v2478_v49  ;;  %v2338_v29 = vrot.slane %v2216_v28, 2  ;;  %v2447_v39 = vmul.f32 %v4582_v54, %v5910_v46 }
 0x29d   : > { %v1539_v60 = vsel %vm1471_vm2, %v7090_v36, %v1538_v16  ;;  %v1784_v33 = vsel %vm1716_vm3, %v7092_v21, %v1783_v61  ;;  %v2528_v35 = vmul.f32 %v4589_v58, %v5910_v46  ;;  %v3036_v47 = vmax.f32 %v3004_v38, 0.0 }
 0x29e   : > { %v1610_v1 = vadd.f32 %v1539_v60, %v1333_v31  ;;  %v2096_v5 = vsel %vm1471_vm2, %v2094_v40, %v2095_v63  ;;  %v2339_v57 = vrot.slane %v2217_v26, 2  ;;  %v2966_v56 = vadd.f32 %v2893_v62, %v2722_v8 }
 0x29f   : > { %v2529_v31 = vmul.f32 %v4589_v58, %v6051_v23  ;;  %v2650_v41 = vrot.slane %v2528_v35, 1  ;;  %v2772_v19 = vmul.f32 %v6206_v53, %v5910_v46  ;;  %v3068_v10 = vmin.f32 %v3036_v47, 6.0 }
 0x2a0   : > { %v1855_v7 = vadd.f32 %v1784_v33, %v1610_v1  ;;  %v2340_v59 = vsel %vm1716_vm3, %v2338_v29, %v2339_v57  ;;  %v2773_v44 = vmul.f32 %v6206_v53, %v6051_v23  ;;  %v3005_v25 = vadd.f32 %v6308_v24, %v2966_v56 }
 0x2a1   : > { %v2651_v28 = vrot.slane %v2529_v31, 1  ;;  %v2894_v40 = vrot.slane %v2772_v19, 2  ;;  %v1334_v62 = vmul.f32 %v4553_v27, %v5814_v14  ;;  %3902 = vmatprep.mubr.f32.mxu1 %v3068_v10  ;;  %v7094_v36 = vrot.slane %v7093_v50, 1  ;;  %v7100_v19 = vld [vmem:[#allocation24_spill] sm:$0xff] }
 0x2a2   : > { %v1923_v37 = vadd.f32 %v1891_v32, %v1855_v7  ;;  %v2895_v49 = vrot.slane %v2773_v44, 2  ;;  %v7095_v32 = vld [vmem:[#allocation55_spill] sm:$0xff]  ;;  %v3037_v33 = vmax.f32 %v3005_v25, 0.0  ;;  %v1892_v26 = vmul.f32 %v4575_v48, %v5849_v20  ;;  %v6390_v7 = vpop.f32.mrf.mxu1 }
 0x2a3   : > { %v1541_v60 = vsel %vm1471_vm2, %v1538_v16, %v7094_v36  ;;  %v7096_v30 = vrot.slane %v7095_v32, 2  ;;  %v2652_v38 = vsel %vm1471_vm2, %v2650_v41, %v2651_v28  ;;  %v7097_v29 = vrot.slane %v5950_v11, 1  ;;  %v7105_v25 = vld [vmem:[#allocation27_spill] sm:$0xff] }
 0x2a4   : > { %v2167_v6 = vadd.f32 %v2096_v5, %v1923_v37  ;;  %v1611_v1 = vadd.f32 %v1541_v60, %v1334_v62  ;;  %v2896_v14 = vsel %vm1716_vm3, %v2894_v40, %v2895_v49  ;;  %v7098_v16 = vrot.slane %v5953_v2, 2  ;;  %v7101_v2 = vld [vmem:[#allocation69_spill] sm:$0xff]  ;;  %v7107_v62 = vld [vmem:[#allocation67_spill] sm:$0xff]  ;;  %v6417_v60 = vpop.f32.mrf.mxu1 }
 0x2a5   : > { %v1786_v21 = vsel %vm1716_vm3, %v1783_v61, %v7096_v30  ;;  %v2098_v35 = vsel %vm1471_vm2, %v2095_v63, %v7097_v29  ;;  %v3069_v61 = vmin.f32 %v3037_v33, 6.0  ;;  %v2448_v56 = vmul.f32 %v4582_v54, %v6051_v23 }
 0x2a6   : > { %v2411_v8 = vadd.f32 %v2340_v59, %v2167_v6  ;;  %v2342_v47 = vsel %vm1716_vm3, %v2339_v57, %v7098_v16  ;;  %v1856_v5 = vadd.f32 %v1786_v21, %v1611_v1  ;;  %v7099_v20 = vrot.slane %v5991_v22, 1  ;;  %v7103_v57 = vld [vmem:[#allocation63_spill] sm:$0xff] }
 0x2a7   : > { %v2897_v11 = vrot.slane %v7100_v19, 2  ;;  %v1335_v63 = vmul.f32 %v4553_v27, %v5858_v34  ;;  %v7102_v10 = vrot.slane %v7101_v2, 1  ;;  %v7104_v37 = vrot.slane %v7103_v57, 1  ;;  %3903 = vmatmul.mubr.f32.gmra.mxu1 %v3069_v61 }
 0x2a8   : > { %v2654_v31 = vsel %vm1471_vm2, %v2651_v28, %v7099_v20  ;;  %v2479_v41 = vadd.f32 %v2447_v39, %v2411_v8  ;;  %v1924_v44 = vadd.f32 %v1892_v26, %v1856_v5  ;;  %v7106_v40 = vrot.slane %v7105_v25, 2 }
 0x2a9   : > { %v1544_v59 = vsel %vm1471_vm2, %v7104_v37, %v7102_v10  ;;  %v7108_v22 = vrot.slane %v7107_v62, 2  ;;  %v1893_v39 = vmul.f32 %v4575_v48, %v5910_v46  ;;  %v1975_v27 = vmul.f32 %v4577_v51, %v5910_v46 }
 0x2aa   : > { %v2723_v34 = vadd.f32 %v2652_v38, %v2479_v41  ;;  %v2898_v6 = vsel %vm1716_vm3, %v2895_v49, %v2897_v11  ;;  %v1612_v50 = vadd.f32 %v1544_v59, %v1335_v63  ;;  %v1976_v36 = vmul.f32 %v4577_v51, %v6051_v23  ;;  %v3871_v38 = vpop.f32.mrf.mxu1 }
 0x2ab   : > { %v1789_v28 = vsel %vm1716_vm3, %v7108_v22, %v7106_v40  ;;  %v2168_v32 = vadd.f32 %v2098_v35, %v1924_v44  ;;  %v2099_v30 = vrot.slane %v1975_v27, 1  ;;  %v2219_v21 = vmul.f32 %v4579_v52, %v5910_v46  ;;  %v7110_v44 = vld [vmem:[#allocation57_spill] sm:$0xff]  ;;  %v7112_v40 = vld [vmem:[#allocation58_spill] sm:$0xff] }
 0x2ac   : > { %v2220_v33 = vmul.f32 %v4579_v52, %v6051_v23  ;;  %v2967_v1 = vadd.f32 %v2896_v14, %v2723_v34  ;;  %v1857_v26 = vadd.f32 %v1789_v28, %v1612_v50  ;;  %v2100_v8 = vrot.slane %v1976_v36, 1  ;;  %v3175_v57 = vpop.f32.mrf.mxu1  ;;  %v7115_v50 = vld [vmem:[#allocation60_spill] sm:$0xff] }
 0x2ad   : > { %v2532_v49 = vmul.f32 %v4589_v58, %v6083_v4  ;;  %v2412_v29 = vadd.f32 %v2342_v47, %v2168_v32  ;;  %v2343_v16 = vrot.slane %v2219_v21, 2  ;;  %v2776_v35 = vmul.f32 %v6206_v53, %v6083_v4 }
 0x2ae   : > { %v2344_v51 = vrot.slane %v2220_v33, 2  ;;  %v3006_v61 = vadd.f32 %v6308_v24, %v2967_v1  ;;  %v1925_v5 = vadd.f32 %v1893_v39, %v1857_v26  ;;  %v2101_v46 = vsel %vm1471_vm2, %v2099_v30, %v2100_v8  ;;  %v7117_v30 = vld [vmem:[#allocation32_spill] sm:$0xff] }
 0x2af   : > { %v2656_v20 = vrot.slane %v2532_v49, 1  ;;  %v2480_v52 = vadd.f32 %v2448_v56, %v2412_v29  ;;  %v2899_v41 = vrot.slane %v6115_v17, 2  ;;  %v2900_v19 = vrot.slane %v2776_v35, 2  ;;  %v3325_v29 = vld [vmem:[%s4488_s15 + $0x8] sm:$0xff] }
 0x2b0   : > { %v2345_v14 = vsel %vm1716_vm3, %v2343_v16, %v2344_v51  ;;  %v3038_v11 = vmax.f32 %v3006_v61, 0.0  ;;  %v2169_v63 = vadd.f32 %v2101_v46, %v1925_v5  ;;  %v7109_v47 = vrot.slane %v6112_v13, 1  ;;  %v7114_v13 = vld [vmem:[#allocation28_spill] sm:$0xff] }
 0x2b1   : > { %v1894_v10 = vmul.f32 %v4575_v48, %v6051_v23  ;;  %v2724_v37 = vadd.f32 %v2654_v31, %v2480_v52  ;;  %v2901_v59 = vsel %vm1716_vm3, %v2899_v41, %v2900_v19  ;;  %v7111_v56 = vrot.slane %v7110_v44, 1  ;;  %v3874_v48 = vpop.f32.mrf.mxu1  ;;  %v3327_v52 = vld [vmem:[%s4488_s15 + $0x18] sm:$0xff] }
 0x2b2   : > { %v2657_v2 = vsel %vm1471_vm2, %v7109_v47, %v2656_v20  ;;  %v7113_v17 = vrot.slane %v7112_v40, 2  ;;  %v3070_v22 = vmin.f32 %v3038_v11, 6.0  ;;  %v2413_v28 = vadd.f32 %v2345_v14, %v2169_v63 }
 0x2b3   : > { %v2103_v25 = vsel %vm1471_vm2, %v2100_v8, %v7111_v56  ;;  %v1926_v39 = vadd.f32 %v1894_v10, %v7114_v13  ;;  %v2450_v27 = vmul.f32 %v4582_v54, %v6083_v4  ;;  %v2968_v23 = vadd.f32 %v2898_v6, %v2724_v37  ;;  %v7118_v6 = vld [vmem:[#allocation33_spill] sm:$0xff]  ;;  %v3185_v16 = vpop.f32.mrf.mxu1  ;;  %v3329_v10 = vld [vmem:[%s4488_s15 + $0x28] sm:$0xff] }
 0x2b4   : > { %v2347_v62 = vsel %vm1716_vm3, %v2344_v51, %v7113_v17  ;;  %v2659_v31 = vsel %vm1471_vm2, %v2656_v20, %v2658_v3  ;;  %v2903_v34 = vsel %vm1716_vm3, %v2900_v19, %v2902_v15  ;;  %v7116_v36 = vrot.slane %v7115_v50, 1  ;;  %3905 = vmatprep.mubr.f32.mxu1 %v3070_v22  ;;  %v3324_v20 = vld [vmem:[%s4488_s15] sm:$0xff] }
 0x2b5   : > { %v2481_v4 = vadd.f32 %v7117_v30, %v2413_v28  ;;  %v2170_v21 = vadd.f32 %v2103_v25, %v1926_v39  ;;  %v7120_v3 = vrot.slane %v7119_v0, 2  ;;  %v3007_v15 = vadd.f32 %v6308_v24, %v2968_v23  ;;  %v3877_v14 = vpop.f32.mrf.mxu1  ;;  %v3328_v17 = vld [vmem:[%s4488_s15 + $0x20] sm:$0xff] }
 0x2b6   : > { %v2106_v32 = vsel %vm1471_vm2, %v7116_v36, %v2105_v18  ;;  %v2451_v18 = vmul.f32 0.0, %v4582_v54  ;;  %v2534_v1 = vmul.f32 0.0, %v4589_v58  ;;  %v2778_v26 = vmul.f32 0.0, %v6206_v53 }
 0x2b7   : > { %v2171_v33 = vadd.f32 %v2106_v32, %v7118_v6  ;;  %v2350_v43 = vsel %vm1716_vm3, %v7120_v3, %v2349_v55  ;;  %v2725_v45 = vadd.f32 %v2657_v2, %v2481_v4  ;;  %v2414_v8 = vadd.f32 %v2347_v62, %v2170_v21  ;;  %v3326_v2 = vld [vmem:[%s4488_s15 + $0x10] sm:$0xff]  ;;  %v3331_v62 = vld [vmem:[%s4488_s15 + $0x38] sm:$0xff]  ;;  %v3195_v22 = vpop.f32.mrf.mxu1 }
 0x2b8   : > { %v2416_v55 = vadd.f32 %v6223_v12, %v6227_v9  ;;  %v3039_v51 = vmax.f32 %v3007_v15, 0.0  ;;  %v2660_v35 = vrot.slane %v2534_v1, 1  ;;  %v2904_v61 = vrot.slane %v2778_v26, 2 }
 0x2b9   : > { %v2415_v49 = vadd.f32 %v2350_v43, %v2171_v33  ;;  %v3171_v54 = vadd.f32 %v6390_v7, %v6467_v42  ;;  %v2969_v58 = vadd.f32 %v2901_v59, %v2725_v45  ;;  %v2482_v5 = vadd.f32 %v2450_v27, %v2414_v8  ;;  %v3880_v6 = vpop.f32.mrf.mxu1  ;;  %v3333_v33 = vld [vmem:[%s4488_s15 + $0x48] sm:$0xff] }
 0x2ba   : > { %v2484_v46 = vadd.f32 %v2451_v18, %v2416_v55  ;;  %v3071_v41 = vmin.f32 %v3039_v51, 6.0  ;;  %v3166_v9 = vadd.f32 %v6467_v42, %v6417_v60  ;;  %v3181_v19 = vadd.f32 %v3871_v38, %v6467_v42  ;;  %v3335_v55 = vld [vmem:[%s4488_s15 + $0x58] sm:$0xff]  ;;  %v3334_v51 = vld [vmem:[%s4488_s15 + $0x50] sm:$0xff] }
 0x2bb   : > { %v2483_v53 = vadd.f32 %v2451_v18, %v2415_v49  ;;  %v3357_v12 = vadd.f32 %v3325_v29, %v3171_v54  ;;  %v3008_v11 = vadd.f32 %v6308_v24, %v2969_v58  ;;  %v2726_v7 = vadd.f32 %v2659_v31, %v2482_v5  ;;  %v3205_v15 = vpop.f32.mrf.mxu1  ;;  %v3332_v18 = vld [vmem:[%s4488_s15 + $0x40] sm:$0xff]  ;;  %v3337_v5 = vld [vmem:[%s4488_s15 + $0x68] sm:$0xff] }
 0x2bc   : > { %v2728_v47 = vadd.f32 %v2660_v35, %v2484_v46  ;;  %3906 = vmatmul.mubr.f32.gmra.mxu1 %v3071_v41  ;;  %v3356_v60 = vadd.f32 %v3324_v20, %v3166_v9  ;;  %v3359_v37 = vadd.f32 %v3327_v52, %v3181_v19  ;;  %v3176_v38 = vadd.f32 %v6467_v42, %v3175_v57  ;;  %v3336_v20 = vld [vmem:[%s4488_s15 + $0x60] sm:$0xff]  ;;  %v3339_v9 = vld [vmem:[%s4488_s15 + $0x78] sm:$0xff] }
 0x2bd   : > { %v2727_v63 = vadd.f32 %v2660_v35, %v2483_v53  ;;  %3389 = vst [vmem:[%s6488_s21 + $0x8] sm:$0xff] %v3357_v12  ;;  %v3191_v59 = vadd.f32 %v3874_v48, %v6467_v42  ;;  %v3040_v44 = vmax.f32 %v3008_v11, 0.0  ;;  %v2970_v56 = vadd.f32 %v2903_v34, %v2726_v7  ;;  %v3330_v34 = vld [vmem:[%s4488_s15 + $0x30] sm:$0xff] }
 0x2be   : > { %v2972_v40 = vadd.f32 %v2904_v61, %v2728_v47  ;;  %3388 = vst [vmem:[%s6488_s21] sm:$0xff] %v3356_v60  ;;  %3391 = vst [vmem:[%s6488_s21 + $0x18] sm:$0xff] %v3359_v37  ;;  %v3358_v28 = vadd.f32 %v3326_v2, %v3176_v38  ;;  %v3186_v39 = vadd.f32 %v6467_v42, %v3185_v16  ;;  %v3341_v38 = vld [vmem:[%s4488_s15 + $0x88] sm:$0xff] }
 0x2bf   : > { %v2971_v25 = vadd.f32 %v2904_v61, %v2727_v63  ;;  %v3361_v13 = vadd.f32 %v3329_v10, %v3191_v59  ;;  %v3201_v57 = vadd.f32 %v3877_v14, %v6467_v42  ;;  %v3072_v27 = vmin.f32 %v3040_v44, 6.0  ;;  %v3338_v63 = vld [vmem:[%s4488_s15 + $0x70] sm:$0xff] }
 0x2c0   : > { %v3009_v48 = vadd.f32 %v6308_v24, %v2970_v56  ;;  %v3011_v31 = vadd.f32 %v6308_v24, %v2972_v40  ;;  %3390 = vst [vmem:[%s6488_s21 + $0x10] sm:$0xff] %v3358_v28  ;;  %v3360_v50 = vadd.f32 %v3328_v17, %v3186_v39  ;;  %v3196_v32 = vadd.f32 %v6467_v42, %v3195_v22  ;;  %v3340_v56 = vld [vmem:[%s4488_s15 + $0x80] sm:$0xff]  ;;  %v3343_v22 = vld [vmem:[%s4488_s15 + $0x98] sm:$0xff]  ;;  %v3342_v39 = vld [vmem:[%s4488_s15 + $0x90] sm:$0xff] }
 0x2c1   : > { %v3010_v23 = vadd.f32 %v6308_v24, %v2971_v25  ;;  %3393 = vst [vmem:[%s6488_s21 + $0x28] sm:$0xff] %v3361_v13  ;;  %v3363_v36 = vadd.f32 %v3331_v62, %v3201_v57  ;;  %3908 = vmatprep.mubr.f32.mxu1 %v3072_v27  ;;  %v3211_v0 = vadd.f32 %v3880_v6, %v6467_v42  ;;  %v3347_v6 = vld [vmem:[%s4488_s15 + $0xb8] sm:$0xff] }
 0x2c2   : > { %v3041_v30 = vmax.f32 %v3009_v48, 0.0  ;;  %v3043_v21 = vmax.f32 %v3011_v31, 0.0  ;;  %3392 = vst [vmem:[%s6488_s21 + $0x20] sm:$0xff] %v3360_v50  ;;  %v3362_v24 = vadd.f32 %v3330_v34, %v3196_v32  ;;  %v3206_v26 = vadd.f32 %v6467_v42, %v3205_v15  ;;  %v3345_v31 = vld [vmem:[%s4488_s15 + $0xa8] sm:$0xff] }
 0x2c3   : > { %v3042_v4 = vmax.f32 %v3010_v23, 0.0  ;;  %3395 = vst [vmem:[%s6488_s21 + $0x38] sm:$0xff] %v3363_v36  ;;  %v3365_v1 = vadd.f32 %v3333_v33, %v3211_v0  ;;  %v3344_v36 = vld [vmem:[%s4488_s15 + $0xa0] sm:$0xff]  ;;  %v3346_v0 = vld [vmem:[%s4488_s15 + $0xb0] sm:$0xff] }
 0x2c4   : > { %v3073_v3 = vmin.f32 %v3041_v30, 6.0  ;;  %3394 = vst [vmem:[%s6488_s21 + $0x30] sm:$0xff] %v3362_v24  ;;  %v3075_v45 = vmin.f32 %v3043_v21, 6.0  ;;  %v3364_v8 = vadd.f32 %v3332_v18, %v3206_v26 }
 0x2c5   : > { %v3074_v43 = vmin.f32 %v3042_v4, 6.0  ;;  %3397 = vst [vmem:[%s6488_s21 + $0x48] sm:$0xff] %v3365_v1  ;;  %v3349_v1 = vld [vmem:[%s4488_s15 + $0xc8] sm:$0xff] }
 0x2c6   : > { %3909 = vmatmul.mubr.f32.gmra.mxu1 %v3073_v3  ;;  %3396 = vst [vmem:[%s6488_s21 + $0x40] sm:$0xff] %v3364_v8  ;;  %v3348_v8 = vld [vmem:[%s4488_s15 + $0xc0] sm:$0xff] }
 0x2c7   : > { %3911 = vmatprep.mubr.f32.mxu1 %v3074_v43 }
 0x2ca   : > { %3912 = vmatmul.mubr.f32.gmra.mxu1 %v3075_v45 }
 0x2d5   : > { %v3883_v49 = vpop.f32.mrf.mxu1 }
 0x2d6   : > { %v3221_v29 = vadd.f32 %v3883_v49, %v6467_v42 }
 0x2d7   : > { %v3215_v16 = vpop.f32.mrf.mxu1 }
 0x2d8   : > { %v3367_v35 = vadd.f32 %v3335_v55, %v3221_v29  ;;  %v3216_v61 = vadd.f32 %v6467_v42, %v3215_v16 }
 0x2da   : > { %3399 = vst [vmem:[%s6488_s21 + $0x58] sm:$0xff] %v3367_v35  ;;  %v3366_v54 = vadd.f32 %v3334_v51, %v3216_v61  ;;  %v3351_v51 = vld [vmem:[%s4488_s15 + $0xd8] sm:$0xff] }
 0x2dc   : > { %3398 = vst [vmem:[%s6488_s21 + $0x50] sm:$0xff] %v3366_v54  ;;  %v3350_v54 = vld [vmem:[%s4488_s15 + $0xd0] sm:$0xff] }
 0x2e2   : > { %v3886_v58 = vpop.f32.mrf.mxu1 }
 0x2e3   : > { %v3231_v53 = vadd.f32 %v3886_v58, %v6467_v42 }
 0x2e4   : > { %v3225_v46 = vpop.f32.mrf.mxu1 }
 0x2e5   : > { %v3369_v52 = vadd.f32 %v3337_v5, %v3231_v53  ;;  %v3226_v14 = vadd.f32 %v6467_v42, %v3225_v46 }
 0x2e7   : > { %3401 = vst [vmem:[%s6488_s21 + $0x68] sm:$0xff] %v3369_v52  ;;  %v3368_v41 = vadd.f32 %v3336_v20, %v3226_v14  ;;  %v3353_v20 = vld [vmem:[%s4488_s15 + $0xe8] sm:$0xff] }
 0x2e9   : > { %3400 = vst [vmem:[%s6488_s21 + $0x60] sm:$0xff] %v3368_v41  ;;  %v3352_v41 = vld [vmem:[%s4488_s15 + $0xe0] sm:$0xff] }
 0x300   : > { %v3833_v19 = vpop.f32.mrf.mxu0 }
 0x301   : > { %v3889_v12 = vpop.f32.mrf.mxu1 }
 0x302   : > { %v3241_v11 = vadd.f32 %v3889_v12, %v6467_v42  ;;  %v832_v47 = vpop.f32.mrf.mxu0 }
 0x303   : > { %v3235_v7 = vpop.f32.mrf.mxu1 }
 0x304   : > { %v3371_v2 = vadd.f32 %v3339_v9, %v3241_v11  ;;  %v3236_v10 = vadd.f32 %v6467_v42, %v3235_v7  ;;  %v3355_v11 = vld [vmem:[%s4488_s15 + $0xf8] sm:$0xff] }
 0x306   : > { %3403 = vst [vmem:[%s6488_s21 + $0x78] sm:$0xff] %v3371_v2  ;;  %v3370_v60 = vadd.f32 %v3338_v63, %v3236_v10  ;;  %v3354_v2 = vld [vmem:[%s4488_s15 + $0xf0] sm:$0xff]  ;;  %s4260_s15 = smov [#allocation11]  }
 0x307   : > { %s4163_s27 = sshll.u32 %s4260_s15, 4  ;;  %s4164_s27 = int_to_ptr.vmem [resolvable:$false] %s4163_s27 }
 0x308   : > { %3402 = vst [vmem:[%s6488_s21 + $0x70] sm:$0xff] %v3370_v60  ;;  %s4165_s16 = scalar_lea.vmem %s4164_s27, 8192  ;;  %p4166_p5 = scmp.lt.s32.totalorder %s6586_s10, %s4164_s27 }
 0x309   : > { %p4167_p7 = scmp.lt.s32.totalorder %s4165_s16, %s4159_s1 }
 0x30b   : > { %p4168_p9 = por %p4167_p7, %p4166_p5 }
 0x30d   : > { %p4169_p11 = pnand %p4168_p9, %p4162_p3 }
 0x30f   : > { %v3892_v37 = vpop.f32.mrf.mxu1 }
 0x310   : > { %v3251_v59 = vadd.f32 %v3892_v37, %v6467_v42 }
 0x311   : > { %v3245_v44 = vpop.f32.mrf.mxu1 }
 0x312   : > { %v3373_v25 = vadd.f32 %v3341_v38, %v3251_v59  ;;  %v3246_v40 = vadd.f32 %v6467_v42, %v3245_v44 }
 0x314   : > { %3405 = vst [vmem:[%s6488_s21 + $0x88] sm:$0xff] %v3373_v25  ;;  %v3372_v17 = vadd.f32 %v3340_v56, %v3246_v40 }
 0x316   : > { %3404 = vst [vmem:[%s6488_s21 + $0x80] sm:$0xff] %v3372_v17 }
 0x32d   : > { %v3895_v62 = vpop.f32.mrf.mxu1 }
 0x32e   : > { %v3261_v28 = vadd.f32 %v3895_v62, %v6467_v42 }
 0x32f   : > { %v3255_v13 = vpop.f32.mrf.mxu1 }
 0x330   : > { %v3375_v57 = vadd.f32 %v3343_v22, %v3261_v28  ;;  %v3256_v27 = vadd.f32 %v6467_v42, %v3255_v13 }
 0x332   : > { %3407 = vst [vmem:[%s6488_s21 + $0x98] sm:$0xff] %v3375_v57  ;;  %v3374_v48 = vadd.f32 %v3342_v39, %v3256_v27 }
 0x334   : > { %3406 = vst [vmem:[%s6488_s21 + $0x90] sm:$0xff] %v3374_v48 }
 0x340   : > { %v3898_v23 = vpop.f32.mrf.mxu1 }
 0x341   : > { %v3271_v34 = vadd.f32 %v3898_v23, %v6467_v42 }
 0x342   : > { %v3265_v50 = vpop.f32.mrf.mxu1 }
 0x343   : > { %v3377_v32 = vadd.f32 %v3345_v31, %v3271_v34  ;;  %v3266_v30 = vadd.f32 %v6467_v42, %v3265_v50 }
 0x345   : > { %3409 = vst [vmem:[%s6488_s21 + $0xa8] sm:$0xff] %v3377_v32  ;;  %v3376_v4 = vadd.f32 %v3344_v36, %v3266_v30 }
 0x347   : > { %3408 = vst [vmem:[%s6488_s21 + $0xa0] sm:$0xff] %v3376_v4 }
 0x35c   : > { %v3901_v21 = vpop.f32.mrf.mxu1 }
 0x35d   : > { %v3281_v33 = vadd.f32 %v3901_v21, %v6467_v42 }
 0x35e   : > { %v3275_v24 = vpop.f32.mrf.mxu1 }
 0x35f   : > { %v3379_v3 = vadd.f32 %v3347_v6, %v3281_v33  ;;  %v3276_v43 = vadd.f32 %v6467_v42, %v3275_v24 }
 0x361   : > { %3411 = vst [vmem:[%s6488_s21 + $0xb8] sm:$0xff] %v3379_v3  ;;  %v3378_v15 = vadd.f32 %v3346_v0, %v3276_v43 }
 0x363   : > { %3410 = vst [vmem:[%s6488_s21 + $0xb0] sm:$0xff] %v3378_v15 }
 0x367   : > { %v3904_v18 = vpop.f32.mrf.mxu1 }
 0x368   : > { %v3291_v26 = vadd.f32 %v3904_v18, %v6467_v42 }
 0x369   : > { %v3285_v45 = vpop.f32.mrf.mxu1 }
 0x36a   : > { %v3381_v49 = vadd.f32 %v3349_v1, %v3291_v26  ;;  %v3286_v55 = vadd.f32 %v6467_v42, %v3285_v45 }
 0x36c   : > { %3413 = vst [vmem:[%s6488_s21 + $0xc8] sm:$0xff] %v3381_v49  ;;  %v3380_v29 = vadd.f32 %v3348_v8, %v3286_v55 }
 0x36e   : > { %3412 = vst [vmem:[%s6488_s21 + $0xc0] sm:$0xff] %v3380_v29 }
 0x37c   : > { %v3907_v16 = vpop.f32.mrf.mxu1 }
 0x37d   : > { %v3301_v35 = vadd.f32 %v3907_v16, %v6467_v42 }
 0x37e   : > { %v3295_v61 = vpop.f32.mrf.mxu1 }
 0x37f   : > { %v3383_v58 = vadd.f32 %v3351_v51, %v3301_v35  ;;  %v3296_v5 = vadd.f32 %v6467_v42, %v3295_v61 }
 0x381   : > { %3415 = vst [vmem:[%s6488_s21 + $0xd8] sm:$0xff] %v3383_v58  ;;  %v3382_v53 = vadd.f32 %v3350_v54, %v3296_v5 }
 0x383   : > { %3414 = vst [vmem:[%s6488_s21 + $0xd0] sm:$0xff] %v3382_v53 }
 0x386   : > { %v3910_v46 = vpop.f32.mrf.mxu1 }
 0x387   : > { %v3311_v52 = vadd.f32 %v3910_v46, %v6467_v42 }
 0x388   : > { %v3305_v14 = vpop.f32.mrf.mxu1 }
 0x389   : > { %v3385_v12 = vadd.f32 %v3353_v20, %v3311_v52  ;;  %v3306_v9 = vadd.f32 %v6467_v42, %v3305_v14 }
 0x38a   : > { %v3913_v19 = vpop.f32.mrf.mxu1 }
 0x38b   : > { %3417 = vst [vmem:[%s6488_s21 + $0xe8] sm:$0xff] %v3385_v12  ;;  %v3384_v7 = vadd.f32 %v3352_v41, %v3306_v9  ;;  %v3321_v63 = vadd.f32 %v3913_v19, %v6467_v42 }
 0x38c   : > { %v3315_v47 = vpop.f32.mrf.mxu1 }
 0x38d   : > { %3416 = vst [vmem:[%s6488_s21 + $0xe0] sm:$0xff] %v3384_v7  ;;  %v3387_v10 = vadd.f32 %v3355_v11, %v3321_v63  ;;  %v3316_v60 = vadd.f32 %v6467_v42, %v3315_v47 }
 0x38f   : > { %3419 = vst [vmem:[%s6488_s21 + $0xf8] sm:$0xff] %v3387_v10  ;;  %v3386_v37 = vadd.f32 %v3354_v2, %v3316_v60 }
 0x391   : > { %3418 = vst [vmem:[%s6488_s21 + $0xf0] sm:$0xff] %v3386_v37 }
 0x392   : > { %4172 = shalt.err (!%p4169_p11)
}
 0x393   : > { %s4173_s29 = scalar_lea.hbm %s6584_s24, 4096  ;;  %s4177_s18 = scalar_lea.hbm %s6644_s8, 8192 }
 0x394   : > { %p4174_p10 = scmp.ne.s32.totalorder %s6584_s24, %s4173_s29  ;;  %p4178_p8 = scmp.lt.s32.totalorder %s6584_s24, %s6644_s8 }
 0x395   : > { %p4179_p0 = scmp.lt.s32.totalorder %s4177_s18, %s4173_s29 }
 0x396   : > { %p4175_p13 = pnand %p4174_p10, %p7121_p2 }
 0x397   : > { %p4180_p12 = por %p4179_p0, %p4178_p8 }
 0x398   : > { %p4176_p1 = pneg %p4175_p13 }
 0x39a   : > { %p4181_p4 = pnand %p4180_p12, %p4176_p1 }
 0x39c   : > { %4184 = shalt.err (!%p4181_p4)
}
 0x39d   : > { %s4261_s22 = smov 128   ;;  %s4262_s14 = smov 8  }
 0x39e   : > { %3933 = dma.vmem_to_hbm [thread:$0]  (%p7121_p2), %s6586_s10, 4096, %s6584_s24, %s3421_s30, %s4261_s22, %s4261_s22, %s4262_s14  }
 0x39f PF: > { %s7122_s21 = sld [smem:[#allocation17_spill]] }
 0x3a0   : > { %s7123_s17 = sld [smem:[#allocation20_spill]] }
 0x3a1   : > { %s7124_s11 = sld [smem:[#allocation19_spill]] }
 0x3a5   : > { %s3452_s13 = sand.u32 1, %s7122_s21  }
 0x3a6   : > { %p7125_p6 = scmp.ne.s32.totalorder %s7123_s17, 0  ;;  %s3453_s1 = scalar_lea.sflag [#allocation4], %s3452_s13 }
 0x3a7   : > { %p7126_p3 = scmp.ge.s32.totalorder %s7124_s11, 2 }
 0x3a9   : > { %p3953_p5 = pnand %p7126_p3, %p7125_p6 }
 0x3ab   : > { %p3954_p7 = pneg %p3953_p5 }
 0x3ad   : > { %4226 = dma.done.wait (%p3954_p7), %s3453_s1, 4096  }
 0x3ae   : > { %4228 = vsyncadd (%p3954_p7), %s3453_s1, 4294963200  ;;  %s26_s10 = sadd.s32 1, %s7124_s11   ;;  %s7127_s15 = sld [smem:[#allocation18_spill]] }
 0x3af   : > { %p23_p9 = scmp.ge.s32.totalorder %s26_s10, 4   ;;  %s7128_s29 = sld [smem:[#allocation22_spill]] }
 0x3b0   : > { %s7129_s26 = sld [smem:[#allocation21_spill]]  ;;  %s7130_s27 = smov %s4235_s28 }
 0x3b1   : > { %s7132_s30 = smov %s4247_s9 }
 0x3b2   :  { %25 = sbr.rel (!%p23_p9) target bundleno = 10 (0xa), region = 121 }
 0x3b4   : > { %s7131_s28 = smov %s7127_s15 }
 0x3b6   : > { %s7133_s9 = smov %s7129_s26 }
 0x3b7   :  { %3458 = vsyncpa [#allocation3], 1 }
 0x3b8   :  { %3460 = vsyncpa [#allocation3 + $0x1], 1 }
 0x3b9   :  { %3461 = vsyncpa [#allocation6], 1 }
 0x3ba   :  { %3462 = vsyncpa [#allocation9], 1 }
 0x3bb   :  { %3463 = vsyncpa [#allocation4], 1 }
 0x3bc   :  { %3465 = vsyncpa [#allocation4 + $0x1], 1 }

</bundles_post_ra>
